<compile_context>
chip_gen: v7x
topology: tpu7x:2x2x1
jax: 0.10.0
libtpu: 0.0.40
codegen_flags: <defaults>
</compile_context>

<pallas_src>
import numpy as np
import jax
import jax.numpy as jnp
from jax.experimental import pallas as pl
from jax.experimental.pallas import tpu as pltpu


# ----------------------------------------------------------------------------
# Kernel
# ----------------------------------------------------------------------------
def hacked_net_kernel(
    x1_ref, x2_ref,
    wih0_ref, whh0_ref, bi0_ref, bhn0_ref,
    w1c_ref, b1c_ref,
    wfold_ref, fc1w_ref, fc1b_ref, fc2wb_ref, bfold_ref,
    out_ref,
):
    f32 = jnp.float32
    B = x2_ref.shape[0]
    TB = x1_ref.shape[0]
    T = TB // B
    Hp = whh0_ref.shape[0]           # lane-padded hidden size (128)

    # ---- x2 branch: relu(fc1(x2)) @ fc2[:, 3:].T  (recurrence-independent)
    y2 = jnp.maximum(
        jnp.dot(x2_ref[...], fc1w_ref[...], preferred_element_type=f32)
        + fc1b_ref[...], 0.0)                                       # (B, 6)
    out2 = jnp.dot(y2, fc2wb_ref[...], preferred_element_type=f32)  # (B, 3)

    # ---- layer-0 input GEMM, hoisted: all timesteps in one matmul --------
    # x1_ref rows are time-major: row t*B + b  ==  x1[b, t, :].
    # bi0 already contains b_ih (all gates) + b_hh (r/z gates).
    gi0_all = (jnp.dot(x1_ref[...], wih0_ref[...], preferred_element_type=f32)
               + bi0_ref[...])                                      # (T*B, 3*Hp)

    bhn0 = bhn0_ref[...]                                            # (1, Hp)
    b1c = b1c_ref[...]                                              # (1, 4*Hp)

    h0 = jnp.zeros((B, Hp), f32)
    h1 = jnp.zeros((B, Hp), f32)

    # Statically unrolled time loop (T is known at trace time and small).
    for t in range(T):
        # ---- layer 0: one matmul on the dependent chain (k = Hp) --------
        gi0 = gi0_all[t * B:(t + 1) * B, :]                         # (B, 3*Hp)
        gh0 = jnp.dot(h0, whh0_ref[...], preferred_element_type=f32)
        r0 = jax.nn.sigmoid(gi0[:, 0:Hp] + gh0[:, 0:Hp])
        z0 = jax.nn.sigmoid(gi0[:, Hp:2 * Hp] + gh0[:, Hp:2 * Hp])
        n0 = jnp.tanh(gi0[:, 2 * Hp:3 * Hp]
                      + r0 * (gh0[:, 2 * Hp:3 * Hp] + bhn0))
        h0 = (1.0 - z0) * n0 + z0 * h0

        # ---- layer 1: single fused matmul over [h0, h1] ------------------
        # columns: [r | z | n_input | n_hidden], each Hp lanes wide.
        pre = (jnp.dot(jnp.concatenate([h0, h1], axis=1), w1c_ref[...],
                       preferred_element_type=f32) + b1c)           # (B, 4*Hp)
        r1 = jax.nn.sigmoid(pre[:, 0:Hp])
        z1 = jax.nn.sigmoid(pre[:, Hp:2 * Hp])
        n1 = jnp.tanh(pre[:, 2 * Hp:3 * Hp] + r1 * pre[:, 3 * Hp:4 * Hp])
        h1 = (1.0 - z1) * n1 + z1 * h1

    # ---- folded epilogue: (fc then fc2[:, :3]) as one (Hp, 3) matmul -----
    out = (jnp.dot(h1, wfold_ref[...], preferred_element_type=f32)
           + out2 + bfold_ref[...])
    out_ref[...] = out.astype(out_ref.dtype)


# ----------------------------------------------------------------------------
# Wrapper
# ----------------------------------------------------------------------------
def hacked_network_forward(x1, x2, kp):
    """x1: (B, T, I) float32, x2: (B, 4) float32 -> (B, 3) float32."""
    B, T, I = x1.shape
    # Layout plumbing only: time-major flattening so the kernel can do the
    # whole layer-0 input GEMM as one matmul (row t*B + b == x1[b, t, :]).
    x1_tm = jnp.transpose(x1, (1, 0, 2)).reshape(T * B, I)

    inputs = [
        x1_tm, x2,
        kp["wih0"], kp["whh0"], kp["bi0"], kp["bhn0"],
        kp["w1c"], kp["b1c"],
        kp["wfold"], kp["fc1w"], kp["fc1b"], kp["fc2wb"], kp["bfold"],
    ]

    def full_spec(a):
        n = a.ndim
        return pl.BlockSpec(a.shape, lambda i, n=n: (0,) * n)

    return pl.pallas_call(
        hacked_net_kernel,
        out_shape=jax.ShapeDtypeStruct((B, 3), jnp.float32),
        grid=(1,),
        in_specs=[full_spec(a) for a in inputs],
        out_specs=pl.BlockSpec((B, 3), lambda i: (0, 0)),
        compiler_params=pltpu.CompilerParams(
            dimension_semantics=("arbitrary",)),
    )(*inputs)


# ----------------------------------------------------------------------------
# Deterministic parameter construction (mirrors nn.Module __init__), plus the
# padded / folded kernel-side layout.
# ----------------------------------------------------------------------------
def make_params(input_size=7, hidden_size=120, hidden_pad=128, seed=0):
    H, Hp = hidden_size, hidden_pad
    key = jax.random.PRNGKey(seed)
    k = 1.0 / np.sqrt(H)

    def unif(kk, shape):
        return jax.random.uniform(kk, shape, jnp.float32, -k, k)

    keys = jax.random.split(key, 10)
    # PyTorch GRU layout: w_ih (3H, in), w_hh (3H, H), biases (3H,), gates r,z,n.
    wih0 = unif(keys[0], (3 * H, input_size))
    whh0 = unif(keys[1], (3 * H, H))
    bih0 = unif(keys[2], (3 * H,))
    bhh0 = unif(keys[3], (3 * H,))
    wih1 = unif(keys[4], (3 * H, H))
    whh1 = unif(keys[5], (3 * H, H))
    bih1 = unif(keys[6], (3 * H,))
    bhh1 = unif(keys[7], (3 * H,))
    # fc: Linear(H, 3)
    fcw = unif(keys[8], (3, H))
    fcb = unif(keys[9], (3,))

    # fc1: Linear(4, 6) with hand-set (frozen) weights from __init__
    fc1_w = np.zeros((6, 4), np.float32)
    fc1_b = np.array([-1.0, 0.0, -1.0, 0.0, -1.0, 0.0], np.float32)
    for j in (0, 2, 4):
        fc1_w[j, 3] = 1.0
    for j in (1, 3, 5):
        fc1_w[j, 3] = -10.0
    fc1_w[0, 0] = 1.0; fc1_w[1, 0] = 1.0
    fc1_w[2, 1] = 1.0; fc1_w[3, 1] = 1.0
    fc1_w[4, 2] = 1.0; fc1_w[5, 2] = 1.0

    # fc2: Linear(9, 3) with hand-set (frozen) weights from __init__
    fc2_w = np.zeros((3, 9), np.float32)
    for i in range(3):
        fc2_w[i, i] = 1.0
    fc2_w[0, 3] = -1000.0; fc2_w[0, 4] = -1000.0; fc2_w[0, 6] = -1000.0
    fc2_w[2, 6] = -1000.0; fc2_w[2, 7] = -1000.0; fc2_w[2, 8] = -1000.0
    fc2_b = np.zeros((3,), np.float32)

    # ----- reference (PyTorch-layout) parameters -----
    ref = dict(
        wih0=wih0, whh0=whh0, bih0=bih0, bhh0=bhh0,
        wih1=wih1, whh1=whh1, bih1=bih1, bhh1=bhh1,
        fcw=fcw, fcb=fcb,
        fc1w=jnp.asarray(fc1_w), fc1b=jnp.asarray(fc1_b),
        fc2w=jnp.asarray(fc2_w), fc2b=jnp.asarray(fc2_b),
    )

    # ----- kernel layout: gate-major, 128-lane padded, biases folded -----
    def gate_pad_w(w, in_dim):
        # torch (3H, in_dim) -> (in_pad, 3*Hp), gates at lane offsets 0/Hp/2Hp.
        in_pad = Hp if in_dim == H else in_dim
        out = np.zeros((in_pad, 3 * Hp), np.float32)
        wn = np.asarray(w)
        for g in range(3):
            out[:in_dim, g * Hp: g * Hp + H] = wn[g * H:(g + 1) * H, :].T
        return out

    def gate_pad_b(b):
        out = np.zeros((1, 3 * Hp), np.float32)
        bn = np.asarray(b)
        for g in range(3):
            out[0, g * Hp: g * Hp + H] = bn[g * H:(g + 1) * H]
        return out

    # Layer 0: fold b_hh (r/z) into the input bias; keep n-gate hidden bias.
    bi0 = gate_pad_b(bih0)
    bhh0_p = gate_pad_b(bhh0)
    bi0[:, :2 * Hp] += bhh0_p[:, :2 * Hp]
    bhn0 = bhh0_p[:, 2 * Hp:]                      # (1, Hp)

    # Layer 1: fused [h0, h1] weight with split n-gate columns.
    wi1, wh1 = np.asarray(wih1), np.asarray(whh1)
    bi1, bh1 = np.asarray(bih1), np.asarray(bhh1)
    w1c = np.zeros((2 * Hp, 4 * Hp), np.float32)   # rows: [h0 | h1]
    b1c = np.zeros((1, 4 * Hp), np.float32)        # cols: [r | z | n_i | n_h]
    # r gate
    w1c[0:H, 0:H] = wi1[0:H].T
    w1c[Hp:Hp + H, 0:H] = wh1[0:H].T
    b1c[0, 0:H] = bi1[0:H] + bh1[0:H]
    # z gate
    w1c[0:H, Hp:Hp + H] = wi1[H:2 * H].T
    w1c[Hp:Hp + H, Hp:Hp + H] = wh1[H:2 * H].T
    b1c[0, Hp:Hp + H] = bi1[H:2 * H] + bh1[H:2 * H]
    # n gate, input (h0) part
    w1c[0:H, 2 * Hp:2 * Hp + H] = wi1[2 * H:3 * H].T
    b1c[0, 2 * Hp:2 * Hp + H] = bi1[2 * H:3 * H]
    # n gate, hidden (h1) part
    w1c[Hp:Hp + H, 3 * Hp:3 * Hp + H] = wh1[2 * H:3 * H].T
    b1c[0, 3 * Hp:3 * Hp + H] = bh1[2 * H:3 * H]

    # Fold fc through the first 3 columns of fc2:  W' = fcw.T @ fc2[:, :3].T
    fc2wa = fc2_w[:, :3].T                         # (3, 3)
    fcw_pad = np.zeros((Hp, 3), np.float32)
    fcw_pad[:H, :] = np.asarray(fcw).T
    wfold = fcw_pad @ fc2wa                        # (Hp, 3)
    bfold = np.asarray(fcb)[None, :] @ fc2wa + fc2_b[None, :]   # (1, 3)

    kern = dict(
        wih0=jnp.asarray(gate_pad_w(wih0, input_size)),
        whh0=jnp.asarray(gate_pad_w(whh0, H)),
        bi0=jnp.asarray(bi0), bhn0=jnp.asarray(bhn0),
        w1c=jnp.asarray(w1c), b1c=jnp.asarray(b1c),
        wfold=jnp.asarray(wfold),
        fc1w=jnp.asarray(fc1_w.T), fc1b=jnp.asarray(fc1_b[None, :]),
        fc2wb=jnp.asarray(fc2_w[:, 3:].T),
        bfold=jnp.asarray(bfold),
    )
    return ref, kern


# ----------------------------------------------------------------------------
# Pure-JAX reference (same math as torch.nn.GRU + Linears)
# ----------------------------------------------------------------------------
def reference_forward(x1, x2, p):
    B, T, I = x1.shape
    H = p["whh0"].shape[1]
    hp = jax.lax.Precision.HIGHEST

    def cell(x, h, wih, whh, bih, bhh):
        gi = jnp.dot(x, wih.T, precision=hp) + bih
        gh = jnp.dot(h, whh.T, precision=hp) + bhh
        r = jax.nn.sigmoid(gi[:, :H] + gh[:, :H])
        z = jax.nn.sigmoid(gi[:, H:2 * H] + gh[:, H:2 * H])
        n = jnp.tanh(gi[:, 2 * H:] + r * gh[:, 2 * H:])
        return (1.0 - z) * n + z * h

    h0 = jnp.zeros((B, H), jnp.float32)
    h1 = jnp.zeros((B, H), jnp.float32)
    for t in range(T):
        h0 = cell(x1[:, t, :], h0, p["wih0"], p["whh0"], p["bih0"], p["bhh0"])
        h1 = cell(h0, h1, p["wih1"], p["whh1"], p["bih1"], p["bhh1"])
    y1 = jnp.dot(h1, p["fcw"].T, precision=hp) + p["fcb"]
    y2 = jax.nn.relu(jnp.dot(x2, p["fc1w"].T, precision=hp) + p["fc1b"])
    xc = jnp.concatenate([y1, y2], axis=-1)
    return jnp.dot(xc, p["fc2w"].T, precision=hp) + p["fc2b"]


# ----------------------------------------------------------------------------
if __name__ == "__main__":
    B, T, I, H = 2, 8, 7, 120
    # TODO(synk): optimizer (Adam) and MSELoss from __init__ are training-only
    # utilities and are not part of the forward pass; they are not implemented.

    ref_params, kern_params = make_params(input_size=I, hidden_size=H, seed=0)

    key = jax.random.PRNGKey(0)
    k1, k2 = jax.random.split(key)
    x1 = jax.random.normal(k1, (B, T, I), jnp.float32)
    x2 = jax.random.normal(k2, (B, 4), jnp.float32)

    out = jax.block_until_ready(hacked_network_forward(x1, x2, kern_params))

    ref = reference_forward(x1, x2, ref_params)
    np.testing.assert_allclose(np.asarray(out), np.asarray(ref),
                               rtol=1e-2, atol=1e-2)

    print("KERNEL_OK")
</pallas_src>

<mosaic_0001>
module attributes {stable_mosaic.version = 11 : i64} {
  func.func @hacked_net_kernel(%arg0: i32, %arg1: memref<16x7xf32, #tpu.memory_space<vmem>>, %arg2: memref<2x4xf32, #tpu.memory_space<vmem>>, %arg3: memref<7x384xf32, #tpu.memory_space<vmem>>, %arg4: memref<128x384xf32, #tpu.memory_space<vmem>>, %arg5: memref<1x384xf32, #tpu.memory_space<vmem>>, %arg6: memref<1x128xf32, #tpu.memory_space<vmem>>, %arg7: memref<256x512xf32, #tpu.memory_space<vmem>>, %arg8: memref<1x512xf32, #tpu.memory_space<vmem>>, %arg9: memref<128x3xf32, #tpu.memory_space<vmem>>, %arg10: memref<4x6xf32, #tpu.memory_space<vmem>>, %arg11: memref<1x6xf32, #tpu.memory_space<vmem>>, %arg12: memref<6x3xf32, #tpu.memory_space<vmem>>, %arg13: memref<1x3xf32, #tpu.memory_space<vmem>>, %arg14: memref<2x3xf32, #tpu.memory_space<vmem>>) attributes {dimension_semantics = [#tpu.dimension_semantics<arbitrary>], iteration_bounds = array<i64: 1>, scalar_prefetch = 0 : i64, scratch_operands = 0 : i64, tpu.core_type = #tpu.core_type<tc>, window_params = [{pipeline_mode = #tpu.pipeline_mode<synchronous>, transform_indices = @transform_0, window_bounds = array<i64: 16, 7>}, {pipeline_mode = #tpu.pipeline_mode<synchronous>, transform_indices = @transform_1, window_bounds = array<i64: 2, 4>}, {pipeline_mode = #tpu.pipeline_mode<synchronous>, transform_indices = @transform_2, window_bounds = array<i64: 7, 384>}, {pipeline_mode = #tpu.pipeline_mode<synchronous>, transform_indices = @transform_3, window_bounds = array<i64: 128, 384>}, {pipeline_mode = #tpu.pipeline_mode<synchronous>, transform_indices = @transform_4, window_bounds = array<i64: 1, 384>}, {pipeline_mode = #tpu.pipeline_mode<synchronous>, transform_indices = @transform_5, window_bounds = array<i64: 1, 128>}, {pipeline_mode = #tpu.pipeline_mode<synchronous>, transform_indices = @transform_6, window_bounds = array<i64: 256, 512>}, {pipeline_mode = #tpu.pipeline_mode<synchronous>, transform_indices = @transform_7, window_bounds = array<i64: 1, 512>}, {pipeline_mode = #tpu.pipeline_mode<synchronous>, transform_indices = @transform_8, window_bounds = array<i64: 128, 3>}, {pipeline_mode = #tpu.pipeline_mode<synchronous>, transform_indices = @transform_9, window_bounds = array<i64: 4, 6>}, {pipeline_mode = #tpu.pipeline_mode<synchronous>, transform_indices = @transform_10, window_bounds = array<i64: 1, 6>}, {pipeline_mode = #tpu.pipeline_mode<synchronous>, transform_indices = @transform_11, window_bounds = array<i64: 6, 3>}, {pipeline_mode = #tpu.pipeline_mode<synchronous>, transform_indices = @transform_12, window_bounds = array<i64: 1, 3>}, {pipeline_mode = #tpu.pipeline_mode<synchronous>, transform_indices = @transform_13, window_bounds = array<i64: 2, 3>}]} {
    %c0 = arith.constant 0 : index
    %c0_0 = arith.constant 0 : index
    %0 = vector.load %arg2[%c0, %c0_0] : memref<2x4xf32, #tpu.memory_space<vmem>>, vector<2x4xf32>
    %c0_1 = arith.constant 0 : index
    %c0_2 = arith.constant 0 : index
    %1 = vector.load %arg10[%c0_1, %c0_2] : memref<4x6xf32, #tpu.memory_space<vmem>>, vector<4x6xf32>
    %cst = arith.constant dense<0.000000e+00> : vector<2x6xf32>
    %2 = tpu.matmul %0, %1, %cst {dimension_numbers = #tpu.dot_dimension_numbers<[1], [0], [0], [1], [0, 0, 1, 1], [], []>} : vector<2x4xf32>, vector<4x6xf32>, vector<2x6xf32> -> vector<2x6xf32>
    %c0_3 = arith.constant 0 : index
    %c0_4 = arith.constant 0 : index
    %3 = vector.load %arg11[%c0_3, %c0_4] : memref<1x6xf32, #tpu.memory_space<vmem>>, vector<1x6xf32>
    %4 = vector.broadcast %3 : vector<1x6xf32> to vector<2x6xf32>
    %5 = arith.addf %2, %4 : vector<2x6xf32>
    %cst_5 = arith.constant 0.000000e+00 : f32
    %6 = vector.broadcast %cst_5 : f32 to vector<2x6xf32>
    %7 = arith.maximumf %5, %6 : vector<2x6xf32>
    %c0_6 = arith.constant 0 : index
    %c0_7 = arith.constant 0 : index
    %8 = vector.load %arg12[%c0_6, %c0_7] : memref<6x3xf32, #tpu.memory_space<vmem>>, vector<6x3xf32>
    %cst_8 = arith.constant dense<0.000000e+00> : vector<2x3xf32>
    %9 = tpu.matmul %7, %8, %cst_8 {dimension_numbers = #tpu.dot_dimension_numbers<[1], [0], [0], [1], [0, 0, 1, 1], [], []>} : vector<2x6xf32>, vector<6x3xf32>, vector<2x3xf32> -> vector<2x3xf32>
    %c0_9 = arith.constant 0 : index
    %c0_10 = arith.constant 0 : index
    %10 = vector.load %arg1[%c0_9, %c0_10] : memref<16x7xf32, #tpu.memory_space<vmem>>, vector<16x7xf32>
    %c0_11 = arith.constant 0 : index
    %c0_12 = arith.constant 0 : index
    %11 = vector.load %arg3[%c0_11, %c0_12] : memref<7x384xf32, #tpu.memory_space<vmem>>, vector<7x384xf32>
    %cst_13 = arith.constant dense<0.000000e+00> : vector<16x384xf32>
    %12 = tpu.matmul %10, %11, %cst_13 {dimension_numbers = #tpu.dot_dimension_numbers<[1], [0], [0], [1], [0, 0, 1, 1], [], []>} : vector<16x7xf32>, vector<7x384xf32>, vector<16x384xf32> -> vector<16x384xf32>
    %c0_14 = arith.constant 0 : index
    %c0_15 = arith.constant 0 : index
    %13 = vector.load %arg5[%c0_14, %c0_15] : memref<1x384xf32, #tpu.memory_space<vmem>>, vector<1x384xf32>
    %14 = vector.broadcast %13 : vector<1x384xf32> to vector<16x384xf32>
    %15 = arith.addf %12, %14 : vector<16x384xf32>
    %c0_16 = arith.constant 0 : index
    %c0_17 = arith.constant 0 : index
    %16 = vector.load %arg6[%c0_16, %c0_17] : memref<1x128xf32, #tpu.memory_space<vmem>>, vector<1x128xf32>
    %c0_18 = arith.constant 0 : index
    %c0_19 = arith.constant 0 : index
    %17 = vector.load %arg8[%c0_18, %c0_19] : memref<1x512xf32, #tpu.memory_space<vmem>>, vector<1x512xf32>
    %cst_20 = arith.constant 0.000000e+00 : f32
    %18 = vector.broadcast %cst_20 : f32 to vector<2x128xf32>
    %cst_21 = arith.constant 0.000000e+00 : f32
    %19 = vector.broadcast %cst_21 : f32 to vector<2x128xf32>
    %20 = vector.extract_strided_slice %15 {offsets = [0, 0], sizes = [2, 384], strides = [1, 1]} : vector<16x384xf32> to vector<2x384xf32>
    %c0_22 = arith.constant 0 : index
    %c0_23 = arith.constant 0 : index
    %21 = vector.load %arg4[%c0_22, %c0_23] : memref<128x384xf32, #tpu.memory_space<vmem>>, vector<128x384xf32>
    %cst_24 = arith.constant dense<0.000000e+00> : vector<2x384xf32>
    %22 = tpu.matmul %18, %21, %cst_24 {dimension_numbers = #tpu.dot_dimension_numbers<[1], [0], [0], [1], [0, 0, 1, 1], [], []>} : vector<2x128xf32>, vector<128x384xf32>, vector<2x384xf32> -> vector<2x384xf32>
    %23 = vector.extract_strided_slice %20 {offsets = [0, 0], sizes = [2, 128], strides = [1, 1]} : vector<2x384xf32> to vector<2x128xf32>
    %24 = vector.extract_strided_slice %22 {offsets = [0, 0], sizes = [2, 128], strides = [1, 1]} : vector<2x384xf32> to vector<2x128xf32>
    %25 = arith.addf %23, %24 : vector<2x128xf32>
    %26 = arith.negf %25 : vector<2x128xf32>
    %27 = math.exp %26 : vector<2x128xf32>
    %cst_25 = arith.constant 1.000000e+00 : f32
    %28 = vector.broadcast %cst_25 : f32 to vector<2x128xf32>
    %29 = arith.addf %28, %27 : vector<2x128xf32>
    %30 = arith.divf %28, %29 : vector<2x128xf32>
    %31 = vector.extract_strided_slice %20 {offsets = [0, 128], sizes = [2, 128], strides = [1, 1]} : vector<2x384xf32> to vector<2x128xf32>
    %32 = vector.extract_strided_slice %22 {offsets = [0, 128], sizes = [2, 128], strides = [1, 1]} : vector<2x384xf32> to vector<2x128xf32>
    %33 = arith.addf %31, %32 : vector<2x128xf32>
    %34 = arith.negf %33 : vector<2x128xf32>
    %35 = math.exp %34 : vector<2x128xf32>
    %cst_26 = arith.constant 1.000000e+00 : f32
    %36 = vector.broadcast %cst_26 : f32 to vector<2x128xf32>
    %37 = arith.addf %36, %35 : vector<2x128xf32>
    %38 = arith.divf %36, %37 : vector<2x128xf32>
    %39 = vector.extract_strided_slice %20 {offsets = [0, 256], sizes = [2, 128], strides = [1, 1]} : vector<2x384xf32> to vector<2x128xf32>
    %40 = vector.extract_strided_slice %22 {offsets = [0, 256], sizes = [2, 128], strides = [1, 1]} : vector<2x384xf32> to vector<2x128xf32>
    %41 = vector.broadcast %16 : vector<1x128xf32> to vector<2x128xf32>
    %42 = arith.addf %40, %41 : vector<2x128xf32>
    %43 = arith.mulf %30, %42 : vector<2x128xf32>
    %44 = arith.addf %39, %43 : vector<2x128xf32>
    %45 = math.tanh %44 : vector<2x128xf32>
    %cst_27 = arith.constant 1.000000e+00 : f32
    %46 = vector.broadcast %cst_27 : f32 to vector<2x128xf32>
    %47 = arith.subf %46, %38 : vector<2x128xf32>
    %48 = arith.mulf %47, %45 : vector<2x128xf32>
    %49 = arith.mulf %38, %18 : vector<2x128xf32>
    %50 = arith.addf %48, %49 : vector<2x128xf32>
    %51 = tpu.concatenate %50, %19 in 1 : vector<2x128xf32>, vector<2x128xf32> -> vector<2x256xf32>
    %c0_28 = arith.constant 0 : index
    %c0_29 = arith.constant 0 : index
    %52 = vector.load %arg7[%c0_28, %c0_29] : memref<256x512xf32, #tpu.memory_space<vmem>>, vector<256x512xf32>
    %cst_30 = arith.constant dense<0.000000e+00> : vector<2x512xf32>
    %53 = tpu.matmul %51, %52, %cst_30 {dimension_numbers = #tpu.dot_dimension_numbers<[1], [0], [0], [1], [0, 0, 1, 1], [], []>} : vector<2x256xf32>, vector<256x512xf32>, vector<2x512xf32> -> vector<2x512xf32>
    %54 = vector.broadcast %17 : vector<1x512xf32> to vector<2x512xf32>
    %55 = arith.addf %53, %54 : vector<2x512xf32>
    %56 = vector.extract_strided_slice %55 {offsets = [0, 0], sizes = [2, 128], strides = [1, 1]} : vector<2x512xf32> to vector<2x128xf32>
    %57 = arith.negf %56 : vector<2x128xf32>
    %58 = math.exp %57 : vector<2x128xf32>
    %cst_31 = arith.constant 1.000000e+00 : f32
    %59 = vector.broadcast %cst_31 : f32 to vector<2x128xf32>
    %60 = arith.addf %59, %58 : vector<2x128xf32>
    %61 = arith.divf %59, %60 : vector<2x128xf32>
    %62 = vector.extract_strided_slice %55 {offsets = [0, 128], sizes = [2, 128], strides = [1, 1]} : vector<2x512xf32> to vector<2x128xf32>
    %63 = arith.negf %62 : vector<2x128xf32>
    %64 = math.exp %63 : vector<2x128xf32>
    %cst_32 = arith.constant 1.000000e+00 : f32
    %65 = vector.broadcast %cst_32 : f32 to vector<2x128xf32>
    %66 = arith.addf %65, %64 : vector<2x128xf32>
    %67 = arith.divf %65, %66 : vector<2x128xf32>
    %68 = vector.extract_strided_slice %55 {offsets = [0, 256], sizes = [2, 128], strides = [1, 1]} : vector<2x512xf32> to vector<2x128xf32>
    %69 = vector.extract_strided_slice %55 {offsets = [0, 384], sizes = [2, 128], strides = [1, 1]} : vector<2x512xf32> to vector<2x128xf32>
    %70 = arith.mulf %61, %69 : vector<2x128xf32>
    %71 = arith.addf %68, %70 : vector<2x128xf32>
    %72 = math.tanh %71 : vector<2x128xf32>
    %cst_33 = arith.constant 1.000000e+00 : f32
    %73 = vector.broadcast %cst_33 : f32 to vector<2x128xf32>
    %74 = arith.subf %73, %67 : vector<2x128xf32>
    %75 = arith.mulf %74, %72 : vector<2x128xf32>
    %76 = arith.mulf %67, %19 : vector<2x128xf32>
    %77 = arith.addf %75, %76 : vector<2x128xf32>
    %78 = vector.extract_strided_slice %15 {offsets = [2, 0], sizes = [2, 384], strides = [1, 1]} : vector<16x384xf32> to vector<2x384xf32>
    %c0_34 = arith.constant 0 : index
    %c0_35 = arith.constant 0 : index
    %79 = vector.load %arg4[%c0_34, %c0_35] : memref<128x384xf32, #tpu.memory_space<vmem>>, vector<128x384xf32>
    %cst_36 = arith.constant dense<0.000000e+00> : vector<2x384xf32>
    %80 = tpu.matmul %50, %79, %cst_36 {dimension_numbers = #tpu.dot_dimension_numbers<[1], [0], [0], [1], [0, 0, 1, 1], [], []>} : vector<2x128xf32>, vector<128x384xf32>, vector<2x384xf32> -> vector<2x384xf32>
    %81 = vector.extract_strided_slice %78 {offsets = [0, 0], sizes = [2, 128], strides = [1, 1]} : vector<2x384xf32> to vector<2x128xf32>
    %82 = vector.extract_strided_slice %80 {offsets = [0, 0], sizes = [2, 128], strides = [1, 1]} : vector<2x384xf32> to vector<2x128xf32>
    %83 = arith.addf %81, %82 : vector<2x128xf32>
    %84 = arith.negf %83 : vector<2x128xf32>
    %85 = math.exp %84 : vector<2x128xf32>
    %cst_37 = arith.constant 1.000000e+00 : f32
    %86 = vector.broadcast %cst_37 : f32 to vector<2x128xf32>
    %87 = arith.addf %86, %85 : vector<2x128xf32>
    %88 = arith.divf %86, %87 : vector<2x128xf32>
    %89 = vector.extract_strided_slice %78 {offsets = [0, 128], sizes = [2, 128], strides = [1, 1]} : vector<2x384xf32> to vector<2x128xf32>
    %90 = vector.extract_strided_slice %80 {offsets = [0, 128], sizes = [2, 128], strides = [1, 1]} : vector<2x384xf32> to vector<2x128xf32>
    %91 = arith.addf %89, %90 : vector<2x128xf32>
    %92 = arith.negf %91 : vector<2x128xf32>
    %93 = math.exp %92 : vector<2x128xf32>
    %cst_38 = arith.constant 1.000000e+00 : f32
    %94 = vector.broadcast %cst_38 : f32 to vector<2x128xf32>
    %95 = arith.addf %94, %93 : vector<2x128xf32>
    %96 = arith.divf %94, %95 : vector<2x128xf32>
    %97 = vector.extract_strided_slice %78 {offsets = [0, 256], sizes = [2, 128], strides = [1, 1]} : vector<2x384xf32> to vector<2x128xf32>
    %98 = vector.extract_strided_slice %80 {offsets = [0, 256], sizes = [2, 128], strides = [1, 1]} : vector<2x384xf32> to vector<2x128xf32>
    %99 = vector.broadcast %16 : vector<1x128xf32> to vector<2x128xf32>
    %100 = arith.addf %98, %99 : vector<2x128xf32>
    %101 = arith.mulf %88, %100 : vector<2x128xf32>
    %102 = arith.addf %97, %101 : vector<2x128xf32>
    %103 = math.tanh %102 : vector<2x128xf32>
    %cst_39 = arith.constant 1.000000e+00 : f32
    %104 = vector.broadcast %cst_39 : f32 to vector<2x128xf32>
    %105 = arith.subf %104, %96 : vector<2x128xf32>
    %106 = arith.mulf %105, %103 : vector<2x128xf32>
    %107 = arith.mulf %96, %50 : vector<2x128xf32>
    %108 = arith.addf %106, %107 : vector<2x128xf32>
    %109 = tpu.concatenate %108, %77 in 1 : vector<2x128xf32>, vector<2x128xf32> -> vector<2x256xf32>
    %c0_40 = arith.constant 0 : index
    %c0_41 = arith.constant 0 : index
    %110 = vector.load %arg7[%c0_40, %c0_41] : memref<256x512xf32, #tpu.memory_space<vmem>>, vector<256x512xf32>
    %cst_42 = arith.constant dense<0.000000e+00> : vector<2x512xf32>
    %111 = tpu.matmul %109, %110, %cst_42 {dimension_numbers = #tpu.dot_dimension_numbers<[1], [0], [0], [1], [0, 0, 1, 1], [], []>} : vector<2x256xf32>, vector<256x512xf32>, vector<2x512xf32> -> vector<2x512xf32>
    %112 = vector.broadcast %17 : vector<1x512xf32> to vector<2x512xf32>
    %113 = arith.addf %111, %112 : vector<2x512xf32>
    %114 = vector.extract_strided_slice %113 {offsets = [0, 0], sizes = [2, 128], strides = [1, 1]} : vector<2x512xf32> to vector<2x128xf32>
    %115 = arith.negf %114 : vector<2x128xf32>
    %116 = math.exp %115 : vector<2x128xf32>
    %cst_43 = arith.constant 1.000000e+00 : f32
    %117 = vector.broadcast %cst_43 : f32 to vector<2x128xf32>
    %118 = arith.addf %117, %116 : vector<2x128xf32>
    %119 = arith.divf %117, %118 : vector<2x128xf32>
    %120 = vector.extract_strided_slice %113 {offsets = [0, 128], sizes = [2, 128], strides = [1, 1]} : vector<2x512xf32> to vector<2x128xf32>
    %121 = arith.negf %120 : vector<2x128xf32>
    %122 = math.exp %121 : vector<2x128xf32>
    %cst_44 = arith.constant 1.000000e+00 : f32
    %123 = vector.broadcast %cst_44 : f32 to vector<2x128xf32>
    %124 = arith.addf %123, %122 : vector<2x128xf32>
    %125 = arith.divf %123, %124 : vector<2x128xf32>
    %126 = vector.extract_strided_slice %113 {offsets = [0, 256], sizes = [2, 128], strides = [1, 1]} : vector<2x512xf32> to vector<2x128xf32>
    %127 = vector.extract_strided_slice %113 {offsets = [0, 384], sizes = [2, 128], strides = [1, 1]} : vector<2x512xf32> to vector<2x128xf32>
    %128 = arith.mulf %119, %127 : vector<2x128xf32>
    %129 = arith.addf %126, %128 : vector<2x128xf32>
    %130 = math.tanh %129 : vector<2x128xf32>
    %cst_45 = arith.constant 1.000000e+00 : f32
    %131 = vector.broadcast %cst_45 : f32 to vector<2x128xf32>
    %132 = arith.subf %131, %125 : vector<2x128xf32>
    %133 = arith.mulf %132, %130 : vector<2x128xf32>
    %134 = arith.mulf %125, %77 : vector<2x128xf32>
    %135 = arith.addf %133, %134 : vector<2x128xf32>
    %136 = vector.extract_strided_slice %15 {offsets = [4, 0], sizes = [2, 384], strides = [1, 1]} : vector<16x384xf32> to vector<2x384xf32>
    %c0_46 = arith.constant 0 : index
    %c0_47 = arith.constant 0 : index
    %137 = vector.load %arg4[%c0_46, %c0_47] : memref<128x384xf32, #tpu.memory_space<vmem>>, vector<128x384xf32>
    %cst_48 = arith.constant dense<0.000000e+00> : vector<2x384xf32>
    %138 = tpu.matmul %108, %137, %cst_48 {dimension_numbers = #tpu.dot_dimension_numbers<[1], [0], [0], [1], [0, 0, 1, 1], [], []>} : vector<2x128xf32>, vector<128x384xf32>, vector<2x384xf32> -> vector<2x384xf32>
    %139 = vector.extract_strided_slice %136 {offsets = [0, 0], sizes = [2, 128], strides = [1, 1]} : vector<2x384xf32> to vector<2x128xf32>
    %140 = vector.extract_strided_slice %138 {offsets = [0, 0], sizes = [2, 128], strides = [1, 1]} : vector<2x384xf32> to vector<2x128xf32>
    %141 = arith.addf %139, %140 : vector<2x128xf32>
    %142 = arith.negf %141 : vector<2x128xf32>
    %143 = math.exp %142 : vector<2x128xf32>
    %cst_49 = arith.constant 1.000000e+00 : f32
    %144 = vector.broadcast %cst_49 : f32 to vector<2x128xf32>
    %145 = arith.addf %144, %143 : vector<2x128xf32>
    %146 = arith.divf %144, %145 : vector<2x128xf32>
    %147 = vector.extract_strided_slice %136 {offsets = [0, 128], sizes = [2, 128], strides = [1, 1]} : vector<2x384xf32> to vector<2x128xf32>
    %148 = vector.extract_strided_slice %138 {offsets = [0, 128], sizes = [2, 128], strides = [1, 1]} : vector<2x384xf32> to vector<2x128xf32>
    %149 = arith.addf %147, %148 : vector<2x128xf32>
    %150 = arith.negf %149 : vector<2x128xf32>
    %151 = math.exp %150 : vector<2x128xf32>
    %cst_50 = arith.constant 1.000000e+00 : f32
    %152 = vector.broadcast %cst_50 : f32 to vector<2x128xf32>
    %153 = arith.addf %152, %151 : vector<2x128xf32>
    %154 = arith.divf %152, %153 : vector<2x128xf32>
    %155 = vector.extract_strided_slice %136 {offsets = [0, 256], sizes = [2, 128], strides = [1, 1]} : vector<2x384xf32> to vector<2x128xf32>
    %156 = vector.extract_strided_slice %138 {offsets = [0, 256], sizes = [2, 128], strides = [1, 1]} : vector<2x384xf32> to vector<2x128xf32>
    %157 = vector.broadcast %16 : vector<1x128xf32> to vector<2x128xf32>
    %158 = arith.addf %156, %157 : vector<2x128xf32>
    %159 = arith.mulf %146, %158 : vector<2x128xf32>
    %160 = arith.addf %155, %159 : vector<2x128xf32>
    %161 = math.tanh %160 : vector<2x128xf32>
    %cst_51 = arith.constant 1.000000e+00 : f32
    %162 = vector.broadcast %cst_51 : f32 to vector<2x128xf32>
    %163 = arith.subf %162, %154 : vector<2x128xf32>
    %164 = arith.mulf %163, %161 : vector<2x128xf32>
    %165 = arith.mulf %154, %108 : vector<2x128xf32>
    %166 = arith.addf %164, %165 : vector<2x128xf32>
    %167 = tpu.concatenate %166, %135 in 1 : vector<2x128xf32>, vector<2x128xf32> -> vector<2x256xf32>
    %c0_52 = arith.constant 0 : index
    %c0_53 = arith.constant 0 : index
    %168 = vector.load %arg7[%c0_52, %c0_53] : memref<256x512xf32, #tpu.memory_space<vmem>>, vector<256x512xf32>
    %cst_54 = arith.constant dense<0.000000e+00> : vector<2x512xf32>
    %169 = tpu.matmul %167, %168, %cst_54 {dimension_numbers = #tpu.dot_dimension_numbers<[1], [0], [0], [1], [0, 0, 1, 1], [], []>} : vector<2x256xf32>, vector<256x512xf32>, vector<2x512xf32> -> vector<2x512xf32>
    %170 = vector.broadcast %17 : vector<1x512xf32> to vector<2x512xf32>
    %171 = arith.addf %169, %170 : vector<2x512xf32>
    %172 = vector.extract_strided_slice %171 {offsets = [0, 0], sizes = [2, 128], strides = [1, 1]} : vector<2x512xf32> to vector<2x128xf32>
    %173 = arith.negf %172 : vector<2x128xf32>
    %174 = math.exp %173 : vector<2x128xf32>
    %cst_55 = arith.constant 1.000000e+00 : f32
    %175 = vector.broadcast %cst_55 : f32 to vector<2x128xf32>
    %176 = arith.addf %175, %174 : vector<2x128xf32>
    %177 = arith.divf %175, %176 : vector<2x128xf32>
    %178 = vector.extract_strided_slice %171 {offsets = [0, 128], sizes = [2, 128], strides = [1, 1]} : vector<2x512xf32> to vector<2x128xf32>
    %179 = arith.negf %178 : vector<2x128xf32>
    %180 = math.exp %179 : vector<2x128xf32>
    %cst_56 = arith.constant 1.000000e+00 : f32
    %181 = vector.broadcast %cst_56 : f32 to vector<2x128xf32>
    %182 = arith.addf %181, %180 : vector<2x128xf32>
    %183 = arith.divf %181, %182 : vector<2x128xf32>
    %184 = vector.extract_strided_slice %171 {offsets = [0, 256], sizes = [2, 128], strides = [1, 1]} : vector<2x512xf32> to vector<2x128xf32>
    %185 = vector.extract_strided_slice %171 {offsets = [0, 384], sizes = [2, 128], strides = [1, 1]} : vector<2x512xf32> to vector<2x128xf32>
    %186 = arith.mulf %177, %185 : vector<2x128xf32>
    %187 = arith.addf %184, %186 : vector<2x128xf32>
    %188 = math.tanh %187 : vector<2x128xf32>
    %cst_57 = arith.constant 1.000000e+00 : f32
    %189 = vector.broadcast %cst_57 : f32 to vector<2x128xf32>
    %190 = arith.subf %189, %183 : vector<2x128xf32>
    %191 = arith.mulf %190, %188 : vector<2x128xf32>
    %192 = arith.mulf %183, %135 : vector<2x128xf32>
    %193 = arith.addf %191, %192 : vector<2x128xf32>
    %194 = vector.extract_strided_slice %15 {offsets = [6, 0], sizes = [2, 384], strides = [1, 1]} : vector<16x384xf32> to vector<2x384xf32>
    %c0_58 = arith.constant 0 : index
    %c0_59 = arith.constant 0 : index
    %195 = vector.load %arg4[%c0_58, %c0_59] : memref<128x384xf32, #tpu.memory_space<vmem>>, vector<128x384xf32>
    %cst_60 = arith.constant dense<0.000000e+00> : vector<2x384xf32>
    %196 = tpu.matmul %166, %195, %cst_60 {dimension_numbers = #tpu.dot_dimension_numbers<[1], [0], [0], [1], [0, 0, 1, 1], [], []>} : vector<2x128xf32>, vector<128x384xf32>, vector<2x384xf32> -> vector<2x384xf32>
    %197 = vector.extract_strided_slice %194 {offsets = [0, 0], sizes = [2, 128], strides = [1, 1]} : vector<2x384xf32> to vector<2x128xf32>
    %198 = vector.extract_strided_slice %196 {offsets = [0, 0], sizes = [2, 128], strides = [1, 1]} : vector<2x384xf32> to vector<2x128xf32>
    %199 = arith.addf %197, %198 : vector<2x128xf32>
    %200 = arith.negf %199 : vector<2x128xf32>
    %201 = math.exp %200 : vector<2x128xf32>
    %cst_61 = arith.constant 1.000000e+00 : f32
    %202 = vector.broadcast %cst_61 : f32 to vector<2x128xf32>
    %203 = arith.addf %202, %201 : vector<2x128xf32>
    %204 = arith.divf %202, %203 : vector<2x128xf32>
    %205 = vector.extract_strided_slice %194 {offsets = [0, 128], sizes = [2, 128], strides = [1, 1]} : vector<2x384xf32> to vector<2x128xf32>
    %206 = vector.extract_strided_slice %196 {offsets = [0, 128], sizes = [2, 128], strides = [1, 1]} : vector<2x384xf32> to vector<2x128xf32>
    %207 = arith.addf %205, %206 : vector<2x128xf32>
    %208 = arith.negf %207 : vector<2x128xf32>
    %209 = math.exp %208 : vector<2x128xf32>
    %cst_62 = arith.constant 1.000000e+00 : f32
    %210 = vector.broadcast %cst_62 : f32 to vector<2x128xf32>
    %211 = arith.addf %210, %209 : vector<2x128xf32>
    %212 = arith.divf %210, %211 : vector<2x128xf32>
    %213 = vector.extract_strided_slice %194 {offsets = [0, 256], sizes = [2, 128], strides = [1, 1]} : vector<2x384xf32> to vector<2x128xf32>
    %214 = vector.extract_strided_slice %196 {offsets = [0, 256], sizes = [2, 128], strides = [1, 1]} : vector<2x384xf32> to vector<2x128xf32>
    %215 = vector.broadcast %16 : vector<1x128xf32> to vector<2x128xf32>
    %216 = arith.addf %214, %215 : vector<2x128xf32>
    %217 = arith.mulf %204, %216 : vector<2x128xf32>
    %218 = arith.addf %213, %217 : vector<2x128xf32>
    %219 = math.tanh %218 : vector<2x128xf32>
    %cst_63 = arith.constant 1.000000e+00 : f32
    %220 = vector.broadcast %cst_63 : f32 to vector<2x128xf32>
    %221 = arith.subf %220, %212 : vector<2x128xf32>
    %222 = arith.mulf %221, %219 : vector<2x128xf32>
    %223 = arith.mulf %212, %166 : vector<2x128xf32>
    %224 = arith.addf %222, %223 : vector<2x128xf32>
    %225 = tpu.concatenate %224, %193 in 1 : vector<2x128xf32>, vector<2x128xf32> -> vector<2x256xf32>
    %c0_64 = arith.constant 0 : index
    %c0_65 = arith.constant 0 : index
    %226 = vector.load %arg7[%c0_64, %c0_65] : memref<256x512xf32, #tpu.memory_space<vmem>>, vector<256x512xf32>
    %cst_66 = arith.constant dense<0.000000e+00> : vector<2x512xf32>
    %227 = tpu.matmul %225, %226, %cst_66 {dimension_numbers = #tpu.dot_dimension_numbers<[1], [0], [0], [1], [0, 0, 1, 1], [], []>} : vector<2x256xf32>, vector<256x512xf32>, vector<2x512xf32> -> vector<2x512xf32>
    %228 = vector.broadcast %17 : vector<1x512xf32> to vector<2x512xf32>
    %229 = arith.addf %227, %228 : vector<2x512xf32>
    %230 = vector.extract_strided_slice %229 {offsets = [0, 0], sizes = [2, 128], strides = [1, 1]} : vector<2x512xf32> to vector<2x128xf32>
    %231 = arith.negf %230 : vector<2x128xf32>
    %232 = math.exp %231 : vector<2x128xf32>
    %cst_67 = arith.constant 1.000000e+00 : f32
    %233 = vector.broadcast %cst_67 : f32 to vector<2x128xf32>
    %234 = arith.addf %233, %232 : vector<2x128xf32>
    %235 = arith.divf %233, %234 : vector<2x128xf32>
    %236 = vector.extract_strided_slice %229 {offsets = [0, 128], sizes = [2, 128], strides = [1, 1]} : vector<2x512xf32> to vector<2x128xf32>
    %237 = arith.negf %236 : vector<2x128xf32>
    %238 = math.exp %237 : vector<2x128xf32>
    %cst_68 = arith.constant 1.000000e+00 : f32
    %239 = vector.broadcast %cst_68 : f32 to vector<2x128xf32>
    %240 = arith.addf %239, %238 : vector<2x128xf32>
    %241 = arith.divf %239, %240 : vector<2x128xf32>
    %242 = vector.extract_strided_slice %229 {offsets = [0, 256], sizes = [2, 128], strides = [1, 1]} : vector<2x512xf32> to vector<2x128xf32>
    %243 = vector.extract_strided_slice %229 {offsets = [0, 384], sizes = [2, 128], strides = [1, 1]} : vector<2x512xf32> to vector<2x128xf32>
    %244 = arith.mulf %235, %243 : vector<2x128xf32>
    %245 = arith.addf %242, %244 : vector<2x128xf32>
    %246 = math.tanh %245 : vector<2x128xf32>
    %cst_69 = arith.constant 1.000000e+00 : f32
    %247 = vector.broadcast %cst_69 : f32 to vector<2x128xf32>
    %248 = arith.subf %247, %241 : vector<2x128xf32>
    %249 = arith.mulf %248, %246 : vector<2x128xf32>
    %250 = arith.mulf %241, %193 : vector<2x128xf32>
    %251 = arith.addf %249, %250 : vector<2x128xf32>
    %252 = vector.extract_strided_slice %15 {offsets = [8, 0], sizes = [2, 384], strides = [1, 1]} : vector<16x384xf32> to vector<2x384xf32>
    %c0_70 = arith.constant 0 : index
    %c0_71 = arith.constant 0 : index
    %253 = vector.load %arg4[%c0_70, %c0_71] : memref<128x384xf32, #tpu.memory_space<vmem>>, vector<128x384xf32>
    %cst_72 = arith.constant dense<0.000000e+00> : vector<2x384xf32>
    %254 = tpu.matmul %224, %253, %cst_72 {dimension_numbers = #tpu.dot_dimension_numbers<[1], [0], [0], [1], [0, 0, 1, 1], [], []>} : vector<2x128xf32>, vector<128x384xf32>, vector<2x384xf32> -> vector<2x384xf32>
    %255 = vector.extract_strided_slice %252 {offsets = [0, 0], sizes = [2, 128], strides = [1, 1]} : vector<2x384xf32> to vector<2x128xf32>
    %256 = vector.extract_strided_slice %254 {offsets = [0, 0], sizes = [2, 128], strides = [1, 1]} : vector<2x384xf32> to vector<2x128xf32>
    %257 = arith.addf %255, %256 : vector<2x128xf32>
    %258 = arith.negf %257 : vector<2x128xf32>
    %259 = math.exp %258 : vector<2x128xf32>
    %cst_73 = arith.constant 1.000000e+00 : f32
    %260 = vector.broadcast %cst_73 : f32 to vector<2x128xf32>
    %261 = arith.addf %260, %259 : vector<2x128xf32>
    %262 = arith.divf %260, %261 : vector<2x128xf32>
    %263 = vector.extract_strided_slice %252 {offsets = [0, 128], sizes = [2, 128], strides = [1, 1]} : vector<2x384xf32> to vector<2x128xf32>
    %264 = vector.extract_strided_slice %254 {offsets = [0, 128], sizes = [2, 128], strides = [1, 1]} : vector<2x384xf32> to vector<2x128xf32>
    %265 = arith.addf %263, %264 : vector<2x128xf32>
    %266 = arith.negf %265 : vector<2x128xf32>
    %267 = math.exp %266 : vector<2x128xf32>
    %cst_74 = arith.constant 1.000000e+00 : f32
    %268 = vector.broadcast %cst_74 : f32 to vector<2x128xf32>
    %269 = arith.addf %268, %267 : vector<2x128xf32>
    %270 = arith.divf %268, %269 : vector<2x128xf32>
    %271 = vector.extract_strided_slice %252 {offsets = [0, 256], sizes = [2, 128], strides = [1, 1]} : vector<2x384xf32> to vector<2x128xf32>
    %272 = vector.extract_strided_slice %254 {offsets = [0, 256], sizes = [2, 128], strides = [1, 1]} : vector<2x384xf32> to vector<2x128xf32>
    %273 = vector.broadcast %16 : vector<1x128xf32> to vector<2x128xf32>
    %274 = arith.addf %272, %273 : vector<2x128xf32>
    %275 = arith.mulf %262, %274 : vector<2x128xf32>
    %276 = arith.addf %271, %275 : vector<2x128xf32>
    %277 = math.tanh %276 : vector<2x128xf32>
    %cst_75 = arith.constant 1.000000e+00 : f32
    %278 = vector.broadcast %cst_75 : f32 to vector<2x128xf32>
    %279 = arith.subf %278, %270 : vector<2x128xf32>
    %280 = arith.mulf %279, %277 : vector<2x128xf32>
    %281 = arith.mulf %270, %224 : vector<2x128xf32>
    %282 = arith.addf %280, %281 : vector<2x128xf32>
    %283 = tpu.concatenate %282, %251 in 1 : vector<2x128xf32>, vector<2x128xf32> -> vector<2x256xf32>
    %c0_76 = arith.constant 0 : index
    %c0_77 = arith.constant 0 : index
    %284 = vector.load %arg7[%c0_76, %c0_77] : memref<256x512xf32, #tpu.memory_space<vmem>>, vector<256x512xf32>
    %cst_78 = arith.constant dense<0.000000e+00> : vector<2x512xf32>
    %285 = tpu.matmul %283, %284, %cst_78 {dimension_numbers = #tpu.dot_dimension_numbers<[1], [0], [0], [1], [0, 0, 1, 1], [], []>} : vector<2x256xf32>, vector<256x512xf32>, vector<2x512xf32> -> vector<2x512xf32>
    %286 = vector.broadcast %17 : vector<1x512xf32> to vector<2x512xf32>
    %287 = arith.addf %285, %286 : vector<2x512xf32>
    %288 = vector.extract_strided_slice %287 {offsets = [0, 0], sizes = [2, 128], strides = [1, 1]} : vector<2x512xf32> to vector<2x128xf32>
    %289 = arith.negf %288 : vector<2x128xf32>
    %290 = math.exp %289 : vector<2x128xf32>
    %cst_79 = arith.constant 1.000000e+00 : f32
    %291 = vector.broadcast %cst_79 : f32 to vector<2x128xf32>
    %292 = arith.addf %291, %290 : vector<2x128xf32>
    %293 = arith.divf %291, %292 : vector<2x128xf32>
    %294 = vector.extract_strided_slice %287 {offsets = [0, 128], sizes = [2, 128], strides = [1, 1]} : vector<2x512xf32> to vector<2x128xf32>
    %295 = arith.negf %294 : vector<2x128xf32>
    %296 = math.exp %295 : vector<2x128xf32>
    %cst_80 = arith.constant 1.000000e+00 : f32
    %297 = vector.broadcast %cst_80 : f32 to vector<2x128xf32>
    %298 = arith.addf %297, %296 : vector<2x128xf32>
    %299 = arith.divf %297, %298 : vector<2x128xf32>
    %300 = vector.extract_strided_slice %287 {offsets = [0, 256], sizes = [2, 128], strides = [1, 1]} : vector<2x512xf32> to vector<2x128xf32>
    %301 = vector.extract_strided_slice %287 {offsets = [0, 384], sizes = [2, 128], strides = [1, 1]} : vector<2x512xf32> to vector<2x128xf32>
    %302 = arith.mulf %293, %301 : vector<2x128xf32>
    %303 = arith.addf %300, %302 : vector<2x128xf32>
    %304 = math.tanh %303 : vector<2x128xf32>
    %cst_81 = arith.constant 1.000000e+00 : f32
    %305 = vector.broadcast %cst_81 : f32 to vector<2x128xf32>
    %306 = arith.subf %305, %299 : vector<2x128xf32>
    %307 = arith.mulf %306, %304 : vector<2x128xf32>
    %308 = arith.mulf %299, %251 : vector<2x128xf32>
    %309 = arith.addf %307, %308 : vector<2x128xf32>
    %310 = vector.extract_strided_slice %15 {offsets = [10, 0], sizes = [2, 384], strides = [1, 1]} : vector<16x384xf32> to vector<2x384xf32>
    %c0_82 = arith.constant 0 : index
    %c0_83 = arith.constant 0 : index
    %311 = vector.load %arg4[%c0_82, %c0_83] : memref<128x384xf32, #tpu.memory_space<vmem>>, vector<128x384xf32>
    %cst_84 = arith.constant dense<0.000000e+00> : vector<2x384xf32>
    %312 = tpu.matmul %282, %311, %cst_84 {dimension_numbers = #tpu.dot_dimension_numbers<[1], [0], [0], [1], [0, 0, 1, 1], [], []>} : vector<2x128xf32>, vector<128x384xf32>, vector<2x384xf32> -> vector<2x384xf32>
    %313 = vector.extract_strided_slice %310 {offsets = [0, 0], sizes = [2, 128], strides = [1, 1]} : vector<2x384xf32> to vector<2x128xf32>
    %314 = vector.extract_strided_slice %312 {offsets = [0, 0], sizes = [2, 128], strides = [1, 1]} : vector<2x384xf32> to vector<2x128xf32>
    %315 = arith.addf %313, %314 : vector<2x128xf32>
    %316 = arith.negf %315 : vector<2x128xf32>
    %317 = math.exp %316 : vector<2x128xf32>
    %cst_85 = arith.constant 1.000000e+00 : f32
    %318 = vector.broadcast %cst_85 : f32 to vector<2x128xf32>
    %319 = arith.addf %318, %317 : vector<2x128xf32>
    %320 = arith.divf %318, %319 : vector<2x128xf32>
    %321 = vector.extract_strided_slice %310 {offsets = [0, 128], sizes = [2, 128], strides = [1, 1]} : vector<2x384xf32> to vector<2x128xf32>
    %322 = vector.extract_strided_slice %312 {offsets = [0, 128], sizes = [2, 128], strides = [1, 1]} : vector<2x384xf32> to vector<2x128xf32>
    %323 = arith.addf %321, %322 : vector<2x128xf32>
    %324 = arith.negf %323 : vector<2x128xf32>
    %325 = math.exp %324 : vector<2x128xf32>
    %cst_86 = arith.constant 1.000000e+00 : f32
    %326 = vector.broadcast %cst_86 : f32 to vector<2x128xf32>
    %327 = arith.addf %326, %325 : vector<2x128xf32>
    %328 = arith.divf %326, %327 : vector<2x128xf32>
    %329 = vector.extract_strided_slice %310 {offsets = [0, 256], sizes = [2, 128], strides = [1, 1]} : vector<2x384xf32> to vector<2x128xf32>
    %330 = vector.extract_strided_slice %312 {offsets = [0, 256], sizes = [2, 128], strides = [1, 1]} : vector<2x384xf32> to vector<2x128xf32>
    %331 = vector.broadcast %16 : vector<1x128xf32> to vector<2x128xf32>
    %332 = arith.addf %330, %331 : vector<2x128xf32>
    %333 = arith.mulf %320, %332 : vector<2x128xf32>
    %334 = arith.addf %329, %333 : vector<2x128xf32>
    %335 = math.tanh %334 : vector<2x128xf32>
    %cst_87 = arith.constant 1.000000e+00 : f32
    %336 = vector.broadcast %cst_87 : f32 to vector<2x128xf32>
    %337 = arith.subf %336, %328 : vector<2x128xf32>
    %338 = arith.mulf %337, %335 : vector<2x128xf32>
    %339 = arith.mulf %328, %282 : vector<2x128xf32>
    %340 = arith.addf %338, %339 : vector<2x128xf32>
    %341 = tpu.concatenate %340, %309 in 1 : vector<2x128xf32>, vector<2x128xf32> -> vector<2x256xf32>
    %c0_88 = arith.constant 0 : index
    %c0_89 = arith.constant 0 : index
    %342 = vector.load %arg7[%c0_88, %c0_89] : memref<256x512xf32, #tpu.memory_space<vmem>>, vector<256x512xf32>
    %cst_90 = arith.constant dense<0.000000e+00> : vector<2x512xf32>
    %343 = tpu.matmul %341, %342, %cst_90 {dimension_numbers = #tpu.dot_dimension_numbers<[1], [0], [0], [1], [0, 0, 1, 1], [], []>} : vector<2x256xf32>, vector<256x512xf32>, vector<2x512xf32> -> vector<2x512xf32>
    %344 = vector.broadcast %17 : vector<1x512xf32> to vector<2x512xf32>
    %345 = arith.addf %343, %344 : vector<2x512xf32>
    %346 = vector.extract_strided_slice %345 {offsets = [0, 0], sizes = [2, 128], strides = [1, 1]} : vector<2x512xf32> to vector<2x128xf32>
    %347 = arith.negf %346 : vector<2x128xf32>
    %348 = math.exp %347 : vector<2x128xf32>
    %cst_91 = arith.constant 1.000000e+00 : f32
    %349 = vector.broadcast %cst_91 : f32 to vector<2x128xf32>
    %350 = arith.addf %349, %348 : vector<2x128xf32>
    %351 = arith.divf %349, %350 : vector<2x128xf32>
    %352 = vector.extract_strided_slice %345 {offsets = [0, 128], sizes = [2, 128], strides = [1, 1]} : vector<2x512xf32> to vector<2x128xf32>
    %353 = arith.negf %352 : vector<2x128xf32>
    %354 = math.exp %353 : vector<2x128xf32>
    %cst_92 = arith.constant 1.000000e+00 : f32
    %355 = vector.broadcast %cst_92 : f32 to vector<2x128xf32>
    %356 = arith.addf %355, %354 : vector<2x128xf32>
    %357 = arith.divf %355, %356 : vector<2x128xf32>
    %358 = vector.extract_strided_slice %345 {offsets = [0, 256], sizes = [2, 128], strides = [1, 1]} : vector<2x512xf32> to vector<2x128xf32>
    %359 = vector.extract_strided_slice %345 {offsets = [0, 384], sizes = [2, 128], strides = [1, 1]} : vector<2x512xf32> to vector<2x128xf32>
    %360 = arith.mulf %351, %359 : vector<2x128xf32>
    %361 = arith.addf %358, %360 : vector<2x128xf32>
    %362 = math.tanh %361 : vector<2x128xf32>
    %cst_93 = arith.constant 1.000000e+00 : f32
    %363 = vector.broadcast %cst_93 : f32 to vector<2x128xf32>
    %364 = arith.subf %363, %357 : vector<2x128xf32>
    %365 = arith.mulf %364, %362 : vector<2x128xf32>
    %366 = arith.mulf %357, %309 : vector<2x128xf32>
    %367 = arith.addf %365, %366 : vector<2x128xf32>
    %368 = vector.extract_strided_slice %15 {offsets = [12, 0], sizes = [2, 384], strides = [1, 1]} : vector<16x384xf32> to vector<2x384xf32>
    %c0_94 = arith.constant 0 : index
    %c0_95 = arith.constant 0 : index
    %369 = vector.load %arg4[%c0_94, %c0_95] : memref<128x384xf32, #tpu.memory_space<vmem>>, vector<128x384xf32>
    %cst_96 = arith.constant dense<0.000000e+00> : vector<2x384xf32>
    %370 = tpu.matmul %340, %369, %cst_96 {dimension_numbers = #tpu.dot_dimension_numbers<[1], [0], [0], [1], [0, 0, 1, 1], [], []>} : vector<2x128xf32>, vector<128x384xf32>, vector<2x384xf32> -> vector<2x384xf32>
    %371 = vector.extract_strided_slice %368 {offsets = [0, 0], sizes = [2, 128], strides = [1, 1]} : vector<2x384xf32> to vector<2x128xf32>
    %372 = vector.extract_strided_slice %370 {offsets = [0, 0], sizes = [2, 128], strides = [1, 1]} : vector<2x384xf32> to vector<2x128xf32>
    %373 = arith.addf %371, %372 : vector<2x128xf32>
    %374 = arith.negf %373 : vector<2x128xf32>
    %375 = math.exp %374 : vector<2x128xf32>
    %cst_97 = arith.constant 1.000000e+00 : f32
    %376 = vector.broadcast %cst_97 : f32 to vector<2x128xf32>
    %377 = arith.addf %376, %375 : vector<2x128xf32>
    %378 = arith.divf %376, %377 : vector<2x128xf32>
    %379 = vector.extract_strided_slice %368 {offsets = [0, 128], sizes = [2, 128], strides = [1, 1]} : vector<2x384xf32> to vector<2x128xf32>
    %380 = vector.extract_strided_slice %370 {offsets = [0, 128], sizes = [2, 128], strides = [1, 1]} : vector<2x384xf32> to vector<2x128xf32>
    %381 = arith.addf %379, %380 : vector<2x128xf32>
    %382 = arith.negf %381 : vector<2x128xf32>
    %383 = math.exp %382 : vector<2x128xf32>
    %cst_98 = arith.constant 1.000000e+00 : f32
    %384 = vector.broadcast %cst_98 : f32 to vector<2x128xf32>
    %385 = arith.addf %384, %383 : vector<2x128xf32>
    %386 = arith.divf %384, %385 : vector<2x128xf32>
    %387 = vector.extract_strided_slice %368 {offsets = [0, 256], sizes = [2, 128], strides = [1, 1]} : vector<2x384xf32> to vector<2x128xf32>
    %388 = vector.extract_strided_slice %370 {offsets = [0, 256], sizes = [2, 128], strides = [1, 1]} : vector<2x384xf32> to vector<2x128xf32>
    %389 = vector.broadcast %16 : vector<1x128xf32> to vector<2x128xf32>
    %390 = arith.addf %388, %389 : vector<2x128xf32>
    %391 = arith.mulf %378, %390 : vector<2x128xf32>
    %392 = arith.addf %387, %391 : vector<2x128xf32>
    %393 = math.tanh %392 : vector<2x128xf32>
    %cst_99 = arith.constant 1.000000e+00 : f32
    %394 = vector.broadcast %cst_99 : f32 to vector<2x128xf32>
    %395 = arith.subf %394, %386 : vector<2x128xf32>
    %396 = arith.mulf %395, %393 : vector<2x128xf32>
    %397 = arith.mulf %386, %340 : vector<2x128xf32>
    %398 = arith.addf %396, %397 : vector<2x128xf32>
    %399 = tpu.concatenate %398, %367 in 1 : vector<2x128xf32>, vector<2x128xf32> -> vector<2x256xf32>
    %c0_100 = arith.constant 0 : index
    %c0_101 = arith.constant 0 : index
    %400 = vector.load %arg7[%c0_100, %c0_101] : memref<256x512xf32, #tpu.memory_space<vmem>>, vector<256x512xf32>
    %cst_102 = arith.constant dense<0.000000e+00> : vector<2x512xf32>
    %401 = tpu.matmul %399, %400, %cst_102 {dimension_numbers = #tpu.dot_dimension_numbers<[1], [0], [0], [1], [0, 0, 1, 1], [], []>} : vector<2x256xf32>, vector<256x512xf32>, vector<2x512xf32> -> vector<2x512xf32>
    %402 = vector.broadcast %17 : vector<1x512xf32> to vector<2x512xf32>
    %403 = arith.addf %401, %402 : vector<2x512xf32>
    %404 = vector.extract_strided_slice %403 {offsets = [0, 0], sizes = [2, 128], strides = [1, 1]} : vector<2x512xf32> to vector<2x128xf32>
    %405 = arith.negf %404 : vector<2x128xf32>
    %406 = math.exp %405 : vector<2x128xf32>
    %cst_103 = arith.constant 1.000000e+00 : f32
    %407 = vector.broadcast %cst_103 : f32 to vector<2x128xf32>
    %408 = arith.addf %407, %406 : vector<2x128xf32>
    %409 = arith.divf %407, %408 : vector<2x128xf32>
    %410 = vector.extract_strided_slice %403 {offsets = [0, 128], sizes = [2, 128], strides = [1, 1]} : vector<2x512xf32> to vector<2x128xf32>
    %411 = arith.negf %410 : vector<2x128xf32>
    %412 = math.exp %411 : vector<2x128xf32>
    %cst_104 = arith.constant 1.000000e+00 : f32
    %413 = vector.broadcast %cst_104 : f32 to vector<2x128xf32>
    %414 = arith.addf %413, %412 : vector<2x128xf32>
    %415 = arith.divf %413, %414 : vector<2x128xf32>
    %416 = vector.extract_strided_slice %403 {offsets = [0, 256], sizes = [2, 128], strides = [1, 1]} : vector<2x512xf32> to vector<2x128xf32>
    %417 = vector.extract_strided_slice %403 {offsets = [0, 384], sizes = [2, 128], strides = [1, 1]} : vector<2x512xf32> to vector<2x128xf32>
    %418 = arith.mulf %409, %417 : vector<2x128xf32>
    %419 = arith.addf %416, %418 : vector<2x128xf32>
    %420 = math.tanh %419 : vector<2x128xf32>
    %cst_105 = arith.constant 1.000000e+00 : f32
    %421 = vector.broadcast %cst_105 : f32 to vector<2x128xf32>
    %422 = arith.subf %421, %415 : vector<2x128xf32>
    %423 = arith.mulf %422, %420 : vector<2x128xf32>
    %424 = arith.mulf %415, %367 : vector<2x128xf32>
    %425 = arith.addf %423, %424 : vector<2x128xf32>
    %426 = vector.extract_strided_slice %15 {offsets = [14, 0], sizes = [2, 384], strides = [1, 1]} : vector<16x384xf32> to vector<2x384xf32>
    %c0_106 = arith.constant 0 : index
    %c0_107 = arith.constant 0 : index
    %427 = vector.load %arg4[%c0_106, %c0_107] : memref<128x384xf32, #tpu.memory_space<vmem>>, vector<128x384xf32>
    %cst_108 = arith.constant dense<0.000000e+00> : vector<2x384xf32>
    %428 = tpu.matmul %398, %427, %cst_108 {dimension_numbers = #tpu.dot_dimension_numbers<[1], [0], [0], [1], [0, 0, 1, 1], [], []>} : vector<2x128xf32>, vector<128x384xf32>, vector<2x384xf32> -> vector<2x384xf32>
    %429 = vector.extract_strided_slice %426 {offsets = [0, 0], sizes = [2, 128], strides = [1, 1]} : vector<2x384xf32> to vector<2x128xf32>
    %430 = vector.extract_strided_slice %428 {offsets = [0, 0], sizes = [2, 128], strides = [1, 1]} : vector<2x384xf32> to vector<2x128xf32>
    %431 = arith.addf %429, %430 : vector<2x128xf32>
    %432 = arith.negf %431 : vector<2x128xf32>
    %433 = math.exp %432 : vector<2x128xf32>
    %cst_109 = arith.constant 1.000000e+00 : f32
    %434 = vector.broadcast %cst_109 : f32 to vector<2x128xf32>
    %435 = arith.addf %434, %433 : vector<2x128xf32>
    %436 = arith.divf %434, %435 : vector<2x128xf32>
    %437 = vector.extract_strided_slice %426 {offsets = [0, 128], sizes = [2, 128], strides = [1, 1]} : vector<2x384xf32> to vector<2x128xf32>
    %438 = vector.extract_strided_slice %428 {offsets = [0, 128], sizes = [2, 128], strides = [1, 1]} : vector<2x384xf32> to vector<2x128xf32>
    %439 = arith.addf %437, %438 : vector<2x128xf32>
    %440 = arith.negf %439 : vector<2x128xf32>
    %441 = math.exp %440 : vector<2x128xf32>
    %cst_110 = arith.constant 1.000000e+00 : f32
    %442 = vector.broadcast %cst_110 : f32 to vector<2x128xf32>
    %443 = arith.addf %442, %441 : vector<2x128xf32>
    %444 = arith.divf %442, %443 : vector<2x128xf32>
    %445 = vector.extract_strided_slice %426 {offsets = [0, 256], sizes = [2, 128], strides = [1, 1]} : vector<2x384xf32> to vector<2x128xf32>
    %446 = vector.extract_strided_slice %428 {offsets = [0, 256], sizes = [2, 128], strides = [1, 1]} : vector<2x384xf32> to vector<2x128xf32>
    %447 = vector.broadcast %16 : vector<1x128xf32> to vector<2x128xf32>
    %448 = arith.addf %446, %447 : vector<2x128xf32>
    %449 = arith.mulf %436, %448 : vector<2x128xf32>
    %450 = arith.addf %445, %449 : vector<2x128xf32>
    %451 = math.tanh %450 : vector<2x128xf32>
    %cst_111 = arith.constant 1.000000e+00 : f32
    %452 = vector.broadcast %cst_111 : f32 to vector<2x128xf32>
    %453 = arith.subf %452, %444 : vector<2x128xf32>
    %454 = arith.mulf %453, %451 : vector<2x128xf32>
    %455 = arith.mulf %444, %398 : vector<2x128xf32>
    %456 = arith.addf %454, %455 : vector<2x128xf32>
    %457 = tpu.concatenate %456, %425 in 1 : vector<2x128xf32>, vector<2x128xf32> -> vector<2x256xf32>
    %c0_112 = arith.constant 0 : index
    %c0_113 = arith.constant 0 : index
    %458 = vector.load %arg7[%c0_112, %c0_113] : memref<256x512xf32, #tpu.memory_space<vmem>>, vector<256x512xf32>
    %cst_114 = arith.constant dense<0.000000e+00> : vector<2x512xf32>
    %459 = tpu.matmul %457, %458, %cst_114 {dimension_numbers = #tpu.dot_dimension_numbers<[1], [0], [0], [1], [0, 0, 1, 1], [], []>} : vector<2x256xf32>, vector<256x512xf32>, vector<2x512xf32> -> vector<2x512xf32>
    %460 = vector.broadcast %17 : vector<1x512xf32> to vector<2x512xf32>
    %461 = arith.addf %459, %460 : vector<2x512xf32>
    %462 = vector.extract_strided_slice %461 {offsets = [0, 0], sizes = [2, 128], strides = [1, 1]} : vector<2x512xf32> to vector<2x128xf32>
    %463 = arith.negf %462 : vector<2x128xf32>
    %464 = math.exp %463 : vector<2x128xf32>
    %cst_115 = arith.constant 1.000000e+00 : f32
    %465 = vector.broadcast %cst_115 : f32 to vector<2x128xf32>
    %466 = arith.addf %465, %464 : vector<2x128xf32>
    %467 = arith.divf %465, %466 : vector<2x128xf32>
    %468 = vector.extract_strided_slice %461 {offsets = [0, 128], sizes = [2, 128], strides = [1, 1]} : vector<2x512xf32> to vector<2x128xf32>
    %469 = arith.negf %468 : vector<2x128xf32>
    %470 = math.exp %469 : vector<2x128xf32>
    %cst_116 = arith.constant 1.000000e+00 : f32
    %471 = vector.broadcast %cst_116 : f32 to vector<2x128xf32>
    %472 = arith.addf %471, %470 : vector<2x128xf32>
    %473 = arith.divf %471, %472 : vector<2x128xf32>
    %474 = vector.extract_strided_slice %461 {offsets = [0, 256], sizes = [2, 128], strides = [1, 1]} : vector<2x512xf32> to vector<2x128xf32>
    %475 = vector.extract_strided_slice %461 {offsets = [0, 384], sizes = [2, 128], strides = [1, 1]} : vector<2x512xf32> to vector<2x128xf32>
    %476 = arith.mulf %467, %475 : vector<2x128xf32>
    %477 = arith.addf %474, %476 : vector<2x128xf32>
    %478 = math.tanh %477 : vector<2x128xf32>
    %cst_117 = arith.constant 1.000000e+00 : f32
    %479 = vector.broadcast %cst_117 : f32 to vector<2x128xf32>
    %480 = arith.subf %479, %473 : vector<2x128xf32>
    %481 = arith.mulf %480, %478 : vector<2x128xf32>
    %482 = arith.mulf %473, %425 : vector<2x128xf32>
    %483 = arith.addf %481, %482 : vector<2x128xf32>
    %c0_118 = arith.constant 0 : index
    %c0_119 = arith.constant 0 : index
    %484 = vector.load %arg9[%c0_118, %c0_119] : memref<128x3xf32, #tpu.memory_space<vmem>>, vector<128x3xf32>
    %cst_120 = arith.constant dense<0.000000e+00> : vector<2x3xf32>
    %485 = tpu.matmul %483, %484, %cst_120 {dimension_numbers = #tpu.dot_dimension_numbers<[1], [0], [0], [1], [0, 0, 1, 1], [], []>} : vector<2x128xf32>, vector<128x3xf32>, vector<2x3xf32> -> vector<2x3xf32>
    %486 = arith.addf %485, %9 : vector<2x3xf32>
    %c0_121 = arith.constant 0 : index
    %c0_122 = arith.constant 0 : index
    %487 = vector.load %arg13[%c0_121, %c0_122] : memref<1x3xf32, #tpu.memory_space<vmem>>, vector<1x3xf32>
    %488 = vector.broadcast %487 : vector<1x3xf32> to vector<2x3xf32>
    %489 = arith.addf %486, %488 : vector<2x3xf32>
    %c0_123 = arith.constant 0 : index
    %c0_124 = arith.constant 0 : index
    %490 = vector.load %arg14[%c0_123, %c0_124] : memref<2x3xf32, #tpu.memory_space<vmem>>, vector<2x3xf32>
    tpu.vector_store %arg14[%c0_123, %c0_124], %489 {strides = array<i32>} : memref<2x3xf32, #tpu.memory_space<vmem>>, vector<2x3xf32>,
    return
  }
  func.func @transform_0(%arg0: i32) -> (i32, i32) {
    %c0_i32 = arith.constant 0 : i32
    %c0_i32_0 = arith.constant 0 : i32
    %c0_i32_1 = arith.constant 0 : i32
    return %c0_i32, %c0_i32_0 : i32, i32
  }
  func.func @transform_1(%arg0: i32) -> (i32, i32) {
    %c0_i32 = arith.constant 0 : i32
    %c0_i32_0 = arith.constant 0 : i32
    %c0_i32_1 = arith.constant 0 : i32
    return %c0_i32, %c0_i32_0 : i32, i32
  }
  func.func @transform_2(%arg0: i32) -> (i32, i32) {
    %c0_i32 = arith.constant 0 : i32
    %c0_i32_0 = arith.constant 0 : i32
    %c0_i32_1 = arith.constant 0 : i32
    return %c0_i32, %c0_i32_0 : i32, i32
  }
  func.func @transform_3(%arg0: i32) -> (i32, i32) {
    %c0_i32 = arith.constant 0 : i32
    %c0_i32_0 = arith.constant 0 : i32
    %c0_i32_1 = arith.constant 0 : i32
    return %c0_i32, %c0_i32_0 : i32, i32
  }
  func.func @transform_4(%arg0: i32) -> (i32, i32) {
    %c0_i32 = arith.constant 0 : i32
    %c0_i32_0 = arith.constant 0 : i32
    %c0_i32_1 = arith.constant 0 : i32
    return %c0_i32, %c0_i32_0 : i32, i32
  }
  func.func @transform_5(%arg0: i32) -> (i32, i32) {
    %c0_i32 = arith.constant 0 : i32
    %c0_i32_0 = arith.constant 0 : i32
    %c0_i32_1 = arith.constant 0 : i32
    return %c0_i32, %c0_i32_0 : i32, i32
  }
  func.func @transform_6(%arg0: i32) -> (i32, i32) {
    %c0_i32 = arith.constant 0 : i32
    %c0_i32_0 = arith.constant 0 : i32
    %c0_i32_1 = arith.constant 0 : i32
    return %c0_i32, %c0_i32_0 : i32, i32
  }
  func.func @transform_7(%arg0: i32) -> (i32, i32) {
    %c0_i32 = arith.constant 0 : i32
    %c0_i32_0 = arith.constant 0 : i32
    %c0_i32_1 = arith.constant 0 : i32
    return %c0_i32, %c0_i32_0 : i32, i32
  }
  func.func @transform_8(%arg0: i32) -> (i32, i32) {
    %c0_i32 = arith.constant 0 : i32
    %c0_i32_0 = arith.constant 0 : i32
    %c0_i32_1 = arith.constant 0 : i32
    return %c0_i32, %c0_i32_0 : i32, i32
  }
  func.func @transform_9(%arg0: i32) -> (i32, i32) {
    %c0_i32 = arith.constant 0 : i32
    %c0_i32_0 = arith.constant 0 : i32
    %c0_i32_1 = arith.constant 0 : i32
    return %c0_i32, %c0_i32_0 : i32, i32
  }
  func.func @transform_10(%arg0: i32) -> (i32, i32) {
    %c0_i32 = arith.constant 0 : i32
    %c0_i32_0 = arith.constant 0 : i32
    %c0_i32_1 = arith.constant 0 : i32
    return %c0_i32, %c0_i32_0 : i32, i32
  }
  func.func @transform_11(%arg0: i32) -> (i32, i32) {
    %c0_i32 = arith.constant 0 : i32
    %c0_i32_0 = arith.constant 0 : i32
    %c0_i32_1 = arith.constant 0 : i32
    return %c0_i32, %c0_i32_0 : i32, i32
  }
  func.func @transform_12(%arg0: i32) -> (i32, i32) {
    %c0_i32 = arith.constant 0 : i32
    %c0_i32_0 = arith.constant 0 : i32
    %c0_i32_1 = arith.constant 0 : i32
    return %c0_i32, %c0_i32_0 : i32, i32
  }
  func.func @transform_13(%arg0: i32) -> (i32, i32) {
    %c0_i32 = arith.constant 0 : i32
    %c0_i32_0 = arith.constant 0 : i32
    %c0_i32_1 = arith.constant 0 : i32
    return %c0_i32, %c0_i32_0 : i32, i32
  }
}

</mosaic_0001>

<bundles_post_ra>
// kernel: tpu_custom_call.1
= control target key start
LH: loop header
LB: loop body
LE: loop exit
PB: predicated region body
PF: predicated region fallthrough
CT: control target
= control target key end

     0   :  { %18 = vsyncpa [#allocation3], 0  ;;  %s7106_s0 = inlined_call_operand.vmem [shape: f32[16,7], index: 0, kind: input, shape index: {}]   ;;  %s7107_s1 = inlined_call_operand.vmem [shape: f32[2,4], index: 1, kind: input, shape index: {}]   ;;  %s7108_s2 = inlined_call_operand.vmem [shape: f32[7,384], index: 2, kind: input, shape index: {}]   ;;  %s7109_s3 = inlined_call_operand.hbm [shape: f32[128,384], index: 3, kind: input, shape index: {}]   ;;  %s7110_s4 = inlined_call_operand.vmem [shape: f32[1,384], index: 4, kind: input, shape index: {}]   ;;  %s7111_s5 = inlined_call_operand.vmem [shape: f32[1,128], index: 5, kind: input, shape index: {}]   ;;  %s7112_s6 = inlined_call_operand.hbm [shape: f32[256,512], index: 6, kind: input, shape index: {}]   ;;  %s7113_s7 = inlined_call_operand.vmem [shape: f32[1,512], index: 7, kind: input, shape index: {}]   ;;  %s7114_s8 = inlined_call_operand.vmem [shape: f32[128,3], index: 8, kind: input, shape index: {}]   ;;  %s7115_s9 = inlined_call_operand.vmem [shape: f32[4,6], index: 9, kind: input, shape index: {}]   ;;  %s7116_s10 = inlined_call_operand.vmem [shape: f32[1,6], index: 10, kind: input, shape index: {}]   ;;  %s7117_s11 = inlined_call_operand.vmem [shape: f32[6,3], index: 11, kind: input, shape index: {}]   ;;  %s7118_s12 = inlined_call_operand.vmem [shape: f32[1,3], index: 12, kind: input, shape index: {}]   ;;  %s7119_s13 = inlined_call_operand.hbm [shape: f32[2,3], index: 13, kind: output, shape index: {}]  }
   0x1   :  { %19 = vsyncpa [#allocation6], 0 }
   0x2   :  { %20 = vsyncpa [#allocation4], 0  ;;  %s5725_s25 = smov [#allocation2]   ;;  %s5653_s29 = scalar_lea.hbm %s7109_s3, 6144 }
   0x3   :  { %s32_s26 = sshll.u32 %s5725_s25, 4  ;;  %p5654_p0 = scmp.ne.s32.totalorder %s7109_s3, %s5653_s29  ;;  %s33_s26 = int_to_ptr.vmem [resolvable:$true] %s32_s26 }
   0x4   :  { %p5657_p1 = scmp.lt.u32.totalorder %s5653_s29, %s7109_s3 }
   0x6   :  { %p5659_p2 = pnand %p5657_p1, %p5654_p0 }
   0x8   :  { %5662 = shalt.err (!%p5659_p2)
}
   0x9   :  { %s5663_s17 = scalar_lea.vmem %s33_s26, 6144  ;;  %p5668_p4 = scmp.lt.s32.totalorder %s33_s26, %s33_s26 }
   0xa   :  { %p5664_p3 = scmp.ne.s32.totalorder %s33_s26, %s5663_s17  ;;  %p5669_p5 = scmp.lt.s32.totalorder %s5663_s17, %s5663_s17 }
   0xc   :  { %p5670_p6 = por %p5669_p5, %p5668_p4 }
   0xe   :  { %p5671_p7 = pnand %p5670_p6, %p5664_p3 }
  0x10   :  { %5674 = shalt.err (!%p5671_p7)
}
  0x11   :  { %s5726_s18 = smov 384   ;;  %s5727_s19 = smov 24  }
  0x12   :  { %38 = dma.hbm_to_vmem [thread:$0]  %s7109_s3, 6144, %s33_s26, [#allocation3], %s5726_s18, %s5726_s18, %s5727_s19  }
  0x13   :  { %s5728_s22 = smov [#allocation5]   ;;  %s5675_s27 = scalar_lea.hbm %s7112_s6, 16384 }
  0x14   :  { %s48_s23 = sshll.u32 %s5728_s22, 4  ;;  %p5676_p8 = scmp.ne.s32.totalorder %s7112_s6, %s5675_s27  ;;  %s49_s23 = int_to_ptr.vmem [resolvable:$true] %s48_s23 }
  0x15   :  { %p5679_p9 = scmp.lt.u32.totalorder %s5675_s27, %s7112_s6 }
  0x17   :  { %p5681_p10 = pnand %p5679_p9, %p5676_p8 }
  0x19   :  { %5684 = shalt.err (!%p5681_p10)
}
  0x1a   :  { %s5685_s15 = scalar_lea.vmem %s49_s23, 16384  ;;  %p5690_p12 = scmp.lt.s32.totalorder %s49_s23, %s49_s23 }
  0x1b   :  { %p5686_p11 = scmp.ne.s32.totalorder %s49_s23, %s5685_s15  ;;  %p5691_p13 = scmp.lt.s32.totalorder %s5685_s15, %s5685_s15 }
  0x1d   :  { %p5692_p0 = por %p5691_p13, %p5690_p12 }
  0x1f   :  { %p5693_p1 = pnand %p5692_p0, %p5686_p11 }
  0x21   :  { %5696 = shalt.err (!%p5693_p1)
}
  0x22   :  { %s5729_s3 = smov 512   ;;  %s5730_s26 = smov 32  }
  0x23   :  { %54 = dma.hbm_to_vmem [thread:$0]  %s7112_s6, 16384, %s49_s23, [#allocation6], %s5729_s3, %s5729_s3, %s5730_s26  }
  0x24   :  { %5719 = dma.done.wait [#allocation3], 6144  }
  0x25   :  { %5720 = vsyncadd [#allocation3], 4294961152 }
  0x26   :  { %5721 = dma.done.wait [#allocation6], 16384  }
  0x27   :  { %5722 = vsyncadd [#allocation6], 4294950912  ;;  %v7120_v0 = vmov 0.0   ;;  %vm5732_vm0 = vmmov 0   ;;  %vm86_vm1 = vcmask 1043456   ;;  %vm82_vm2 = vcmask 31744  }
  0x28   :  { %3656 = vmatprep.subr.mxu1 %v7120_v0  ;;  %3658 = vmatprep.mubr.msk.f32.mxu1 %vm5732_vm0, %v7120_v0  ;;  %v74_v1 = vld [vmem:[%s7115_s9] sm:$0xf]  ;;  %v434_v3 = vld [vmem:[#allocation2 + $0x8] sm:$0xff]  ;;  %v436_v6 = vld [vmem:[#allocation2 + $0x18] sm:$0xff]  ;;  %vm166_vm3 = vcmask 1045504   ;;  %vm269_vm4 = vcmask 1046528  }
  0x29   :  { %545 = vmatprep.mubr.f32.mxu0 %v7120_v0  ;;  %v73_v2 = vld [vmem:[%s7107_s1] sm:$0x3]  ;;  %3657 = vmatpush3.msk.msra.mxu1 %vm86_vm1, %v74_v1  ;;  %v440_v9 = vld [vmem:[#allocation2 + $0x38] sm:$0xff]  ;;  %v443_v10 = vld [vmem:[#allocation2 + $0x50] sm:$0xff]  ;;  %vm162_vm5 = vcmask 48128   ;;  %vm262_vm6 = vcmask 56320  }
  0x2a   :  { %v437_v4 = vld [vmem:[#allocation2 + $0x20] sm:$0xff]  ;;  %3659 = vmatmul.mubr.msk.f32.vlgmr.msra.gmra.mrb[0].mxu1 %vm82_vm2, %v73_v2  ;;  %v439_v11 = vld [vmem:[#allocation2 + $0x30] sm:$0xff]  ;;  %3661 = vmatprep.subr.mxu1 %v7120_v0  ;;  %v5844_v12 = vpack.c.bf16 %v443_v10, %v440_v9  ;;  %v442_v13 = vld [vmem:[#allocation2 + $0x48] sm:$0xff]  ;;  %v7122_v62 = vmov 0.0|0.0   ;;  %s5734_s20 = smov [#allocation7]   ;;  %vm3432_vm7 = vcmask 17408  }
  0x2b   :  { %v433_v5 = vld [vmem:[#allocation2] sm:$0xff]  ;;  %v5839_v7 = vpack.c.bf16 %v437_v4, %v434_v3  ;;  %v446_v14 = vld [vmem:[#allocation2 + $0x68] sm:$0xff]  ;;  %3663 = vmatprep.mubr.msk.f32.mxu1 %vm5732_vm0, %v7120_v0  ;;  %v5850_v16 = vpack.c.bf16 %v442_v13, %v439_v11  ;;  %v448_v19 = vld [vmem:[#allocation2 + $0x78] sm:$0xff]  ;;  %s3440_s1 = sshll.u32 %s5734_s20, 4  ;;  %s3441_s1 = int_to_ptr.vmem [resolvable:$true] %s3440_s1 }
  0x2c   :  { %v5841_v8 = vpack.c.bf16 %v436_v6, %v433_v5  ;;  %v449_v15 = vld [vmem:[#allocation2 + $0x80] sm:$0xff]  ;;  %v452_v20 = vld [vmem:[#allocation2 + $0x98] sm:$0xff]  ;;  %v455_v21 = vld [vmem:[#allocation2 + $0xb0] sm:$0xff]  ;;  %s5697_s9 = scalar_lea.vmem %s3441_s1, 32  ;;  %p5702_p3 = scmp.lt.s32.totalorder %s3441_s1, %s3441_s1 }
  0x2d   :  { %7243 = vst [vmem:[#allocation11_spill] sm:$0xff] %v5839_v7  ;;  %3987 = vmatprep.subr.bf16.mxu0 %v5839_v7  ;;  %v5853_v17 = vpack.c.bf16 %v449_v15, %v446_v14  ;;  %v445_v18 = vld [vmem:[#allocation2 + $0x60] sm:$0xff]  ;;  %v5859_v23 = vpack.c.bf16 %v455_v21, %v452_v20  ;;  %v451_v24 = vld [vmem:[#allocation2 + $0x90] sm:$0xff]  ;;  %v454_v25 = vld [vmem:[#allocation2 + $0xa8] sm:$0xff]  ;;  %p5698_p2 = scmp.ne.s32.totalorder %s3441_s1, %s5697_s9  ;;  %p5703_p4 = scmp.lt.s32.totalorder %s5697_s9, %s5697_s9 }
  0x2e   :  { %3989 = vmatpush1.bf16.msra.mxu0 %v5841_v8  ;;  %v5856_v22 = vpack.c.bf16 %v448_v19, %v445_v18  ;;  %v458_v26 = vld [vmem:[#allocation2 + $0xc8] sm:$0xff]  ;;  %v461_v27 = vld [vmem:[#allocation2 + $0xe0] sm:$0xff]  ;;  %v5862_v28 = vpack.c.bf16 %v454_v25, %v451_v24  ;;  %v460_v31 = vld [vmem:[#allocation2 + $0xd8] sm:$0xff] }
  0x2f   :  { %3991 = vmatprep.subr.bf16.mxu0 %v5844_v12  ;;  %v5865_v29 = vpack.c.bf16 %v461_v27, %v458_v26  ;;  %v457_v30 = vld [vmem:[#allocation2 + $0xc0] sm:$0xff]  ;;  %v464_v32 = vld [vmem:[#allocation2 + $0xf8] sm:$0xff]  ;;  %v467_v33 = vld [vmem:[#allocation2 + $0x110] sm:$0xff]  ;;  %p5704_p5 = por %p5703_p4, %p5702_p3 }
  0x30   :  { %v5868_v34 = vpack.c.bf16 %v460_v31, %v457_v30  ;;  %v5871_v35 = vpack.c.bf16 %v467_v33, %v464_v32  ;;  %v463_v36 = vld [vmem:[#allocation2 + $0xf0] sm:$0xff]  ;;  %v466_v37 = vld [vmem:[#allocation2 + $0x108] sm:$0xff]  ;;  %v473_v40 = vld [vmem:[#allocation2 + $0x140] sm:$0xff] }
  0x31   :  { %v5875_v38 = vpack.c.bf16 %v466_v37, %v463_v36  ;;  %v470_v39 = vld [vmem:[#allocation2 + $0x128] sm:$0xff]  ;;  %v469_v42 = vld [vmem:[#allocation2 + $0x120] sm:$0xff]  ;;  %v472_v43 = vld [vmem:[#allocation2 + $0x138] sm:$0xff]  ;;  %p5705_p6 = pnand %p5704_p5, %p5698_p2 }
  0x32   :  { %3993 = vmatpush1.bf16.msra.mxu0 %v5850_v16  ;;  %v5878_v41 = vpack.c.bf16 %v473_v40, %v470_v39  ;;  %v5880_v44 = vpack.c.bf16 %v472_v43, %v469_v42  ;;  %v161_v45 = vld [vmem:[%s7117_s11] sm:$0x3f]  ;;  %v243_v46 = vld [vmem:[%s7108_s2 + $0x8] sm:$0x7f]  ;;  %v476_v47 = vld [vmem:[#allocation2 + $0x158] sm:$0xff] }
  0x33   :  { %3995 = vmatprep.subr.bf16.mxu0 %v5853_v17  ;;  %3662 = vmatpush3.msk.msra.mxu1 %vm166_vm3, %v161_v45  ;;  %v479_v48 = vld [vmem:[#allocation2 + $0x170] sm:$0xff]  ;;  %v478_v51 = vld [vmem:[#allocation2 + $0x168] sm:$0xff]  ;;  %v3450_v53 = vld [vmem:[%s7116_s10] ss:$0 sm:$0xff] }
  0x34   :  { %3455 = vmatprep.subr.msk.mxu1 %vm269_vm4, %v243_v46  ;;  %v5891_v49 = vpack.c.bf16 %v479_v48, %v476_v47  ;;  %v475_v50 = vld [vmem:[#allocation2 + $0x150] sm:$0xff]  ;;  %v242_v58 = vld [vmem:[%s7108_s2] sm:$0x7f]  ;;  %v241_v61 = vld [vmem:[%s7106_s0 + $0x8] sm:$0xff] }
  0x35   :  { %v5893_v52 = vpack.c.bf16 %v478_v51, %v475_v50  ;;  %v244_v59 = vld [vmem:[%s7108_s2 + $0x10] sm:$0x7f]  ;;  %v240_v60 = vld [vmem:[%s7106_s0] sm:$0xff]  ;;  %v438_v1 = vld [vmem:[#allocation2 + $0x28] sm:$0xff] }
  0x36   :  { %3997 = vmatpush1.bf16.msra.mxu0 %v5856_v22  ;;  %v435_v63 = vld [vmem:[#allocation2 + $0x10] sm:$0xff]  ;;  %v441_v3 = vld [vmem:[#allocation2 + $0x40] sm:$0xff]  ;;  %v444_v4 = vld [vmem:[#allocation2 + $0x58] sm:$0xff] }
  0x37   :  { %3999 = vmatprep.subr.bf16.mxu0 %v5859_v23  ;;  %v5920_v2 = vpack.c.bf16 %v438_v1, %v435_v63  ;;  %v5923_v5 = vpack.c.bf16 %v444_v4, %v441_v3  ;;  %v447_v6 = vld [vmem:[#allocation2 + $0x70] sm:$0xff]  ;;  %v450_v9 = vld [vmem:[#allocation2 + $0x88] sm:$0xff]  ;;  %v453_v11 = vld [vmem:[#allocation2 + $0xa0] sm:$0xff] }
  0x38   :  { %v5929_v10 = vpack.c.bf16 %v450_v9, %v447_v6  ;;  %v456_v13 = vld [vmem:[#allocation2 + $0xb8] sm:$0xff]  ;;  %v459_v15 = vld [vmem:[#allocation2 + $0xd0] sm:$0xff]  ;;  %v462_v18 = vld [vmem:[#allocation2 + $0xe8] sm:$0xff] }
  0x39   :  { %v5933_v14 = vpack.c.bf16 %v456_v13, %v453_v11  ;;  %v5937_v19 = vpack.c.bf16 %v462_v18, %v459_v15  ;;  %v465_v20 = vld [vmem:[#allocation2 + $0x100] sm:$0xff]  ;;  %v468_v21 = vld [vmem:[#allocation2 + $0x118] sm:$0xff]  ;;  %v471_v25 = vld [vmem:[#allocation2 + $0x130] sm:$0xff] }
  0x3a   :  { %4001 = vmatpush1.bf16.msra.mxu0 %v5862_v28  ;;  %v5941_v24 = vpack.c.bf16 %v468_v21, %v465_v20  ;;  %v474_v26 = vld [vmem:[#allocation2 + $0x148] sm:$0xff]  ;;  %v477_v30 = vld [vmem:[#allocation2 + $0x160] sm:$0xff]  ;;  %v480_v31 = vld [vmem:[#allocation2 + $0x178] sm:$0xff] }
  0x3b   :  { %4003 = vmatprep.subr.bf16.mxu0 %v5865_v29  ;;  %v5945_v27 = vpack.c.bf16 %v474_v26, %v471_v25  ;;  %v5949_v32 = vpack.c.bf16 %v480_v31, %v477_v30  ;;  %v651_v33 = vld [vmem:[#allocation5 + $0x8] sm:$0xff]  ;;  %v653_v37 = vld [vmem:[#allocation5 + $0x18] sm:$0xff]  ;;  %v650_v42 = vld [vmem:[#allocation5] sm:$0xff] }
  0x3c   :  { %v655_v36 = vld [vmem:[#allocation5 + $0x28] sm:$0xff]  ;;  %v657_v40 = vld [vmem:[#allocation5 + $0x38] sm:$0xff]  ;;  %v654_v43 = vld [vmem:[#allocation5 + $0x20] sm:$0xff] }
  0x3d   :  { %v5955_v39 = vpack.c.bf16 %v655_v36, %v651_v33  ;;  %v5957_v45 = vpack.c.bf16 %v657_v40, %v653_v37  ;;  %v5959_v46 = vpack.c.bf16 %v654_v43, %v650_v42  ;;  %v652_v47 = vld [vmem:[#allocation5 + $0x10] sm:$0xff]  ;;  %v659_v51 = vld [vmem:[#allocation5 + $0x48] sm:$0xff]  ;;  %v669_v9 = vld [vmem:[#allocation5 + $0x98] sm:$0xff] }
  0x3e   :  { %4005 = vmatpush1.bf16.msra.mxu0 %v5868_v34  ;;  %v656_v48 = vld [vmem:[#allocation5 + $0x30] sm:$0xff]  ;;  %v667_v4 = vld [vmem:[#allocation5 + $0x88] sm:$0xff]  ;;  %v673_v13 = vld [vmem:[#allocation5 + $0xb8] sm:$0xff] }
  0x3f   :  { %4007 = vmatprep.subr.bf16.mxu0 %v5871_v35  ;;  %v5962_v50 = vpack.c.bf16 %v656_v48, %v652_v47  ;;  %v664_v63 = vld [vmem:[#allocation5 + $0x70] sm:$0xff]  ;;  %v671_v6 = vld [vmem:[#allocation5 + $0xa8] sm:$0xff]  ;;  %v666_v15 = vld [vmem:[#allocation5 + $0x80] sm:$0xff]  ;;  %v5985_v21 = vpack.c.bf16 %v673_v13, %v669_v9 }
  0x40   :  { %v5981_v11 = vpack.c.bf16 %v671_v6, %v667_v4  ;;  %v670_v18 = vld [vmem:[#allocation5 + $0xa0] sm:$0xff]  ;;  %v668_v26 = vld [vmem:[#allocation5 + $0x90] sm:$0xff]  ;;  %v675_v33 = vld [vmem:[#allocation5 + $0xc8] sm:$0xff] }
  0x41   :  { %v5987_v25 = vpack.c.bf16 %v670_v18, %v666_v15  ;;  %v672_v30 = vld [vmem:[#allocation5 + $0xb0] sm:$0xff]  ;;  %v679_v36 = vld [vmem:[#allocation5 + $0xe8] sm:$0xff]  ;;  %v677_v37 = vld [vmem:[#allocation5 + $0xd8] sm:$0xff] }
  0x42   :  { %4009 = vmatpush1.bf16.msra.mxu0 %v5875_v38  ;;  %v5990_v31 = vpack.c.bf16 %v672_v30, %v668_v26  ;;  %v5995_v40 = vpack.c.bf16 %v679_v36, %v675_v33  ;;  %v681_v42 = vld [vmem:[#allocation5 + $0xf8] sm:$0xff]  ;;  %v674_v43 = vld [vmem:[#allocation5 + $0xc0] sm:$0xff]  ;;  %v684_v18 = vld [vmem:[#allocation5 + $0x110] sm:$0xff] }
  0x43   :  { %4011 = vmatprep.subr.bf16.mxu0 %v5878_v41  ;;  %v678_v47 = vld [vmem:[#allocation5 + $0xe0] sm:$0xff]  ;;  %v5997_v48 = vpack.c.bf16 %v681_v42, %v677_v37  ;;  %v689_v4 = vld [vmem:[#allocation5 + $0x138] sm:$0xff]  ;;  %v688_v26 = vld [vmem:[#allocation5 + $0x130] sm:$0xff] }
  0x44   :  { %v682_v6 = vld [vmem:[#allocation5 + $0x100] sm:$0xff]  ;;  %v6014_v30 = vpack.c.bf16 %v688_v26, %v684_v18  ;;  %v691_v33 = vld [vmem:[#allocation5 + $0x148] sm:$0xff]  ;;  %v693_v37 = vld [vmem:[#allocation5 + $0x158] sm:$0xff] }
  0x45   :  { %7244 = vst [vmem:[#allocation12_spill] sm:$0xff] %v5997_v48  ;;  %v686_v9 = vld [vmem:[#allocation5 + $0x120] sm:$0xff]  ;;  %v695_v36 = vld [vmem:[#allocation5 + $0x168] sm:$0xff]  ;;  %v701_v18 = vld [vmem:[#allocation5 + $0x198] sm:$0xff] }
  0x46   :  { %4013 = vmatpush1.bf16.msra.mxu0 %v5880_v44  ;;  %v6011_v15 = vpack.c.bf16 %v686_v9, %v682_v6  ;;  %7250 = vst [vmem:[#allocation18_spill] sm:$0xff] %v6014_v30  ;;  %v6019_v42 = vpack.c.bf16 %v695_v36, %v691_v33  ;;  %v699_v6 = vld [vmem:[#allocation5 + $0x188] sm:$0xff]  ;;  %v705_v33 = vld [vmem:[#allocation5 + $0x1b8] sm:$0xff]  ;;  %v698_v36 = vld [vmem:[#allocation5 + $0x180] sm:$0xff] }
  0x47   :  { %4015 = vmatprep.subr.bf16.mxu0 %v5891_v49  ;;  %v703_v9 = vld [vmem:[#allocation5 + $0x1a8] sm:$0xff] }
  0x48   :  { %7249 = vst [vmem:[#allocation17_spill] sm:$0xff] %v6011_v15  ;;  %7251 = vst [vmem:[#allocation19_spill] sm:$0xff] %v6019_v42  ;;  %v6031_v26 = vpack.c.bf16 %v703_v9, %v699_v6  ;;  %v711_v6 = vld [vmem:[#allocation5 + $0x1e8] sm:$0xff]  ;;  %v709_v9 = vld [vmem:[#allocation5 + $0x1d8] sm:$0xff] }
  0x4a   :  { %4017 = vmatpush1.bf16.msra.mxu0 %v5893_v52  ;;  %7255 = vst [vmem:[#allocation23_spill] sm:$0xff] %v6031_v26 }
  0x4b   :  { %4043 = vmatprep.subr.bf16.mxu0 %v5955_v39 }
  0x4d   :  { %546 = vmatmul.mubr.f32.vlgmr.msra.gmra.mrb[0].mxu0 %v7120_v0 }
  0x4e   :  { %863 = vmatprep.mubr.f32.mxu0 %v7120_v0  ;;  %4045 = vmatpush1.bf16.msra.mxu0 %v5959_v46 }
  0xfd   :  { %v156_v54 = vpop.f32.mrb[0].mxu1 }
  0xfe   :  { %v157_v55 = vadd.f32 %v3450_v53, %v156_v54  ;;  %v3660_v56 = vpop.f32.mrb[1].mxu1  ;;  %v663_v53 = vld [vmem:[#allocation5 + $0x68] sm:$0xff]  ;;  %v661_v54 = vld [vmem:[#allocation5 + $0x58] sm:$0xff] }
  0xff   :  { %v665_v56 = vld [vmem:[#allocation5 + $0x78] sm:$0xff] }
 0x100   :  { %v160_v57 = vmax.f32 %v157_v55, 0.0  ;;  %v5967_v55 = vpack.c.bf16 %v663_v53, %v659_v51  ;;  %v5999_v51 = vpack.c.bf16 %v678_v47, %v674_v43  ;;  %v676_v53 = vld [vmem:[#allocation5 + $0xd0] sm:$0xff]  ;;  %v697_v43 = vld [vmem:[#allocation5 + $0x178] sm:$0xff]  ;;  %v690_v47 = vld [vmem:[#allocation5 + $0x140] sm:$0xff] }
 0x102   :  { %3664 = vmatmul.mubr.msk.f32.vlgmr.msra.gmra.mrb[2].mxu1 %vm162_vm5, %v160_v57  ;;  %v658_v57 = vld [vmem:[#allocation5 + $0x40] sm:$0xff]  ;;  %4047 = vmatprep.subr.bf16.mxu0 %v5967_v55  ;;  %7245 = vst [vmem:[#allocation13_spill] sm:$0xff] %v5999_v51 }
 0x103   :  { %3456 = vmatpush1.msk.msra.mxu1 %vm269_vm4, %v242_v58  ;;  %343 = vmatprep.mubr.f32.mxu1 %v7120_v0  ;;  %v662_v58 = vld [vmem:[#allocation5 + $0x60] sm:$0xff] }
 0x104   :  { %3666 = vmatprep.subr.msk.mxu1 %vm269_vm4, %v244_v59 }
 0x106   :  { %3457 = vmatmul.mubr.msk.f32.vlgmr.msra.gmra.mrb[4].mxu1 %vm262_vm6, %v240_v60 }
 0x107   :  { %3667 = vmatpush3.msk.msra.mxu1 %vm269_vm4, %v244_v59  ;;  %349 = vmatprep.mubr.f32.mxu1 %v7120_v0  ;;  %v5969_v59 = vpack.c.bf16 %v665_v56, %v661_v54  ;;  %v680_v54 = vld [vmem:[#allocation5 + $0xf0] sm:$0xff] }
 0x108   :  { %4018 = vmatprep.subr.bf16.mxu1 %v7122_v62  ;;  %v6002_v56 = vpack.c.bf16 %v680_v54, %v676_v53  ;;  %v694_v53 = vld [vmem:[#allocation5 + $0x160] sm:$0xff]  ;;  %v6021_v54 = vpack.c.bf16 %v697_v43, %v693_v37  ;;  %v6033_v43 = vpack.c.bf16 %v705_v33, %v701_v18  ;;  %v713_v18 = vld [vmem:[#allocation5 + $0x1f8] sm:$0xff] }
 0x109   :  { %v702_v37 = vld [vmem:[#allocation5 + $0x1a0] sm:$0xff] }
 0x10a   :  { %3458 = vmatmul.mubr.msk.f32.gmra.mrb[6].mxu1 %vm262_vm6, %v241_v61  ;;  %7246 = vst [vmem:[#allocation14_spill] sm:$0xff] %v6002_v56  ;;  %7252 = vst [vmem:[#allocation20_spill] sm:$0xff] %v6021_v54  ;;  %v706_v33 = vld [vmem:[#allocation5 + $0x1c0] sm:$0xff] }
 0x10b   :  { %3668 = vmatprep.mubr.msk.f32.mxu1 %vm262_vm6, %v240_v60  ;;  %v5971_v60 = vpack.c.bf16 %v662_v58, %v658_v57  ;;  %v683_v57 = vld [vmem:[#allocation5 + $0x108] sm:$0xff]  ;;  %7256 = vst [vmem:[#allocation24_spill] sm:$0xff] %v6033_v43 }
 0x10c   :  { %v687_v58 = vld [vmem:[#allocation5 + $0x128] sm:$0xff] }
 0x10d   :  { %4049 = vmatpush1.bf16.msra.mxu0 %v5971_v60 }
 0x10e   :  { %3669 = vmatmul.mubr.msk.f32.vlgmr.msra.gmra.mrb[8].mxu1 %vm262_vm6, %v241_v61  ;;  %v660_v61 = vld [vmem:[#allocation5 + $0x50] sm:$0xff]  ;;  %4051 = vmatprep.subr.bf16.mxu0 %v5981_v11 }
 0x10f   :  { %4020 = vmatpush3.bf16.msra.mxu1 %v5920_v2  ;;  %3703 = vmatprep.mubr.msk.f32.mxu1 %vm5732_vm0, %v7120_v0  ;;  %v5974_v1 = vpack.c.bf16 %v664_v63, %v660_v61  ;;  %v685_v61 = vld [vmem:[#allocation5 + $0x118] sm:$0xff]  ;;  %v6007_v63 = vpack.c.bf16 %v687_v58, %v683_v57  ;;  %v6023_v57 = vpack.c.bf16 %v694_v53, %v690_v47  ;;  %v692_v58 = vld [vmem:[#allocation5 + $0x150] sm:$0xff] }
 0x110   :  { %4021 = vmatprep.subr.bf16.mxu1 %v7122_v62  ;;  %v6009_v13 = vpack.c.bf16 %v689_v4, %v685_v61  ;;  %v696_v61 = vld [vmem:[#allocation5 + $0x170] sm:$0xff]  ;;  %v6035_v47 = vpack.c.bf16 %v702_v37, %v698_v36  ;;  %v710_v36 = vld [vmem:[#allocation5 + $0x1e0] sm:$0xff]  ;;  %v6045_v37 = vpack.c.bf16 %v713_v18, %v709_v9  ;;  %v721_v9 = vld [vmem:[#allocation5 + $0x238] sm:$0xff] }
 0x111   :  { %4053 = vmatpush1.bf16.msra.mxu0 %v5987_v25  ;;  %7247 = vst [vmem:[#allocation15_spill] sm:$0xff] %v6007_v63  ;;  %7253 = vst [vmem:[#allocation21_spill] sm:$0xff] %v6023_v57  ;;  %v6026_v4 = vpack.c.bf16 %v696_v61, %v692_v58  ;;  %v700_v53 = vld [vmem:[#allocation5 + $0x190] sm:$0xff]  ;;  %v714_v18 = vld [vmem:[#allocation5 + $0x200] sm:$0xff] }
 0x112   :  { %4055 = vmatprep.subr.bf16.mxu0 %v5995_v40  ;;  %7248 = vst [vmem:[#allocation16_spill] sm:$0xff] %v6009_v13  ;;  %7257 = vst [vmem:[#allocation25_spill] sm:$0xff] %v6035_v47  ;;  %v704_v58 = vld [vmem:[#allocation5 + $0x1b0] sm:$0xff] }
 0x113   :  { %4023 = vmatpush3.bf16.msra.mxu1 %v5923_v5  ;;  %7254 = vst [vmem:[#allocation22_spill] sm:$0xff] %v6026_v4  ;;  %v6038_v61 = vpack.c.bf16 %v704_v58, %v700_v53  ;;  %7260 = vst [vmem:[#allocation28_spill] sm:$0xff] %v6045_v37  ;;  %v708_v53 = vld [vmem:[#allocation5 + $0x1d0] sm:$0xff] }
 0x114   :  { %4024 = vmatprep.subr.bf16.mxu1 %v7122_v62  ;;  %v712_v58 = vld [vmem:[#allocation5 + $0x1f0] sm:$0xff] }
 0x115   :  { %4057 = vmatpush1.bf16.msra.mxu0 %v5999_v51  ;;  %7258 = vst [vmem:[#allocation26_spill] sm:$0xff] %v6038_v61 }
 0x116   :  { %4059 = vmatprep.subr.bf16.mxu0 %v6007_v63 }
 0x117   :  { %4026 = vmatpush3.bf16.msra.mxu1 %v5929_v10 }
 0x118   :  { %4027 = vmatprep.subr.bf16.mxu1 %v7122_v62 }
 0x119   :  { %4061 = vmatpush1.bf16.msra.mxu0 %v6011_v15 }
 0x11a   :  { %4063 = vmatprep.subr.bf16.mxu0 %v6019_v42 }
 0x11b   :  { %4029 = vmatpush3.bf16.msra.mxu1 %v5933_v14 }
 0x11c   :  { %4030 = vmatprep.subr.bf16.mxu1 %v7122_v62 }
 0x11d   :  { %4065 = vmatpush1.bf16.msra.mxu0 %v6023_v57  ;;  %v733_v57 = vld [vmem:[#allocation5 + $0x298] sm:$0xff] }
 0x11e   :  { %4067 = vmatprep.subr.bf16.mxu0 %v6031_v26 }
 0x11f   :  { %4032 = vmatpush3.bf16.msra.mxu1 %v5937_v19 }
 0x120   :  { %4033 = vmatprep.subr.bf16.mxu1 %v7122_v62  ;;  %v5978_v3 = vpop.f32.mrb[0].mxu0 }
 0x121   :  { %v5983_v20 = vpop.f32.mrb[1].mxu0  ;;  %4069 = vmatpush1.bf16.msra.mxu0 %v6035_v47 }
 0x123   :  { %4035 = vmatpush3.bf16.msra.mxu1 %v5941_v24 }
 0x124   :  { %4036 = vmatprep.subr.bf16.mxu1 %v7122_v62 }
 0x127   :  { %4038 = vmatpush3.bf16.msra.mxu1 %v5945_v27 }
 0x128   :  { %4039 = vmatprep.subr.bf16.mxu1 %v7122_v62 }
 0x12b   :  { %4041 = vmatpush3.bf16.msra.mxu1 %v5949_v32 }
 0x12c   :  { %4107 = vmatprep.subr.bf16.mxu1 %v5957_v45 }
 0x12e   :  { %3704 = vmatmul.mubr.f32.vlgmr.msra.gmra.mrb[10].mxu1 %v7120_v0 }
 0x12f   :  { %934 = vmatprep.mubr.f32.mxu1 %v7120_v0  ;;  %4109 = vmatpush1.bf16.msra.mxu1 %v5962_v50  ;;  %v707_v0 = vld [vmem:[#allocation5 + $0x1c8] sm:$0xff] }
 0x130   :  { %4111 = vmatprep.subr.bf16.mxu1 %v5969_v59  ;;  %v6043_v62 = vpack.c.bf16 %v711_v6, %v707_v0  ;;  %v719_v0 = vld [vmem:[#allocation5 + $0x228] sm:$0xff]  ;;  %v717_v6 = vld [vmem:[#allocation5 + $0x218] sm:$0xff] }
 0x132   :  { %7259 = vst [vmem:[#allocation27_spill] sm:$0xff] %v6043_v62  ;;  %4071 = vmatprep.subr.bf16.mxu0 %v6043_v62 }
 0x133   :  { %4113 = vmatpush1.bf16.msra.mxu1 %v5974_v1 }
 0x134   :  { %4115 = vmatprep.subr.bf16.mxu1 %v5985_v21 }
 0x137   :  { %4117 = vmatpush1.bf16.msra.mxu1 %v5990_v31 }
 0x138   :  { %4119 = vmatprep.subr.bf16.mxu1 %v5997_v48 }
 0x13b   :  { %4121 = vmatpush1.bf16.msra.mxu1 %v6002_v56 }
 0x13c   :  { %4123 = vmatprep.subr.bf16.mxu1 %v6009_v13 }
 0x13f   :  { %4125 = vmatpush1.bf16.msra.mxu1 %v6014_v30 }
 0x140   :  { %4127 = vmatprep.subr.bf16.mxu1 %v6021_v54  ;;  %v737_v54 = vld [vmem:[#allocation5 + $0x2b8] sm:$0xff] }
 0x143   :  { %4129 = vmatpush1.bf16.msra.mxu1 %v6026_v4  ;;  %v6047_v4 = vpack.c.bf16 %v710_v36, %v706_v33  ;;  %v718_v33 = vld [vmem:[#allocation5 + $0x220] sm:$0xff]  ;;  %v6057_v36 = vpack.c.bf16 %v721_v9, %v717_v6  ;;  %v729_v6 = vld [vmem:[#allocation5 + $0x278] sm:$0xff] }
 0x144   :  { %4131 = vmatprep.subr.bf16.mxu1 %v6033_v43  ;;  %v6050_v43 = vpack.c.bf16 %v712_v58, %v708_v53  ;;  %v6059_v26 = vpack.c.bf16 %v718_v33, %v714_v18  ;;  %v716_v53 = vld [vmem:[#allocation5 + $0x210] sm:$0xff]  ;;  %v722_v9 = vld [vmem:[#allocation5 + $0x240] sm:$0xff] }
 0x145   :  { %7261 = vst [vmem:[#allocation29_spill] sm:$0xff] %v6047_v4  ;;  %4073 = vmatpush1.bf16.msra.mxu0 %v6047_v4  ;;  %7264 = vst [vmem:[#allocation32_spill] sm:$0xff] %v6057_v36  ;;  %v720_v58 = vld [vmem:[#allocation5 + $0x230] sm:$0xff]  ;;  %v726_v18 = vld [vmem:[#allocation5 + $0x260] sm:$0xff] }
 0x146   :  { %7262 = vst [vmem:[#allocation30_spill] sm:$0xff] %v6050_v43  ;;  %7265 = vst [vmem:[#allocation33_spill] sm:$0xff] %v6059_v26  ;;  %v6071_v62 = vpack.c.bf16 %v726_v18, %v722_v9  ;;  %v732_v9 = vld [vmem:[#allocation5 + $0x290] sm:$0xff] }
 0x147   :  { %4133 = vmatpush1.bf16.msra.mxu1 %v6038_v61  ;;  %v715_v61 = vld [vmem:[#allocation5 + $0x208] sm:$0xff] }
 0x148   :  { %4135 = vmatprep.subr.bf16.mxu1 %v6045_v37  ;;  %v6055_v47 = vpack.c.bf16 %v719_v0, %v715_v61  ;;  %v6062_v37 = vpack.c.bf16 %v720_v58, %v716_v53  ;;  %v727_v61 = vld [vmem:[#allocation5 + $0x268] sm:$0xff]  ;;  %v725_v0 = vld [vmem:[#allocation5 + $0x258] sm:$0xff]  ;;  %7269 = vst [vmem:[#allocation37_spill] sm:$0xff] %v6071_v62  ;;  %v724_v53 = vld [vmem:[#allocation5 + $0x250] sm:$0xff] }
 0x149   :  { %v6069_v33 = vpack.c.bf16 %v729_v6, %v725_v0  ;;  %v728_v58 = vld [vmem:[#allocation5 + $0x270] sm:$0xff]  ;;  %v730_v0 = vld [vmem:[#allocation5 + $0x280] sm:$0xff] }
 0x14a   :  { %7263 = vst [vmem:[#allocation31_spill] sm:$0xff] %v6055_v47  ;;  %4075 = vmatprep.subr.bf16.mxu0 %v6055_v47  ;;  %7266 = vst [vmem:[#allocation34_spill] sm:$0xff] %v6062_v37  ;;  %v731_v47 = vld [vmem:[#allocation5 + $0x288] sm:$0xff]  ;;  %v734_v6 = vld [vmem:[#allocation5 + $0x2a0] sm:$0xff] }
 0x14b   :  { %4137 = vmatpush1.bf16.msra.mxu1 %v6050_v43  ;;  %4077 = vmatpush1.bf16.msra.mxu0 %v6059_v26  ;;  %v723_v43 = vld [vmem:[#allocation5 + $0x248] sm:$0xff]  ;;  %7268 = vst [vmem:[#allocation36_spill] sm:$0xff] %v6069_v33  ;;  %v6074_v26 = vpack.c.bf16 %v728_v58, %v724_v53  ;;  %v6083_v18 = vpack.c.bf16 %v734_v6, %v730_v0  ;;  %v736_v53 = vld [vmem:[#allocation5 + $0x2b0] sm:$0xff]  ;;  %v742_v0 = vld [vmem:[#allocation5 + $0x2e0] sm:$0xff] }
 0x14c   :  { %4139 = vmatprep.subr.bf16.mxu1 %v6057_v36  ;;  %v6067_v4 = vpack.c.bf16 %v727_v61, %v723_v43  ;;  %v735_v36 = vld [vmem:[#allocation5 + $0x2a8] sm:$0xff]  ;;  %v6080_v61 = vpack.c.bf16 %v737_v54, %v733_v57  ;;  %v6087_v58 = vpack.c.bf16 %v736_v53, %v732_v9  ;;  %v741_v54 = vld [vmem:[#allocation5 + $0x2d8] sm:$0xff] }
 0x14d   :  { %7270 = vst [vmem:[#allocation38_spill] sm:$0xff] %v6074_v26  ;;  %v6078_v43 = vpack.c.bf16 %v735_v36, %v731_v47  ;;  %7273 = vst [vmem:[#allocation41_spill] sm:$0xff] %v6083_v18  ;;  %v739_v47 = vld [vmem:[#allocation5 + $0x2c8] sm:$0xff] }
 0x14e   :  { %7267 = vst [vmem:[#allocation35_spill] sm:$0xff] %v6067_v4  ;;  %4079 = vmatprep.subr.bf16.mxu0 %v6067_v4  ;;  %7272 = vst [vmem:[#allocation40_spill] sm:$0xff] %v6080_v61  ;;  %v743_v36 = vld [vmem:[#allocation5 + $0x2e8] sm:$0xff]  ;;  %v765_v4 = vld [vmem:[#allocation5 + $0x398] sm:$0xff] }
 0x14f   :  { %4141 = vmatpush1.bf16.msra.mxu1 %v6062_v37  ;;  %4081 = vmatpush1.bf16.msra.mxu0 %v6071_v62  ;;  %7271 = vst [vmem:[#allocation39_spill] sm:$0xff] %v6078_v43  ;;  %7274 = vst [vmem:[#allocation42_spill] sm:$0xff] %v6087_v58  ;;  %v6091_v57 = vpack.c.bf16 %v743_v36, %v739_v47  ;;  %v745_v62 = vld [vmem:[#allocation5 + $0x2f8] sm:$0xff]  ;;  %v747_v53 = vld [vmem:[#allocation5 + $0x308] sm:$0xff] }
 0x150   :  { %4143 = vmatprep.subr.bf16.mxu1 %v6069_v33  ;;  %4083 = vmatprep.subr.bf16.mxu0 %v6078_v43  ;;  %v6093_v6 = vpack.c.bf16 %v745_v62, %v741_v54  ;;  %v740_v43 = vld [vmem:[#allocation5 + $0x2d0] sm:$0xff]  ;;  %v751_v47 = vld [vmem:[#allocation5 + $0x328] sm:$0xff]  ;;  %v749_v36 = vld [vmem:[#allocation5 + $0x318] sm:$0xff] }
 0x151   :  { %7275 = vst [vmem:[#allocation43_spill] sm:$0xff] %v6091_v57  ;;  %v753_v62 = vld [vmem:[#allocation5 + $0x338] sm:$0xff]  ;;  %v750_v54 = vld [vmem:[#allocation5 + $0x320] sm:$0xff] }
 0x152   :  { %7276 = vst [vmem:[#allocation44_spill] sm:$0xff] %v6093_v6  ;;  %v769_v37 = vld [vmem:[#allocation5 + $0x3b8] sm:$0xff] }
 0x153   :  { %4145 = vmatpush1.bf16.msra.mxu1 %v6074_v26  ;;  %4085 = vmatpush1.bf16.msra.mxu0 %v6083_v18  ;;  %v738_v26 = vld [vmem:[#allocation5 + $0x2c0] sm:$0xff] }
 0x154   :  { %4147 = vmatprep.subr.bf16.mxu1 %v6080_v61  ;;  %v6095_v33 = vpack.c.bf16 %v742_v0, %v738_v26  ;;  %v744_v61 = vld [vmem:[#allocation5 + $0x2f0] sm:$0xff]  ;;  %4087 = vmatprep.subr.bf16.mxu0 %v6091_v57  ;;  %v746_v26 = vld [vmem:[#allocation5 + $0x300] sm:$0xff]  ;;  %v6105_v0 = vpack.c.bf16 %v753_v62, %v749_v36  ;;  %v761_v36 = vld [vmem:[#allocation5 + $0x378] sm:$0xff] }
 0x155   :  { %v6098_v9 = vpack.c.bf16 %v744_v61, %v740_v43  ;;  %v6107_v18 = vpack.c.bf16 %v750_v54, %v746_v26  ;;  %v748_v43 = vld [vmem:[#allocation5 + $0x310] sm:$0xff]  ;;  %v754_v62 = vld [vmem:[#allocation5 + $0x340] sm:$0xff] }
 0x156   :  { %7277 = vst [vmem:[#allocation45_spill] sm:$0xff] %v6095_v33  ;;  %7280 = vst [vmem:[#allocation48_spill] sm:$0xff] %v6105_v0  ;;  %v752_v61 = vld [vmem:[#allocation5 + $0x330] sm:$0xff]  ;;  %v758_v26 = vld [vmem:[#allocation5 + $0x360] sm:$0xff] }
 0x157   :  { %4149 = vmatpush1.bf16.msra.mxu1 %v6087_v58  ;;  %7278 = vst [vmem:[#allocation46_spill] sm:$0xff] %v6098_v9  ;;  %4089 = vmatpush1.bf16.msra.mxu0 %v6095_v33  ;;  %v6103_v58 = vpack.c.bf16 %v751_v47, %v747_v53  ;;  %7281 = vst [vmem:[#allocation49_spill] sm:$0xff] %v6107_v18  ;;  %v759_v53 = vld [vmem:[#allocation5 + $0x368] sm:$0xff]  ;;  %v757_v47 = vld [vmem:[#allocation5 + $0x358] sm:$0xff]  ;;  %v6119_v57 = vpack.c.bf16 %v758_v26, %v754_v62 }
 0x158   :  { %4151 = vmatprep.subr.bf16.mxu1 %v6093_v6  ;;  %v6110_v6 = vpack.c.bf16 %v752_v61, %v748_v43  ;;  %v6117_v54 = vpack.c.bf16 %v761_v36, %v757_v47  ;;  %v756_v43 = vld [vmem:[#allocation5 + $0x350] sm:$0xff]  ;;  %v762_v47 = vld [vmem:[#allocation5 + $0x380] sm:$0xff] }
 0x159   :  { %7279 = vst [vmem:[#allocation47_spill] sm:$0xff] %v6103_v58  ;;  %4091 = vmatprep.subr.bf16.mxu0 %v6103_v58  ;;  %7285 = vst [vmem:[#allocation53_spill] sm:$0xff] %v6119_v57  ;;  %v760_v61 = vld [vmem:[#allocation5 + $0x370] sm:$0xff]  ;;  %v763_v58 = vld [vmem:[#allocation5 + $0x388] sm:$0xff] }
 0x15a   :  { %7282 = vst [vmem:[#allocation50_spill] sm:$0xff] %v6110_v6  ;;  %7284 = vst [vmem:[#allocation52_spill] sm:$0xff] %v6117_v54  ;;  %v766_v36 = vld [vmem:[#allocation5 + $0x3a0] sm:$0xff]  ;;  %v764_v62 = vld [vmem:[#allocation5 + $0x390] sm:$0xff] }
 0x15b   :  { %4153 = vmatpush1.bf16.msra.mxu1 %v6098_v9  ;;  %4093 = vmatpush1.bf16.msra.mxu0 %v6107_v18  ;;  %v755_v9 = vld [vmem:[#allocation5 + $0x348] sm:$0xff]  ;;  %v6122_v18 = vpack.c.bf16 %v760_v61, %v756_v43  ;;  %v6131_v26 = vpack.c.bf16 %v766_v36, %v762_v47  ;;  %v768_v43 = vld [vmem:[#allocation5 + $0x3b0] sm:$0xff] }
 0x15c   :  { %4155 = vmatprep.subr.bf16.mxu1 %v6105_v0  ;;  %v6115_v33 = vpack.c.bf16 %v759_v53, %v755_v9  ;;  %v767_v0 = vld [vmem:[#allocation5 + $0x3a8] sm:$0xff]  ;;  %v6128_v53 = vpack.c.bf16 %v769_v37, %v765_v4  ;;  %v773_v4 = vld [vmem:[#allocation5 + $0x3d8] sm:$0xff]  ;;  %v776_v47 = vld [vmem:[#allocation5 + $0x3f0] sm:$0xff] }
 0x15d   :  { %7286 = vst [vmem:[#allocation54_spill] sm:$0xff] %v6122_v18  ;;  %v6126_v9 = vpack.c.bf16 %v767_v0, %v763_v58  ;;  %7289 = vst [vmem:[#allocation57_spill] sm:$0xff] %v6131_v26  ;;  %v771_v61 = vld [vmem:[#allocation5 + $0x3c8] sm:$0xff]  ;;  %v777_v37 = vld [vmem:[#allocation5 + $0x3f8] sm:$0xff] }
 0x15e   :  { %7283 = vst [vmem:[#allocation51_spill] sm:$0xff] %v6115_v33  ;;  %4095 = vmatprep.subr.bf16.mxu0 %v6115_v33  ;;  %7288 = vst [vmem:[#allocation56_spill] sm:$0xff] %v6128_v53  ;;  %v775_v33 = vld [vmem:[#allocation5 + $0x3e8] sm:$0xff]  ;;  %v770_v0 = vld [vmem:[#allocation5 + $0x3c0] sm:$0xff] }
 0x15f   :  { %4157 = vmatpush1.bf16.msra.mxu1 %v6110_v6  ;;  %4097 = vmatpush1.bf16.msra.mxu0 %v6119_v57  ;;  %7287 = vst [vmem:[#allocation55_spill] sm:$0xff] %v6126_v9  ;;  %v6137_v58 = vpack.c.bf16 %v775_v33, %v771_v61  ;;  %v6139_v57 = vpack.c.bf16 %v777_v37, %v773_v4  ;;  %v774_v6 = vld [vmem:[#allocation5 + $0x3e0] sm:$0xff]  ;;  %v7295_v33 = vmov 0.0|0.0  }
 0x160   :  { %4159 = vmatprep.subr.bf16.mxu1 %v6117_v54  ;;  %4099 = vmatprep.subr.bf16.mxu0 %v6126_v9  ;;  %v6135_v54 = vpack.c.bf16 %v768_v43, %v764_v62  ;;  %v6142_v36 = vpack.c.bf16 %v774_v6, %v770_v0  ;;  %v247_v43 = vlaneseq }
 0x161   :  { %7291 = vst [vmem:[#allocation59_spill] sm:$0xff] %v6137_v58  ;;  %7292 = vst [vmem:[#allocation60_spill] sm:$0xff] %v6139_v57 }
 0x162   :  { %7290 = vst [vmem:[#allocation58_spill] sm:$0xff] %v6135_v54  ;;  %7293 = vst [vmem:[#allocation61_spill] sm:$0xff] %v6142_v36  ;;  %v6153_v61 = vshrl.u32 %v247_v43, 7 }
 0x163   :  { %4161 = vmatpush1.bf16.msra.mxu1 %v6122_v18  ;;  %v772_v18 = vld [vmem:[#allocation5 + $0x3d0] sm:$0xff]  ;;  %4101 = vmatpush1.bf16.msra.mxu0 %v6131_v26 }
 0x164   :  { %4163 = vmatprep.subr.bf16.mxu1 %v6128_v53  ;;  %4103 = vmatprep.subr.bf16.mxu0 %v6137_v58  ;;  %v6146_v62 = vpack.c.bf16 %v776_v47, %v772_v18  ;;  %v7208_v6 = vsub.s32 0, %v6153_v61  ;;  %v245_v18 = vld [vmem:[%s7110_s4] sm:$0x7] }
 0x166   :  { %7294 = vst [vmem:[#allocation62_spill] sm:$0xff] %v6146_v62  ;;  %v250_v0 = vrot.slane %v245_v18, %v7208_v6 }
 0x167   :  { %4165 = vmatpush1.bf16.msra.mxu1 %v6135_v54  ;;  %4105 = vmatpush1.bf16.msra.mxu0 %v6142_v36  ;;  %v7218_v36 = vsub.s32 2, %v6153_v61 }
 0x168   :  { %4167 = vmatprep.subr.bf16.mxu1 %v6139_v57  ;;  %4171 = vmatprep.subr.bf16.mxu0 %v5839_v7  ;;  %v7217_v7 = vsub.s32 1, %v6153_v61 }
 0x16a   :  { %v254_v57 = vrot.slane %v245_v18, %v7217_v7 }
 0x16b   :  { %4169 = vmatpush1.bf16.msra.mxu1 %v6146_v62 }
 0x16c   :  { %4202 = vmatprep.subr.bf16.mxu1 %v7295_v33 }
 0x1d5   :  { %v6156_v4 = vpop.f32.mrb[2].mxu1 }
 0x1d6   :  { %7296 = vst [vmem:[#allocation63_spill] sm:$0xff] %v6156_v4  ;;  %v3665_v37 = vpop.f32.mrb[3].mxu1 }
 0x1d7   :  { %v258_v37 = vrot.slane %v245_v18, %v7218_v36 }
 0x1d9   :  { %v345_v47 = vpop.f32.mrb[4].mxu1 }
 0x1da   :  { %v347_v62 = vpop.f32.mrb[5].mxu1  ;;  %v6165_v43 = vadd.f32 %v345_v47, %v250_v0 }
 0x1db   :  { %v6179_v30 = vadd.f32 %v347_v62, %v254_v57 }
 0x1dc   :  { %v622_v6 = vadd.f32 %v5978_v3, %v6165_v43  ;;  %v6186_v3 = vld [vmem:[%s7111_s5] ss:$0 sm:$0xff] }
 0x1dd   :  { %v351_v4 = vpop.f32.mrb[6].mxu1 }
 0x1de   :  { %v6169_v58 = vadd.f32 %v351_v4, %v250_v0  ;;  %v353_v54 = vpop.f32.mrb[7].mxu1  ;;  %v3462_v42 = vmul.f32 -1.442695, %v622_v6  ;;  %v629_v4 = vadd.f32 %v5983_v20, %v6179_v30 }
 0x1df   :  { %v6173_v26 = vadd.f32 %v353_v54, %v254_v57 }
 0x1e0   :  { %7297 = vst [vmem:[#allocation64_spill] sm:$0xff] %v6169_v58  ;;  %5492 = vpow2.f32 %v3462_v42  ;;  %v3463_v0 = vmul.f32 -1.442695, %v629_v4 }
 0x1e1   :  { %7298 = vst [vmem:[#allocation65_spill] sm:$0xff] %v6173_v26  ;;  %v3670_v53 = vpop.f32.mrb[8].mxu1 }
 0x1e2   :  { %v6177_v9 = vadd.f32 %v3670_v53, %v258_v37  ;;  %v422_v47 = vpop.f32.mrb[9].mxu1  ;;  %5494 = vpow2.f32 %v3463_v0 }
 0x1e3   :  { %v6189_v6 = vadd.f32 %v422_v47, %v258_v37  ;;  %v7303_v37 = vld [vmem:[#allocation20_spill] sm:$0xff]  ;;  %v7304_v47 = vld [vmem:[#allocation21_spill] sm:$0xff] }
 0x1e4   :  { %7299 = vst [vmem:[#allocation66_spill] sm:$0xff] %v6177_v9 }
 0x1ea   :  { %v5493_v7 = vpop.eup %5492 }
 0x1eb   :  { %v626_v18 = vadd.f32 1.0, %v5493_v7 }
 0x1ec   :  { %v5495_v54 = vpop.eup %5494 }
 0x1ed   :  { %5496 = vrcp.f32 %v626_v18  ;;  %v633_v53 = vadd.f32 1.0, %v5495_v54  ;;  %v7305_v54 = vld [vmem:[#allocation22_spill] sm:$0xff] }
 0x1ef   :  { %5498 = vrcp.f32 %v633_v53  ;;  %v7306_v53 = vld [vmem:[#allocation23_spill] sm:$0xff] }
 0x1f7   :  { %v5497_v42 = vpop.eup %5496 }
 0x1f9   :  { %v5499_v7 = vpop.eup %5498 }
 0x1fa   :  { %v646_v0 = vsub.f32 1.0, %v5499_v7  ;;  %v648_v26 = vmul.f32 0.0, %v5499_v7  ;;  %v7312_v7 = vld [vmem:[#allocation29_spill] sm:$0xff] }
 0x201   :  { %v618_v36 = vpop.f32.mrb[10].mxu1 }
 0x202   :  { %v642_v57 = vadd.f32 %v6186_v3, %v618_v36  ;;  %v3705_v62 = vpop.f32.mrb[11].mxu1  ;;  %v7300_v36 = vmov 0.0  }
 0x203   :  { %v7308_v62 = vld [vmem:[#allocation25_spill] sm:$0xff] }
 0x204   :  { %v643_v20 = vmul.f32 %v5497_v42, %v642_v57  ;;  %v7307_v57 = vld [vmem:[#allocation24_spill] sm:$0xff]  ;;  %v7309_v42 = vld [vmem:[#allocation26_spill] sm:$0xff] }
 0x206   :  { %v644_v4 = vadd.f32 %v643_v20, %v6189_v6  ;;  %v7310_v20 = vld [vmem:[#allocation27_spill] sm:$0xff] }
 0x208   :  { %5500 = vtanh.f32 %v644_v4  ;;  %v7311_v4 = vld [vmem:[#allocation28_spill] sm:$0xff] }
 0x212   :  { %v5501_v18 = vpop.eup %5500 }
 0x213   :  { %v647_v9 = vmul.f32 %v5501_v18, %v646_v0  ;;  %v7313_v0 = vld [vmem:[#allocation30_spill] sm:$0xff]  ;;  %v7314_v18 = vld [vmem:[#allocation31_spill] sm:$0xff] }
 0x215   :  { %v6192_v58 = vadd.f32 %v648_v26, %v647_v9  ;;  %v7301_v9 = vld [vmem:[#allocation18_spill] sm:$0xff]  ;;  %v7302_v26 = vld [vmem:[#allocation19_spill] sm:$0xff] }
 0x217   :  { %864 = vmatmul.mubr.f32.vlgmr.msra.gmra.mrb[2].mxu0 %v6192_v58  ;;  %935 = vmatmul.mubr.f32.vlgmr.msra.gmra.mrb[12].mxu1 %v6192_v58 }
 0x218   :  { %4173 = vmatpush1.bf16.msra.mxu0 %v5841_v8  ;;  %4204 = vmatpush3.bf16.msra.mxu1 %v5920_v2 }
 0x219   :  { %4175 = vmatprep.subr.bf16.mxu0 %v5844_v12  ;;  %4205 = vmatprep.subr.bf16.mxu1 %v7295_v33 }
 0x21a   :  { %1024 = vmatprep.mubr.f32.mxu0 %v7300_v36  ;;  %3738 = vmatprep.mubr.msk.f32.mxu1 %vm5732_vm0, %v7300_v36 }
 0x21c   :  { %4177 = vmatpush1.bf16.msra.mxu0 %v5850_v16  ;;  %4207 = vmatpush3.bf16.msra.mxu1 %v5923_v5 }
 0x21d   :  { %4179 = vmatprep.subr.bf16.mxu0 %v5853_v17  ;;  %4208 = vmatprep.subr.bf16.mxu1 %v7295_v33 }
 0x220   :  { %4181 = vmatpush1.bf16.msra.mxu0 %v5856_v22  ;;  %4210 = vmatpush3.bf16.msra.mxu1 %v5929_v10 }
 0x221   :  { %4183 = vmatprep.subr.bf16.mxu0 %v5859_v23  ;;  %4211 = vmatprep.subr.bf16.mxu1 %v7295_v33 }
 0x224   :  { %4185 = vmatpush1.bf16.msra.mxu0 %v5862_v28  ;;  %4213 = vmatpush3.bf16.msra.mxu1 %v5933_v14 }
 0x225   :  { %4187 = vmatprep.subr.bf16.mxu0 %v5865_v29  ;;  %4214 = vmatprep.subr.bf16.mxu1 %v7295_v33 }
 0x228   :  { %4189 = vmatpush1.bf16.msra.mxu0 %v5868_v34  ;;  %4216 = vmatpush3.bf16.msra.mxu1 %v5937_v19 }
 0x229   :  { %4191 = vmatprep.subr.bf16.mxu0 %v5871_v35  ;;  %4217 = vmatprep.subr.bf16.mxu1 %v7295_v33 }
 0x22c   :  { %4193 = vmatpush1.bf16.msra.mxu0 %v5875_v38  ;;  %4219 = vmatpush3.bf16.msra.mxu1 %v5941_v24 }
 0x22d   :  { %4195 = vmatprep.subr.bf16.mxu0 %v5878_v41  ;;  %4220 = vmatprep.subr.bf16.mxu1 %v7295_v33 }
 0x230   :  { %4197 = vmatpush1.bf16.msra.mxu0 %v5880_v44  ;;  %4222 = vmatpush3.bf16.msra.mxu1 %v5945_v27 }
 0x231   :  { %4199 = vmatprep.subr.bf16.mxu0 %v5891_v49  ;;  %4223 = vmatprep.subr.bf16.mxu1 %v7295_v33 }
 0x234   :  { %4201 = vmatpush1.bf16.msra.mxu0 %v5893_v52  ;;  %4225 = vmatpush3.bf16.msra.mxu1 %v5949_v32 }
 0x235   :  { %4227 = vmatprep.subr.bf16.mxu0 %v5955_v39  ;;  %4291 = vmatprep.subr.bf16.mxu1 %v5957_v45 }
 0x237   :  { %1025 = vmatmul.mubr.f32.vlgmr.msra.gmra.mrb[4].mxu0 %v6192_v58  ;;  %3739 = vmatmul.mubr.f32.vlgmr.msra.gmra.mrb[14].mxu1 %v6192_v58 }
 0x238   :  { %4229 = vmatpush1.bf16.msra.mxu0 %v5959_v46  ;;  %4293 = vmatpush1.bf16.msra.mxu1 %v5962_v50 }
 0x239   :  { %4231 = vmatprep.subr.bf16.mxu0 %v5967_v55  ;;  %4295 = vmatprep.subr.bf16.mxu1 %v5969_v59 }
 0x23c   :  { %4233 = vmatpush1.bf16.msra.mxu0 %v5971_v60  ;;  %4297 = vmatpush1.bf16.msra.mxu1 %v5974_v1 }
 0x23d   :  { %4235 = vmatprep.subr.bf16.mxu0 %v5981_v11  ;;  %4299 = vmatprep.subr.bf16.mxu1 %v5985_v21 }
 0x240   :  { %4237 = vmatpush1.bf16.msra.mxu0 %v5987_v25  ;;  %4301 = vmatpush1.bf16.msra.mxu1 %v5990_v31 }
 0x241   :  { %4239 = vmatprep.subr.bf16.mxu0 %v5995_v40  ;;  %4303 = vmatprep.subr.bf16.mxu1 %v5997_v48 }
 0x244   :  { %4241 = vmatpush1.bf16.msra.mxu0 %v5999_v51  ;;  %4305 = vmatpush1.bf16.msra.mxu1 %v6002_v56 }
 0x245   :  { %4243 = vmatprep.subr.bf16.mxu0 %v6007_v63  ;;  %4307 = vmatprep.subr.bf16.mxu1 %v6009_v13  ;;  %v7352_v63 = vsub.s32 2, %v6153_v61 }
 0x248   :  { %4245 = vmatpush1.bf16.msra.mxu0 %v6011_v15  ;;  %4309 = vmatpush1.bf16.msra.mxu1 %v7301_v9 }
 0x249   :  { %4247 = vmatprep.subr.bf16.mxu0 %v7302_v26  ;;  %4311 = vmatprep.subr.bf16.mxu1 %v7303_v37 }
 0x24c   :  { %4249 = vmatpush1.bf16.msra.mxu0 %v7304_v47  ;;  %4313 = vmatpush1.bf16.msra.mxu1 %v7305_v54  ;;  %v7315_v47 = vld [vmem:[#allocation32_spill] sm:$0xff]  ;;  %v7316_v54 = vld [vmem:[#allocation33_spill] sm:$0xff] }
 0x24d   :  { %4251 = vmatprep.subr.bf16.mxu0 %v7306_v53  ;;  %4315 = vmatprep.subr.bf16.mxu1 %v7307_v57  ;;  %v7317_v53 = vld [vmem:[#allocation34_spill] sm:$0xff]  ;;  %v7318_v57 = vld [vmem:[#allocation35_spill] sm:$0xff] }
 0x250   :  { %4253 = vmatpush1.bf16.msra.mxu0 %v7308_v62  ;;  %4317 = vmatpush1.bf16.msra.mxu1 %v7309_v42  ;;  %v7319_v62 = vld [vmem:[#allocation36_spill] sm:$0xff]  ;;  %v7320_v42 = vld [vmem:[#allocation37_spill] sm:$0xff] }
 0x251   :  { %4255 = vmatprep.subr.bf16.mxu0 %v7310_v20  ;;  %4319 = vmatprep.subr.bf16.mxu1 %v7311_v4  ;;  %v7321_v20 = vld [vmem:[#allocation38_spill] sm:$0xff]  ;;  %v7322_v4 = vld [vmem:[#allocation39_spill] sm:$0xff] }
 0x254   :  { %4257 = vmatpush1.bf16.msra.mxu0 %v7312_v7  ;;  %4321 = vmatpush1.bf16.msra.mxu1 %v7313_v0  ;;  %v7323_v7 = vld [vmem:[#allocation40_spill] sm:$0xff]  ;;  %v7324_v0 = vld [vmem:[#allocation41_spill] sm:$0xff] }
 0x255   :  { %4259 = vmatprep.subr.bf16.mxu0 %v7314_v18  ;;  %4323 = vmatprep.subr.bf16.mxu1 %v7315_v47  ;;  %v7325_v18 = vld [vmem:[#allocation42_spill] sm:$0xff]  ;;  %v7326_v47 = vld [vmem:[#allocation43_spill] sm:$0xff] }
 0x258   :  { %4261 = vmatpush1.bf16.msra.mxu0 %v7316_v54  ;;  %4325 = vmatpush1.bf16.msra.mxu1 %v7317_v53  ;;  %v7327_v54 = vld [vmem:[#allocation44_spill] sm:$0xff]  ;;  %v7328_v53 = vld [vmem:[#allocation45_spill] sm:$0xff] }
 0x259   :  { %4263 = vmatprep.subr.bf16.mxu0 %v7318_v57  ;;  %4327 = vmatprep.subr.bf16.mxu1 %v7319_v62  ;;  %v7329_v57 = vld [vmem:[#allocation46_spill] sm:$0xff]  ;;  %v7330_v62 = vld [vmem:[#allocation47_spill] sm:$0xff] }
 0x25c   :  { %4265 = vmatpush1.bf16.msra.mxu0 %v7320_v42  ;;  %4329 = vmatpush1.bf16.msra.mxu1 %v7321_v20  ;;  %v7331_v42 = vld [vmem:[#allocation48_spill] sm:$0xff]  ;;  %v7332_v20 = vld [vmem:[#allocation49_spill] sm:$0xff] }
 0x25d   :  { %4267 = vmatprep.subr.bf16.mxu0 %v7322_v4  ;;  %4331 = vmatprep.subr.bf16.mxu1 %v7323_v7  ;;  %v7333_v4 = vld [vmem:[#allocation50_spill] sm:$0xff]  ;;  %v7334_v7 = vld [vmem:[#allocation51_spill] sm:$0xff] }
 0x260   :  { %4269 = vmatpush1.bf16.msra.mxu0 %v7324_v0  ;;  %4333 = vmatpush1.bf16.msra.mxu1 %v7325_v18  ;;  %v7335_v0 = vld [vmem:[#allocation52_spill] sm:$0xff]  ;;  %v7336_v18 = vld [vmem:[#allocation53_spill] sm:$0xff] }
 0x261   :  { %4271 = vmatprep.subr.bf16.mxu0 %v7326_v47  ;;  %4335 = vmatprep.subr.bf16.mxu1 %v7327_v54  ;;  %v7337_v47 = vld [vmem:[#allocation54_spill] sm:$0xff]  ;;  %v7338_v54 = vld [vmem:[#allocation55_spill] sm:$0xff] }
 0x264   :  { %4273 = vmatpush1.bf16.msra.mxu0 %v7328_v53  ;;  %4337 = vmatpush1.bf16.msra.mxu1 %v7329_v57  ;;  %v7339_v53 = vld [vmem:[#allocation56_spill] sm:$0xff]  ;;  %v7340_v57 = vld [vmem:[#allocation57_spill] sm:$0xff] }
 0x265   :  { %4275 = vmatprep.subr.bf16.mxu0 %v7330_v62  ;;  %4339 = vmatprep.subr.bf16.mxu1 %v7331_v42  ;;  %v7341_v62 = vld [vmem:[#allocation58_spill] sm:$0xff]  ;;  %v7342_v42 = vld [vmem:[#allocation59_spill] sm:$0xff] }
 0x268   :  { %4277 = vmatpush1.bf16.msra.mxu0 %v7332_v20  ;;  %4341 = vmatpush1.bf16.msra.mxu1 %v7333_v4  ;;  %v7343_v20 = vld [vmem:[#allocation60_spill] sm:$0xff]  ;;  %v7344_v4 = vld [vmem:[#allocation61_spill] sm:$0xff] }
 0x269   :  { %4279 = vmatprep.subr.bf16.mxu0 %v7334_v7  ;;  %4343 = vmatprep.subr.bf16.mxu1 %v7335_v0  ;;  %v7345_v7 = vld [vmem:[#allocation62_spill] sm:$0xff]  ;;  %v7346_v0 = vld [vmem:[#allocation11_spill] sm:$0xff] }
 0x26c   :  { %4281 = vmatpush1.bf16.msra.mxu0 %v7336_v18  ;;  %4345 = vmatpush1.bf16.msra.mxu1 %v7337_v47 }
 0x26d   :  { %4283 = vmatprep.subr.bf16.mxu0 %v7338_v54  ;;  %4347 = vmatprep.subr.bf16.mxu1 %v7339_v53  ;;  %v432_v53 = vld [vmem:[%s7113_s7] sm:$0xf] }
 0x26e   :  { %v6315_v56 = vrot.slane %v432_v53, %v7352_v63 }
 0x270   :  { %4285 = vmatpush1.bf16.msra.mxu0 %v7340_v57  ;;  %4349 = vmatpush1.bf16.msra.mxu1 %v7341_v62  ;;  %v7347_v57 = vsub.s32 0, %v6153_v61 }
 0x271   :  { %4287 = vmatprep.subr.bf16.mxu0 %v7342_v42  ;;  %4351 = vmatprep.subr.bf16.mxu1 %v7343_v20  ;;  %v7349_v42 = vsub.s32 1, %v6153_v61 }
 0x272   :  { %v6302_v54 = vrot.slane %v432_v53, %v7347_v57  ;;  %v793_v57 = vsub.s32 3, %v6153_v61 }
 0x273   :  { %v6306_v62 = vrot.slane %v432_v53, %v7349_v42 }
 0x274   :  { %4289 = vmatpush1.bf16.msra.mxu0 %v7344_v4  ;;  %4353 = vmatpush1.bf16.msra.mxu1 %v7345_v7  ;;  %7348 = vst [vmem:[#allocation67_spill] sm:$0xff] %v6302_v54  ;;  %v6311_v42 = vrot.slane %v432_v53, %v793_v57 }
 0x275   :  { %4355 = vmatprep.subr.bf16.mxu0 %v7346_v0  ;;  %4386 = vmatprep.subr.bf16.mxu1 %v7295_v33  ;;  %7350 = vst [vmem:[#allocation68_spill] sm:$0xff] %v6306_v62 }
 0x276   :  { %7351 = vst [vmem:[#allocation69_spill] sm:$0xff] %v6311_v42 }
 0x2ea   :  { %v865_v20 = vpop.f32.mrb[2].mxu0  ;;  %v936_v4 = vpop.f32.mrb[12].mxu1 }
 0x2eb   :  { %v866_v7 = vadd.f32 %v865_v20, %v6302_v54  ;;  %v867_v47 = vpop.f32.mrb[3].mxu0  ;;  %v938_v0 = vpop.f32.mrb[13].mxu1 }
 0x2ec   :  { %v868_v37 = vadd.f32 %v867_v47, %v6306_v62  ;;  %v937_v47 = vadd.f32 %v936_v4, %v6315_v56 }
 0x2ed   :  { %v3465_v18 = vmul.f32 -1.442695, %v866_v7  ;;  %v939_v7 = vadd.f32 %v938_v0, %v6311_v42 }
 0x2ee   :  { %v3466_v26 = vmul.f32 -1.442695, %v868_v37 }
 0x2ef   :  { %5502 = vpow2.f32 %v3465_v18 }
 0x2f0   :  { %5504 = vpow2.f32 %v3466_v26 }
 0x2f9   :  { %v5503_v9 = vpop.eup %5502 }
 0x2fa   :  { %v944_v15 = vadd.f32 1.0, %v5503_v9  ;;  %v5505_v13 = vpop.eup %5504 }
 0x2fb   :  { %v950_v20 = vadd.f32 1.0, %v5505_v13 }
 0x2fc   :  { %5506 = vrcp.f32 %v944_v15 }
 0x2fd   :  { %5508 = vrcp.f32 %v950_v20 }
 0x306   :  { %v5507_v54 = vpop.eup %5506 }
 0x307   :  { %v953_v26 = vmul.f32 %v5507_v54, %v939_v7  ;;  %v5509_v0 = vpop.eup %5508 }
 0x308   :  { %v956_v4 = vsub.f32 1.0, %v5509_v0  ;;  %v958_v7 = vmul.f32 0.0, %v5509_v0 }
 0x309   :  { %v954_v37 = vadd.f32 %v953_v26, %v937_v47 }
 0x30a   :  { %v1026_v9 = vpop.f32.mrb[4].mxu0  ;;  %v1097_v15 = vpop.f32.mrb[14].mxu1 }
 0x30b   :  { %5510 = vtanh.f32 %v954_v37  ;;  %v1102_v18 = vrot.slane %v1026_v9, 6  ;;  %v1028_v62 = vpop.f32.mrb[5].mxu0  ;;  %v3740_v57 = vpop.f32.mrb[15].mxu1 }
 0x30c   :  { %v1112_v51 = vrot.slane %v1028_v62, 6 }
 0x30d   :  { %v1104_v61 = vadd.f32 %v1102_v18, %v6165_v43 }
 0x30e   :  { %v1114_v63 = vadd.f32 %v1112_v51, %v6179_v30  ;;  %v1121_v51 = vadd.f32 %v6186_v3, %v1097_v15  ;;  %v7354_v15 = vld [vmem:[#allocation14_spill] sm:$0xff] }
 0x30f   :  { %v3467_v13 = vmul.f32 -1.442695, %v1104_v61 }
 0x310   :  { %v3468_v53 = vmul.f32 -1.442695, %v1114_v63  ;;  %v1123_v61 = vrot.slane %v1121_v51, 6  ;;  %v7358_v51 = vld [vmem:[#allocation18_spill] sm:$0xff] }
 0x311   :  { %5512 = vpow2.f32 %v3467_v13  ;;  %v1131_v13 = vrot.slane %v6192_v58, 6  ;;  %v7353_v58 = vld [vmem:[#allocation13_spill] sm:$0xff] }
 0x312   :  { %5514 = vpow2.f32 %v3468_v53 }
 0x315   :  { %v5511_v20 = vpop.eup %5510 }
 0x316   :  { %v957_v54 = vmul.f32 %v5511_v20, %v956_v4 }
 0x318   :  { %v6321_v47 = vadd.f32 %v958_v7, %v957_v54 }
 0x31a   :  { %v1136_v26 = vrot.slane %v6321_v47, 6 }
 0x31b   :  { %v5513_v37 = vpop.eup %5512 }
 0x31c   :  { %v5515_v9 = vpop.eup %5514  ;;  %v1108_v62 = vadd.f32 1.0, %v5513_v37  ;;  %v1139_v57 = vrot.slane %v1136_v26, 2 }
 0x31d   :  { %v1118_v18 = vadd.f32 1.0, %v5515_v9 }
 0x31e   :  { %5516 = vrcp.f32 %v1108_v62  ;;  %1206 = vmatprep.mubr.f32.mxu0 %v1139_v57  ;;  %1277 = vmatprep.mubr.f32.mxu1 %v1139_v57  ;;  %v7355_v62 = vld [vmem:[#allocation15_spill] sm:$0xff]  ;;  %v7356_v57 = vld [vmem:[#allocation16_spill] sm:$0xff] }
 0x31f   :  { %5518 = vrcp.f32 %v1118_v18  ;;  %v7357_v18 = vld [vmem:[#allocation17_spill] sm:$0xff] }
 0x328   :  { %v5517_v63 = vpop.eup %5516 }
 0x329   :  { %v5519_v53 = vpop.eup %5518  ;;  %v1125_v0 = vmul.f32 %v5517_v63, %v1123_v61  ;;  %v7359_v61 = vld [vmem:[#allocation19_spill] sm:$0xff]  ;;  %v7360_v63 = vld [vmem:[#allocation20_spill] sm:$0xff] }
 0x32a   :  { %v1133_v4 = vmul.f32 %v5519_v53, %v1131_v13  ;;  %v1128_v54 = vsub.f32 1.0, %v5519_v53  ;;  %v7361_v13 = vld [vmem:[#allocation21_spill] sm:$0xff]  ;;  %v7362_v53 = vld [vmem:[#allocation22_spill] sm:$0xff] }
 0x32b   :  { %v1126_v20 = vadd.f32 %v1125_v0, %v6189_v6  ;;  %v7363_v0 = vld [vmem:[#allocation23_spill] sm:$0xff] }
 0x32d   :  { %5520 = vtanh.f32 %v1126_v20  ;;  %v7365_v20 = vld [vmem:[#allocation25_spill] sm:$0xff] }
 0x337   :  { %v5521_v7 = vpop.eup %5520 }
 0x338   :  { %v1129_v26 = vmul.f32 %v5521_v7, %v1128_v54  ;;  %v7366_v54 = vld [vmem:[#allocation26_spill] sm:$0xff]  ;;  %v7367_v7 = vld [vmem:[#allocation27_spill] sm:$0xff] }
 0x33a   :  { %v6327_v37 = vadd.f32 %v1133_v4, %v1129_v26  ;;  %v7364_v4 = vld [vmem:[#allocation24_spill] sm:$0xff] }
 0x33b   :  { %v7368_v26 = vld [vmem:[#allocation28_spill] sm:$0xff] }
 0x33c   :  { %v1138_v9 = vrot.slane %v6327_v37, 2 }
 0x33e   :  { %1207 = vmatmul.mubr.f32.vlgmr.msra.gmra.mrb[6].mxu0 %v1138_v9  ;;  %1278 = vmatmul.mubr.f32.vlgmr.msra.gmra.mrb[16].mxu1 %v1138_v9 }
 0x33f   :  { %4357 = vmatpush1.bf16.msra.mxu0 %v5841_v8  ;;  %4388 = vmatpush3.bf16.msra.mxu1 %v5920_v2 }
 0x340   :  { %4359 = vmatprep.subr.bf16.mxu0 %v5844_v12  ;;  %4389 = vmatprep.subr.bf16.mxu1 %v7295_v33 }
 0x341   :  { %1367 = vmatprep.mubr.f32.mxu0 %v7300_v36  ;;  %3773 = vmatprep.mubr.msk.f32.mxu1 %vm5732_vm0, %v7300_v36 }
 0x343   :  { %4361 = vmatpush1.bf16.msra.mxu0 %v5850_v16  ;;  %4391 = vmatpush3.bf16.msra.mxu1 %v5923_v5 }
 0x344   :  { %4363 = vmatprep.subr.bf16.mxu0 %v5853_v17  ;;  %4392 = vmatprep.subr.bf16.mxu1 %v7295_v33 }
 0x347   :  { %4365 = vmatpush1.bf16.msra.mxu0 %v5856_v22  ;;  %4394 = vmatpush3.bf16.msra.mxu1 %v5929_v10 }
 0x348   :  { %4367 = vmatprep.subr.bf16.mxu0 %v5859_v23  ;;  %4395 = vmatprep.subr.bf16.mxu1 %v7295_v33 }
 0x34b   :  { %4369 = vmatpush1.bf16.msra.mxu0 %v5862_v28  ;;  %4397 = vmatpush3.bf16.msra.mxu1 %v5933_v14 }
 0x34c   :  { %4371 = vmatprep.subr.bf16.mxu0 %v5865_v29  ;;  %4398 = vmatprep.subr.bf16.mxu1 %v7295_v33 }
 0x34f   :  { %4373 = vmatpush1.bf16.msra.mxu0 %v5868_v34  ;;  %4400 = vmatpush3.bf16.msra.mxu1 %v5937_v19 }
 0x350   :  { %4375 = vmatprep.subr.bf16.mxu0 %v5871_v35  ;;  %4401 = vmatprep.subr.bf16.mxu1 %v7295_v33 }
 0x353   :  { %4377 = vmatpush1.bf16.msra.mxu0 %v5875_v38  ;;  %4403 = vmatpush3.bf16.msra.mxu1 %v5941_v24 }
 0x354   :  { %4379 = vmatprep.subr.bf16.mxu0 %v5878_v41  ;;  %4404 = vmatprep.subr.bf16.mxu1 %v7295_v33 }
 0x357   :  { %4381 = vmatpush1.bf16.msra.mxu0 %v5880_v44  ;;  %4406 = vmatpush3.bf16.msra.mxu1 %v5945_v27 }
 0x358   :  { %4383 = vmatprep.subr.bf16.mxu0 %v5891_v49  ;;  %4407 = vmatprep.subr.bf16.mxu1 %v7295_v33 }
 0x35b   :  { %4385 = vmatpush1.bf16.msra.mxu0 %v5893_v52  ;;  %4409 = vmatpush3.bf16.msra.mxu1 %v5949_v32 }
 0x35c   :  { %4411 = vmatprep.subr.bf16.mxu0 %v5955_v39  ;;  %4475 = vmatprep.subr.bf16.mxu1 %v5957_v45 }
 0x35e   :  { %1368 = vmatmul.mubr.f32.vlgmr.msra.gmra.mrb[8].mxu0 %v1138_v9  ;;  %3774 = vmatmul.mubr.f32.vlgmr.msra.gmra.mrb[18].mxu1 %v1138_v9  ;;  %v7369_v9 = vld [vmem:[#allocation29_spill] sm:$0xff] }
 0x35f   :  { %4413 = vmatpush1.bf16.msra.mxu0 %v5959_v46  ;;  %4477 = vmatpush1.bf16.msra.mxu1 %v5962_v50 }
 0x360   :  { %4415 = vmatprep.subr.bf16.mxu0 %v5967_v55  ;;  %4479 = vmatprep.subr.bf16.mxu1 %v5969_v59 }
 0x363   :  { %4417 = vmatpush1.bf16.msra.mxu0 %v5971_v60  ;;  %4481 = vmatpush1.bf16.msra.mxu1 %v5974_v1 }
 0x364   :  { %4419 = vmatprep.subr.bf16.mxu0 %v5981_v11  ;;  %4483 = vmatprep.subr.bf16.mxu1 %v5985_v21 }
 0x367   :  { %4421 = vmatpush1.bf16.msra.mxu0 %v5987_v25  ;;  %4485 = vmatpush1.bf16.msra.mxu1 %v5990_v31 }
 0x368   :  { %4423 = vmatprep.subr.bf16.mxu0 %v5995_v40  ;;  %4487 = vmatprep.subr.bf16.mxu1 %v5997_v48 }
 0x36b   :  { %4425 = vmatpush1.bf16.msra.mxu0 %v7353_v58  ;;  %4489 = vmatpush1.bf16.msra.mxu1 %v7354_v15 }
 0x36c   :  { %4427 = vmatprep.subr.bf16.mxu0 %v7355_v62  ;;  %4491 = vmatprep.subr.bf16.mxu1 %v7356_v57 }
 0x36f   :  { %4429 = vmatpush1.bf16.msra.mxu0 %v7357_v18  ;;  %4493 = vmatpush1.bf16.msra.mxu1 %v7358_v51 }
 0x370   :  { %4431 = vmatprep.subr.bf16.mxu0 %v7359_v61  ;;  %4495 = vmatprep.subr.bf16.mxu1 %v7360_v63  ;;  %v7370_v61 = vld [vmem:[#allocation30_spill] sm:$0xff]  ;;  %v7371_v63 = vld [vmem:[#allocation31_spill] sm:$0xff] }
 0x373   :  { %4433 = vmatpush1.bf16.msra.mxu0 %v7361_v13  ;;  %4497 = vmatpush1.bf16.msra.mxu1 %v7362_v53  ;;  %v7372_v13 = vld [vmem:[#allocation32_spill] sm:$0xff]  ;;  %v7373_v53 = vld [vmem:[#allocation33_spill] sm:$0xff] }
 0x374   :  { %4435 = vmatprep.subr.bf16.mxu0 %v7363_v0  ;;  %4499 = vmatprep.subr.bf16.mxu1 %v7364_v4  ;;  %v7374_v0 = vld [vmem:[#allocation34_spill] sm:$0xff]  ;;  %v7375_v4 = vld [vmem:[#allocation35_spill] sm:$0xff] }
 0x377   :  { %4437 = vmatpush1.bf16.msra.mxu0 %v7365_v20  ;;  %4501 = vmatpush1.bf16.msra.mxu1 %v7366_v54  ;;  %v7376_v20 = vld [vmem:[#allocation36_spill] sm:$0xff]  ;;  %v7377_v54 = vld [vmem:[#allocation37_spill] sm:$0xff] }
 0x378   :  { %4439 = vmatprep.subr.bf16.mxu0 %v7367_v7  ;;  %4503 = vmatprep.subr.bf16.mxu1 %v7368_v26  ;;  %v7378_v7 = vld [vmem:[#allocation38_spill] sm:$0xff]  ;;  %v7379_v26 = vld [vmem:[#allocation39_spill] sm:$0xff] }
 0x37b   :  { %4441 = vmatpush1.bf16.msra.mxu0 %v7369_v9  ;;  %4505 = vmatpush1.bf16.msra.mxu1 %v7370_v61  ;;  %v7380_v9 = vld [vmem:[#allocation40_spill] sm:$0xff]  ;;  %v7381_v61 = vld [vmem:[#allocation41_spill] sm:$0xff] }
 0x37c   :  { %4443 = vmatprep.subr.bf16.mxu0 %v7371_v63  ;;  %4507 = vmatprep.subr.bf16.mxu1 %v7372_v13  ;;  %v7382_v63 = vld [vmem:[#allocation42_spill] sm:$0xff]  ;;  %v7383_v13 = vld [vmem:[#allocation43_spill] sm:$0xff] }
 0x37f   :  { %4445 = vmatpush1.bf16.msra.mxu0 %v7373_v53  ;;  %4509 = vmatpush1.bf16.msra.mxu1 %v7374_v0  ;;  %v7384_v53 = vld [vmem:[#allocation44_spill] sm:$0xff]  ;;  %v7385_v0 = vld [vmem:[#allocation45_spill] sm:$0xff] }
 0x380   :  { %4447 = vmatprep.subr.bf16.mxu0 %v7375_v4  ;;  %4511 = vmatprep.subr.bf16.mxu1 %v7376_v20  ;;  %v7386_v4 = vld [vmem:[#allocation46_spill] sm:$0xff]  ;;  %v7387_v20 = vld [vmem:[#allocation47_spill] sm:$0xff] }
 0x383   :  { %4449 = vmatpush1.bf16.msra.mxu0 %v7377_v54  ;;  %4513 = vmatpush1.bf16.msra.mxu1 %v7378_v7  ;;  %v7388_v54 = vld [vmem:[#allocation48_spill] sm:$0xff]  ;;  %v7389_v7 = vld [vmem:[#allocation49_spill] sm:$0xff] }
 0x384   :  { %4451 = vmatprep.subr.bf16.mxu0 %v7379_v26  ;;  %4515 = vmatprep.subr.bf16.mxu1 %v7380_v9  ;;  %v7390_v26 = vld [vmem:[#allocation50_spill] sm:$0xff]  ;;  %v7391_v9 = vld [vmem:[#allocation51_spill] sm:$0xff] }
 0x387   :  { %4453 = vmatpush1.bf16.msra.mxu0 %v7381_v61  ;;  %4517 = vmatpush1.bf16.msra.mxu1 %v7382_v63  ;;  %v7392_v61 = vld [vmem:[#allocation52_spill] sm:$0xff]  ;;  %v7393_v63 = vld [vmem:[#allocation53_spill] sm:$0xff] }
 0x388   :  { %4455 = vmatprep.subr.bf16.mxu0 %v7383_v13  ;;  %4519 = vmatprep.subr.bf16.mxu1 %v7384_v53  ;;  %v7394_v13 = vld [vmem:[#allocation54_spill] sm:$0xff]  ;;  %v7395_v53 = vld [vmem:[#allocation55_spill] sm:$0xff] }
 0x38b   :  { %4457 = vmatpush1.bf16.msra.mxu0 %v7385_v0  ;;  %4521 = vmatpush1.bf16.msra.mxu1 %v7386_v4  ;;  %v7396_v0 = vld [vmem:[#allocation56_spill] sm:$0xff]  ;;  %v7397_v4 = vld [vmem:[#allocation57_spill] sm:$0xff] }
 0x38c   :  { %4459 = vmatprep.subr.bf16.mxu0 %v7387_v20  ;;  %4523 = vmatprep.subr.bf16.mxu1 %v7388_v54  ;;  %v7398_v20 = vld [vmem:[#allocation58_spill] sm:$0xff]  ;;  %v7399_v54 = vld [vmem:[#allocation59_spill] sm:$0xff] }
 0x38f   :  { %4461 = vmatpush1.bf16.msra.mxu0 %v7389_v7  ;;  %4525 = vmatpush1.bf16.msra.mxu1 %v7390_v26  ;;  %v7400_v7 = vld [vmem:[#allocation60_spill] sm:$0xff]  ;;  %v7401_v26 = vld [vmem:[#allocation61_spill] sm:$0xff] }
 0x390   :  { %4463 = vmatprep.subr.bf16.mxu0 %v7391_v9  ;;  %4527 = vmatprep.subr.bf16.mxu1 %v7392_v61  ;;  %v7402_v9 = vld [vmem:[#allocation62_spill] sm:$0xff]  ;;  %v7403_v61 = vld [vmem:[#allocation11_spill] sm:$0xff] }
 0x393   :  { %4465 = vmatpush1.bf16.msra.mxu0 %v7393_v63  ;;  %4529 = vmatpush1.bf16.msra.mxu1 %v7394_v13  ;;  %v7404_v63 = vld [vmem:[#allocation67_spill] sm:$0xff] }
 0x394   :  { %4467 = vmatprep.subr.bf16.mxu0 %v7395_v53  ;;  %4531 = vmatprep.subr.bf16.mxu1 %v7396_v0 }
 0x397   :  { %4469 = vmatpush1.bf16.msra.mxu0 %v7397_v4  ;;  %4533 = vmatpush1.bf16.msra.mxu1 %v7398_v20  ;;  %v7405_v20 = vld [vmem:[#allocation68_spill] sm:$0xff] }
 0x398   :  { %4471 = vmatprep.subr.bf16.mxu0 %v7399_v54  ;;  %4535 = vmatprep.subr.bf16.mxu1 %v7400_v7 }
 0x39b   :  { %4473 = vmatpush1.bf16.msra.mxu0 %v7401_v26  ;;  %4537 = vmatpush1.bf16.msra.mxu1 %v7402_v9 }
 0x39c   :  { %4539 = vmatprep.subr.bf16.mxu0 %v7403_v61  ;;  %4570 = vmatprep.subr.bf16.mxu1 %v7295_v33 }
 0x411   :  { %v1208_v13 = vpop.f32.mrb[6].mxu0  ;;  %v1279_v53 = vpop.f32.mrb[16].mxu1 }
 0x412   :  { %v1209_v0 = vadd.f32 %v1208_v13, %v7404_v63  ;;  %v1210_v51 = vpop.f32.mrb[7].mxu0  ;;  %v1281_v4 = vpop.f32.mrb[17].mxu1  ;;  %v1280_v58 = vadd.f32 %v1279_v53, %v6315_v56 }
 0x413   :  { %v1211_v57 = vadd.f32 %v1210_v51, %v7405_v20  ;;  %v1282_v61 = vadd.f32 %v1281_v4, %v6311_v42 }
 0x414   :  { %v3469_v18 = vmul.f32 -1.442695, %v1209_v0 }
 0x415   :  { %v3470_v54 = vmul.f32 -1.442695, %v1211_v57 }
 0x416   :  { %5522 = vpow2.f32 %v3469_v18 }
 0x417   :  { %5524 = vpow2.f32 %v3470_v54 }
 0x420   :  { %v5523_v7 = vpop.eup %5522 }
 0x421   :  { %v1287_v26 = vadd.f32 1.0, %v5523_v7  ;;  %v5525_v9 = vpop.eup %5524 }
 0x422   :  { %v1293_v62 = vadd.f32 1.0, %v5525_v9 }
 0x423   :  { %5526 = vrcp.f32 %v1287_v26 }
 0x424   :  { %5528 = vrcp.f32 %v1293_v62 }
 0x42d   :  { %v5527_v15 = vpop.eup %5526 }
 0x42e   :  { %v1296_v13 = vmul.f32 %v5527_v15, %v1282_v61  ;;  %v5529_v4 = vpop.eup %5528 }
 0x42f   :  { %v1299_v53 = vsub.f32 1.0, %v5529_v4 }
 0x430   :  { %v1297_v63 = vadd.f32 %v1296_v13, %v1280_v58  ;;  %v1301_v58 = vmul.f32 %v5529_v4, %v6321_v47 }
 0x431   :  { %v1369_v48 = vpop.f32.mrb[8].mxu0  ;;  %v1440_v0 = vpop.f32.mrb[18].mxu1 }
 0x432   :  { %5530 = vtanh.f32 %v1297_v63  ;;  %v1445_v51 = vrot.slane %v1369_v48, 4  ;;  %v1371_v18 = vpop.f32.mrb[9].mxu0  ;;  %v3775_v57 = vpop.f32.mrb[19].mxu1 }
 0x433   :  { %v1455_v54 = vrot.slane %v1371_v18, 4 }
 0x434   :  { %v1447_v7 = vadd.f32 %v1445_v51, %v6165_v43 }
 0x435   :  { %v1457_v26 = vadd.f32 %v1455_v54, %v6179_v30 }
 0x436   :  { %v3471_v9 = vmul.f32 -1.442695, %v1447_v7 }
 0x437   :  { %v3472_v20 = vmul.f32 -1.442695, %v1457_v26  ;;  %v1473_v26 = vrot.slane %v6327_v37, 6  ;;  %v7406_v37 = vld [vmem:[#allocation12_spill] sm:$0xff] }
 0x438   :  { %5532 = vpow2.f32 %v3471_v9 }
 0x439   :  { %5534 = vpow2.f32 %v3472_v20  ;;  %v1464_v20 = vadd.f32 %v6186_v3, %v1440_v0  ;;  %v7407_v0 = vld [vmem:[#allocation13_spill] sm:$0xff] }
 0x43b   :  { %v1466_v54 = vrot.slane %v1464_v20, 4  ;;  %v7412_v20 = vld [vmem:[#allocation18_spill] sm:$0xff] }
 0x43c   :  { %v5531_v62 = vpop.eup %5530 }
 0x43d   :  { %v1300_v15 = vmul.f32 %v5531_v62, %v1299_v53 }
 0x43f   :  { %v6436_v61 = vadd.f32 %v1301_v58, %v1300_v15 }
 0x441   :  { %v1478_v48 = vrot.slane %v6436_v61, 4 }
 0x442   :  { %v5533_v63 = vpop.eup %5532 }
 0x443   :  { %v5535_v13 = vpop.eup %5534  ;;  %v1451_v18 = vadd.f32 1.0, %v5533_v63  ;;  %v1481_v51 = vrot.slane %v1478_v48, 4 }
 0x444   :  { %v1461_v57 = vadd.f32 1.0, %v5535_v13  ;;  %v7408_v13 = vld [vmem:[#allocation14_spill] sm:$0xff] }
 0x445   :  { %5536 = vrcp.f32 %v1451_v18  ;;  %1548 = vmatprep.mubr.f32.mxu0 %v1481_v51  ;;  %1619 = vmatprep.mubr.f32.mxu1 %v1481_v51  ;;  %v7409_v18 = vld [vmem:[#allocation15_spill] sm:$0xff]  ;;  %v7410_v51 = vld [vmem:[#allocation16_spill] sm:$0xff] }
 0x446   :  { %5538 = vrcp.f32 %v1461_v57  ;;  %v7411_v57 = vld [vmem:[#allocation17_spill] sm:$0xff] }
 0x44f   :  { %v5537_v7 = vpop.eup %5536 }
 0x450   :  { %v5539_v47 = vpop.eup %5538  ;;  %v1468_v9 = vmul.f32 %v5537_v7, %v1466_v54  ;;  %v7413_v54 = vld [vmem:[#allocation19_spill] sm:$0xff]  ;;  %v7414_v7 = vld [vmem:[#allocation20_spill] sm:$0xff] }
 0x451   :  { %v1475_v4 = vmul.f32 %v5539_v47, %v1473_v26  ;;  %v1471_v62 = vsub.f32 1.0, %v5539_v47  ;;  %v7415_v26 = vld [vmem:[#allocation21_spill] sm:$0xff]  ;;  %v7416_v47 = vld [vmem:[#allocation22_spill] sm:$0xff] }
 0x452   :  { %v1469_v53 = vadd.f32 %v1468_v9, %v6189_v6  ;;  %v7417_v9 = vld [vmem:[#allocation23_spill] sm:$0xff] }
 0x454   :  { %5540 = vtanh.f32 %v1469_v53  ;;  %v7419_v53 = vld [vmem:[#allocation25_spill] sm:$0xff] }
 0x45e   :  { %v5541_v15 = vpop.eup %5540 }
 0x45f   :  { %v1472_v58 = vmul.f32 %v5541_v15, %v1471_v62  ;;  %v7420_v62 = vld [vmem:[#allocation26_spill] sm:$0xff]  ;;  %v7421_v15 = vld [vmem:[#allocation27_spill] sm:$0xff] }
 0x461   :  { %v6442_v48 = vadd.f32 %v1475_v4, %v1472_v58  ;;  %v7418_v4 = vld [vmem:[#allocation24_spill] sm:$0xff] }
 0x462   :  { %v7422_v58 = vld [vmem:[#allocation28_spill] sm:$0xff] }
 0x463   :  { %v1480_v63 = vrot.slane %v6442_v48, 4 }
 0x465   :  { %1549 = vmatmul.mubr.f32.vlgmr.msra.gmra.mrb[10].mxu0 %v1480_v63  ;;  %1620 = vmatmul.mubr.f32.vlgmr.msra.gmra.mrb[20].mxu1 %v1480_v63 }
 0x466   :  { %4541 = vmatpush1.bf16.msra.mxu0 %v5841_v8  ;;  %4572 = vmatpush3.bf16.msra.mxu1 %v5920_v2 }
 0x467   :  { %4543 = vmatprep.subr.bf16.mxu0 %v5844_v12  ;;  %4573 = vmatprep.subr.bf16.mxu1 %v7295_v33 }
 0x468   :  { %1709 = vmatprep.mubr.f32.mxu0 %v7300_v36  ;;  %3808 = vmatprep.mubr.msk.f32.mxu1 %vm5732_vm0, %v7300_v36 }
 0x46a   :  { %4545 = vmatpush1.bf16.msra.mxu0 %v5850_v16  ;;  %4575 = vmatpush3.bf16.msra.mxu1 %v5923_v5 }
 0x46b   :  { %4547 = vmatprep.subr.bf16.mxu0 %v5853_v17  ;;  %4576 = vmatprep.subr.bf16.mxu1 %v7295_v33 }
 0x46e   :  { %4549 = vmatpush1.bf16.msra.mxu0 %v5856_v22  ;;  %4578 = vmatpush3.bf16.msra.mxu1 %v5929_v10 }
 0x46f   :  { %4551 = vmatprep.subr.bf16.mxu0 %v5859_v23  ;;  %4579 = vmatprep.subr.bf16.mxu1 %v7295_v33 }
 0x472   :  { %4553 = vmatpush1.bf16.msra.mxu0 %v5862_v28  ;;  %4581 = vmatpush3.bf16.msra.mxu1 %v5933_v14 }
 0x473   :  { %4555 = vmatprep.subr.bf16.mxu0 %v5865_v29  ;;  %4582 = vmatprep.subr.bf16.mxu1 %v7295_v33 }
 0x476   :  { %4557 = vmatpush1.bf16.msra.mxu0 %v5868_v34  ;;  %4584 = vmatpush3.bf16.msra.mxu1 %v5937_v19 }
 0x477   :  { %4559 = vmatprep.subr.bf16.mxu0 %v5871_v35  ;;  %4585 = vmatprep.subr.bf16.mxu1 %v7295_v33 }
 0x47a   :  { %4561 = vmatpush1.bf16.msra.mxu0 %v5875_v38  ;;  %4587 = vmatpush3.bf16.msra.mxu1 %v5941_v24 }
 0x47b   :  { %4563 = vmatprep.subr.bf16.mxu0 %v5878_v41  ;;  %4588 = vmatprep.subr.bf16.mxu1 %v7295_v33 }
 0x47e   :  { %4565 = vmatpush1.bf16.msra.mxu0 %v5880_v44  ;;  %4590 = vmatpush3.bf16.msra.mxu1 %v5945_v27 }
 0x47f   :  { %4567 = vmatprep.subr.bf16.mxu0 %v5891_v49  ;;  %4591 = vmatprep.subr.bf16.mxu1 %v7295_v33 }
 0x482   :  { %4569 = vmatpush1.bf16.msra.mxu0 %v5893_v52  ;;  %4593 = vmatpush3.bf16.msra.mxu1 %v5949_v32 }
 0x483   :  { %4595 = vmatprep.subr.bf16.mxu0 %v5955_v39  ;;  %4659 = vmatprep.subr.bf16.mxu1 %v5957_v45 }
 0x485   :  { %1710 = vmatmul.mubr.f32.vlgmr.msra.gmra.mrb[12].mxu0 %v1480_v63  ;;  %3809 = vmatmul.mubr.f32.vlgmr.msra.gmra.mrb[22].mxu1 %v1480_v63  ;;  %v7423_v63 = vld [vmem:[#allocation29_spill] sm:$0xff] }
 0x486   :  { %4597 = vmatpush1.bf16.msra.mxu0 %v5959_v46  ;;  %4661 = vmatpush1.bf16.msra.mxu1 %v5962_v50 }
 0x487   :  { %4599 = vmatprep.subr.bf16.mxu0 %v5967_v55  ;;  %4663 = vmatprep.subr.bf16.mxu1 %v5969_v59 }
 0x48a   :  { %4601 = vmatpush1.bf16.msra.mxu0 %v5971_v60  ;;  %4665 = vmatpush1.bf16.msra.mxu1 %v5974_v1 }
 0x48b   :  { %4603 = vmatprep.subr.bf16.mxu0 %v5981_v11  ;;  %4667 = vmatprep.subr.bf16.mxu1 %v5985_v21 }
 0x48e   :  { %4605 = vmatpush1.bf16.msra.mxu0 %v5987_v25  ;;  %4669 = vmatpush1.bf16.msra.mxu1 %v5990_v31 }
 0x48f   :  { %4607 = vmatprep.subr.bf16.mxu0 %v5995_v40  ;;  %4671 = vmatprep.subr.bf16.mxu1 %v7406_v37 }
 0x492   :  { %4609 = vmatpush1.bf16.msra.mxu0 %v7407_v0  ;;  %4673 = vmatpush1.bf16.msra.mxu1 %v7408_v13 }
 0x493   :  { %4611 = vmatprep.subr.bf16.mxu0 %v7409_v18  ;;  %4675 = vmatprep.subr.bf16.mxu1 %v7410_v51 }
 0x496   :  { %4613 = vmatpush1.bf16.msra.mxu0 %v7411_v57  ;;  %4677 = vmatpush1.bf16.msra.mxu1 %v7412_v20 }
 0x497   :  { %4615 = vmatprep.subr.bf16.mxu0 %v7413_v54  ;;  %4679 = vmatprep.subr.bf16.mxu1 %v7414_v7  ;;  %v7424_v54 = vld [vmem:[#allocation30_spill] sm:$0xff]  ;;  %v7425_v7 = vld [vmem:[#allocation31_spill] sm:$0xff] }
 0x49a   :  { %4617 = vmatpush1.bf16.msra.mxu0 %v7415_v26  ;;  %4681 = vmatpush1.bf16.msra.mxu1 %v7416_v47  ;;  %v7426_v26 = vld [vmem:[#allocation32_spill] sm:$0xff]  ;;  %v7427_v47 = vld [vmem:[#allocation33_spill] sm:$0xff] }
 0x49b   :  { %4619 = vmatprep.subr.bf16.mxu0 %v7417_v9  ;;  %4683 = vmatprep.subr.bf16.mxu1 %v7418_v4  ;;  %v7428_v9 = vld [vmem:[#allocation34_spill] sm:$0xff]  ;;  %v7429_v4 = vld [vmem:[#allocation35_spill] sm:$0xff] }
 0x49e   :  { %4621 = vmatpush1.bf16.msra.mxu0 %v7419_v53  ;;  %4685 = vmatpush1.bf16.msra.mxu1 %v7420_v62  ;;  %v7430_v53 = vld [vmem:[#allocation36_spill] sm:$0xff]  ;;  %v7431_v62 = vld [vmem:[#allocation37_spill] sm:$0xff] }
 0x49f   :  { %4623 = vmatprep.subr.bf16.mxu0 %v7421_v15  ;;  %4687 = vmatprep.subr.bf16.mxu1 %v7422_v58  ;;  %v7432_v15 = vld [vmem:[#allocation38_spill] sm:$0xff]  ;;  %v7433_v58 = vld [vmem:[#allocation39_spill] sm:$0xff] }
 0x4a2   :  { %4625 = vmatpush1.bf16.msra.mxu0 %v7423_v63  ;;  %4689 = vmatpush1.bf16.msra.mxu1 %v7424_v54  ;;  %v7434_v63 = vld [vmem:[#allocation40_spill] sm:$0xff]  ;;  %v7435_v54 = vld [vmem:[#allocation41_spill] sm:$0xff] }
 0x4a3   :  { %4627 = vmatprep.subr.bf16.mxu0 %v7425_v7  ;;  %4691 = vmatprep.subr.bf16.mxu1 %v7426_v26  ;;  %v7436_v7 = vld [vmem:[#allocation42_spill] sm:$0xff]  ;;  %v7437_v26 = vld [vmem:[#allocation43_spill] sm:$0xff] }
 0x4a6   :  { %4629 = vmatpush1.bf16.msra.mxu0 %v7427_v47  ;;  %4693 = vmatpush1.bf16.msra.mxu1 %v7428_v9  ;;  %v7438_v47 = vld [vmem:[#allocation44_spill] sm:$0xff]  ;;  %v7439_v9 = vld [vmem:[#allocation45_spill] sm:$0xff] }
 0x4a7   :  { %4631 = vmatprep.subr.bf16.mxu0 %v7429_v4  ;;  %4695 = vmatprep.subr.bf16.mxu1 %v7430_v53  ;;  %v7440_v4 = vld [vmem:[#allocation46_spill] sm:$0xff]  ;;  %v7441_v53 = vld [vmem:[#allocation47_spill] sm:$0xff] }
 0x4aa   :  { %4633 = vmatpush1.bf16.msra.mxu0 %v7431_v62  ;;  %4697 = vmatpush1.bf16.msra.mxu1 %v7432_v15  ;;  %v7442_v62 = vld [vmem:[#allocation48_spill] sm:$0xff]  ;;  %v7443_v15 = vld [vmem:[#allocation49_spill] sm:$0xff] }
 0x4ab   :  { %4635 = vmatprep.subr.bf16.mxu0 %v7433_v58  ;;  %4699 = vmatprep.subr.bf16.mxu1 %v7434_v63  ;;  %v7444_v58 = vld [vmem:[#allocation50_spill] sm:$0xff]  ;;  %v7445_v63 = vld [vmem:[#allocation51_spill] sm:$0xff] }
 0x4ae   :  { %4637 = vmatpush1.bf16.msra.mxu0 %v7435_v54  ;;  %4701 = vmatpush1.bf16.msra.mxu1 %v7436_v7  ;;  %v7446_v54 = vld [vmem:[#allocation52_spill] sm:$0xff]  ;;  %v7447_v7 = vld [vmem:[#allocation53_spill] sm:$0xff] }
 0x4af   :  { %4639 = vmatprep.subr.bf16.mxu0 %v7437_v26  ;;  %4703 = vmatprep.subr.bf16.mxu1 %v7438_v47  ;;  %v7448_v26 = vld [vmem:[#allocation54_spill] sm:$0xff]  ;;  %v7449_v47 = vld [vmem:[#allocation55_spill] sm:$0xff] }
 0x4b2   :  { %4641 = vmatpush1.bf16.msra.mxu0 %v7439_v9  ;;  %4705 = vmatpush1.bf16.msra.mxu1 %v7440_v4  ;;  %v7450_v9 = vld [vmem:[#allocation56_spill] sm:$0xff]  ;;  %v7451_v4 = vld [vmem:[#allocation57_spill] sm:$0xff] }
 0x4b3   :  { %4643 = vmatprep.subr.bf16.mxu0 %v7441_v53  ;;  %4707 = vmatprep.subr.bf16.mxu1 %v7442_v62  ;;  %v7452_v53 = vld [vmem:[#allocation58_spill] sm:$0xff]  ;;  %v7453_v62 = vld [vmem:[#allocation59_spill] sm:$0xff] }
 0x4b6   :  { %4645 = vmatpush1.bf16.msra.mxu0 %v7443_v15  ;;  %4709 = vmatpush1.bf16.msra.mxu1 %v7444_v58  ;;  %v7454_v15 = vld [vmem:[#allocation60_spill] sm:$0xff]  ;;  %v7455_v58 = vld [vmem:[#allocation61_spill] sm:$0xff] }
 0x4b7   :  { %4647 = vmatprep.subr.bf16.mxu0 %v7445_v63  ;;  %4711 = vmatprep.subr.bf16.mxu1 %v7446_v54  ;;  %v7456_v63 = vld [vmem:[#allocation62_spill] sm:$0xff]  ;;  %v7457_v54 = vld [vmem:[#allocation11_spill] sm:$0xff] }
 0x4ba   :  { %4649 = vmatpush1.bf16.msra.mxu0 %v7447_v7  ;;  %4713 = vmatpush1.bf16.msra.mxu1 %v7448_v26  ;;  %v7458_v7 = vld [vmem:[#allocation67_spill] sm:$0xff] }
 0x4bb   :  { %4651 = vmatprep.subr.bf16.mxu0 %v7449_v47  ;;  %4715 = vmatprep.subr.bf16.mxu1 %v7450_v9 }
 0x4be   :  { %4653 = vmatpush1.bf16.msra.mxu0 %v7451_v4  ;;  %4717 = vmatpush1.bf16.msra.mxu1 %v7452_v53  ;;  %v7459_v53 = vld [vmem:[#allocation68_spill] sm:$0xff] }
 0x4bf   :  { %4655 = vmatprep.subr.bf16.mxu0 %v7453_v62  ;;  %4719 = vmatprep.subr.bf16.mxu1 %v7454_v15 }
 0x4c2   :  { %4657 = vmatpush1.bf16.msra.mxu0 %v7455_v58  ;;  %4721 = vmatpush1.bf16.msra.mxu1 %v7456_v63 }
 0x4c3   :  { %4723 = vmatprep.subr.bf16.mxu0 %v7457_v54  ;;  %4754 = vmatprep.subr.bf16.mxu1 %v7295_v33 }
 0x538   :  { %v1550_v26 = vpop.f32.mrb[10].mxu0  ;;  %v1621_v47 = vpop.f32.mrb[20].mxu1 }
 0x539   :  { %v1551_v9 = vadd.f32 %v1550_v26, %v7458_v7  ;;  %v1552_v20 = vpop.f32.mrb[11].mxu0  ;;  %v1623_v4 = vpop.f32.mrb[21].mxu1  ;;  %v1622_v0 = vadd.f32 %v1621_v47, %v6315_v56 }
 0x53a   :  { %v1553_v51 = vadd.f32 %v1552_v20, %v7459_v53  ;;  %v1624_v54 = vadd.f32 %v1623_v4, %v6311_v42 }
 0x53b   :  { %v3473_v57 = vmul.f32 -1.442695, %v1551_v9 }
 0x53c   :  { %v3474_v62 = vmul.f32 -1.442695, %v1553_v51 }
 0x53d   :  { %5542 = vpow2.f32 %v3473_v57 }
 0x53e   :  { %5544 = vpow2.f32 %v3474_v62 }
 0x547   :  { %v5543_v15 = vpop.eup %5542 }
 0x548   :  { %v1629_v58 = vadd.f32 1.0, %v5543_v15  ;;  %v5545_v63 = vpop.eup %5544 }
 0x549   :  { %v1635_v18 = vadd.f32 1.0, %v5545_v63 }
 0x54a   :  { %5546 = vrcp.f32 %v1629_v58 }
 0x54b   :  { %5548 = vrcp.f32 %v1635_v18 }
 0x554   :  { %v5547_v13 = vpop.eup %5546 }
 0x555   :  { %v1638_v26 = vmul.f32 %v5547_v13, %v1624_v54  ;;  %v5549_v4 = vpop.eup %5548 }
 0x556   :  { %v1641_v47 = vsub.f32 1.0, %v5549_v4 }
 0x557   :  { %v1639_v7 = vadd.f32 %v1638_v26, %v1622_v0  ;;  %v1643_v0 = vmul.f32 %v5549_v4, %v6436_v61 }
 0x558   :  { %v1711_v37 = vpop.f32.mrb[12].mxu0  ;;  %v1782_v9 = vpop.f32.mrb[22].mxu1 }
 0x559   :  { %5550 = vtanh.f32 %v1639_v7  ;;  %v1787_v20 = vrot.slane %v1711_v37, 2  ;;  %v1713_v57 = vpop.f32.mrb[13].mxu0  ;;  %v3810_v51 = vpop.f32.mrb[23].mxu1 }
 0x55a   :  { %v1797_v62 = vrot.slane %v1713_v57, 2 }
 0x55b   :  { %v1789_v15 = vadd.f32 %v1787_v20, %v6165_v43 }
 0x55c   :  { %v1799_v58 = vadd.f32 %v1797_v62, %v6179_v30  ;;  %v1806_v30 = vadd.f32 %v6186_v3, %v1782_v9  ;;  %v1815_v62 = vrot.slane %v6442_v48, 6  ;;  %v7460_v3 = vld [vmem:[#allocation12_spill] sm:$0xff]  ;;  %v7462_v48 = vld [vmem:[#allocation14_spill] sm:$0xff]  ;;  %v7463_v9 = vld [vmem:[#allocation15_spill] sm:$0xff] }
 0x55d   :  { %v3475_v63 = vmul.f32 -1.442695, %v1789_v15 }
 0x55e   :  { %v3476_v53 = vmul.f32 -1.442695, %v1799_v58 }
 0x55f   :  { %5552 = vpow2.f32 %v3475_v63 }
 0x560   :  { %5554 = vpow2.f32 %v3476_v53  ;;  %v1808_v53 = vrot.slane %v1806_v30, 2  ;;  %v7470_v30 = vld [vmem:[#allocation22_spill] sm:$0xff] }
 0x563   :  { %v5551_v18 = vpop.eup %5550 }
 0x564   :  { %v1642_v13 = vmul.f32 %v5551_v18, %v1641_v47 }
 0x566   :  { %v6551_v54 = vadd.f32 %v1643_v0, %v1642_v13 }
 0x568   :  { %v1820_v37 = vrot.slane %v6551_v54, 2 }
 0x569   :  { %v5553_v7 = vpop.eup %5552 }
 0x56a   :  { %v5555_v26 = vpop.eup %5554  ;;  %v1793_v57 = vadd.f32 1.0, %v5553_v7  ;;  %v1823_v43 = vrot.slane %v1820_v37, 6  ;;  %v7464_v37 = vld [vmem:[#allocation16_spill] sm:$0xff]  ;;  %v7465_v7 = vld [vmem:[#allocation17_spill] sm:$0xff] }
 0x56b   :  { %v1803_v20 = vadd.f32 1.0, %v5555_v26  ;;  %v7466_v26 = vld [vmem:[#allocation18_spill] sm:$0xff] }
 0x56c   :  { %5556 = vrcp.f32 %v1793_v57  ;;  %1890 = vmatprep.mubr.f32.mxu0 %v1823_v43  ;;  %1961 = vmatprep.mubr.f32.mxu1 %v1823_v43  ;;  %v7467_v57 = vld [vmem:[#allocation19_spill] sm:$0xff]  ;;  %v7468_v43 = vld [vmem:[#allocation20_spill] sm:$0xff] }
 0x56d   :  { %5558 = vrcp.f32 %v1803_v20  ;;  %v7469_v20 = vld [vmem:[#allocation21_spill] sm:$0xff] }
 0x576   :  { %v5557_v51 = vpop.eup %5556 }
 0x577   :  { %v5559_v61 = vpop.eup %5558  ;;  %v1810_v15 = vmul.f32 %v5557_v51, %v1808_v53  ;;  %v7471_v53 = vld [vmem:[#allocation23_spill] sm:$0xff]  ;;  %v7472_v51 = vld [vmem:[#allocation24_spill] sm:$0xff] }
 0x578   :  { %v1817_v58 = vmul.f32 %v5559_v61, %v1815_v62  ;;  %v1813_v4 = vsub.f32 1.0, %v5559_v61  ;;  %v7473_v62 = vld [vmem:[#allocation25_spill] sm:$0xff]  ;;  %v7474_v61 = vld [vmem:[#allocation26_spill] sm:$0xff] }
 0x579   :  { %v1811_v63 = vadd.f32 %v1810_v15, %v6189_v6  ;;  %v7461_v6 = vld [vmem:[#allocation13_spill] sm:$0xff]  ;;  %v7475_v15 = vld [vmem:[#allocation27_spill] sm:$0xff] }
 0x57b   :  { %5560 = vtanh.f32 %v1811_v63  ;;  %v7477_v63 = vld [vmem:[#allocation29_spill] sm:$0xff] }
 0x585   :  { %v5561_v47 = vpop.eup %5560 }
 0x586   :  { %v1814_v18 = vmul.f32 %v5561_v47, %v1813_v4  ;;  %v7478_v4 = vld [vmem:[#allocation30_spill] sm:$0xff]  ;;  %v7479_v47 = vld [vmem:[#allocation31_spill] sm:$0xff] }
 0x588   :  { %v1818_v13 = vadd.f32 %v1817_v58, %v1814_v18  ;;  %v7476_v58 = vld [vmem:[#allocation28_spill] sm:$0xff] }
 0x589   :  { %v7480_v18 = vld [vmem:[#allocation32_spill] sm:$0xff] }
 0x58a   :  { %v6557_v0 = vrot.slane %v1818_v13, 6  ;;  %v7481_v13 = vld [vmem:[#allocation33_spill] sm:$0xff] }
 0x58c   :  { %1891 = vmatmul.mubr.f32.vlgmr.msra.gmra.mrb[14].mxu0 %v6557_v0  ;;  %1962 = vmatmul.mubr.f32.vlgmr.msra.gmra.mrb[24].mxu1 %v6557_v0 }
 0x58d   :  { %4725 = vmatpush1.bf16.msra.mxu0 %v5841_v8  ;;  %4756 = vmatpush3.bf16.msra.mxu1 %v5920_v2 }
 0x58e   :  { %4727 = vmatprep.subr.bf16.mxu0 %v5844_v12  ;;  %4757 = vmatprep.subr.bf16.mxu1 %v7295_v33 }
 0x58f   :  { %2051 = vmatprep.mubr.f32.mxu0 %v7300_v36  ;;  %3843 = vmatprep.mubr.msk.f32.mxu1 %vm5732_vm0, %v7300_v36 }
 0x591   :  { %4729 = vmatpush1.bf16.msra.mxu0 %v5850_v16  ;;  %4759 = vmatpush3.bf16.msra.mxu1 %v5923_v5 }
 0x592   :  { %4731 = vmatprep.subr.bf16.mxu0 %v5853_v17  ;;  %4760 = vmatprep.subr.bf16.mxu1 %v7295_v33 }
 0x595   :  { %4733 = vmatpush1.bf16.msra.mxu0 %v5856_v22  ;;  %4762 = vmatpush3.bf16.msra.mxu1 %v5929_v10 }
 0x596   :  { %4735 = vmatprep.subr.bf16.mxu0 %v5859_v23  ;;  %4763 = vmatprep.subr.bf16.mxu1 %v7295_v33 }
 0x599   :  { %4737 = vmatpush1.bf16.msra.mxu0 %v5862_v28  ;;  %4765 = vmatpush3.bf16.msra.mxu1 %v5933_v14 }
 0x59a   :  { %4739 = vmatprep.subr.bf16.mxu0 %v5865_v29  ;;  %4766 = vmatprep.subr.bf16.mxu1 %v7295_v33 }
 0x59d   :  { %4741 = vmatpush1.bf16.msra.mxu0 %v5868_v34  ;;  %4768 = vmatpush3.bf16.msra.mxu1 %v5937_v19 }
 0x59e   :  { %4743 = vmatprep.subr.bf16.mxu0 %v5871_v35  ;;  %4769 = vmatprep.subr.bf16.mxu1 %v7295_v33 }
 0x5a1   :  { %4745 = vmatpush1.bf16.msra.mxu0 %v5875_v38  ;;  %4771 = vmatpush3.bf16.msra.mxu1 %v5941_v24 }
 0x5a2   :  { %4747 = vmatprep.subr.bf16.mxu0 %v5878_v41  ;;  %4772 = vmatprep.subr.bf16.mxu1 %v7295_v33 }
 0x5a5   :  { %4749 = vmatpush1.bf16.msra.mxu0 %v5880_v44  ;;  %4774 = vmatpush3.bf16.msra.mxu1 %v5945_v27 }
 0x5a6   :  { %4751 = vmatprep.subr.bf16.mxu0 %v5891_v49  ;;  %4775 = vmatprep.subr.bf16.mxu1 %v7295_v33 }
 0x5a9   :  { %4753 = vmatpush1.bf16.msra.mxu0 %v5893_v52  ;;  %4777 = vmatpush3.bf16.msra.mxu1 %v5949_v32 }
 0x5aa   :  { %4779 = vmatprep.subr.bf16.mxu0 %v5955_v39  ;;  %4843 = vmatprep.subr.bf16.mxu1 %v5957_v45 }
 0x5ac   :  { %2052 = vmatmul.mubr.f32.vlgmr.msra.gmra.mrb[16].mxu0 %v6557_v0  ;;  %3844 = vmatmul.mubr.f32.vlgmr.msra.gmra.mrb[26].mxu1 %v6557_v0 }
 0x5ad   :  { %4781 = vmatpush1.bf16.msra.mxu0 %v5959_v46  ;;  %4845 = vmatpush1.bf16.msra.mxu1 %v5962_v50 }
 0x5ae   :  { %4783 = vmatprep.subr.bf16.mxu0 %v5967_v55  ;;  %4847 = vmatprep.subr.bf16.mxu1 %v5969_v59 }
 0x5b1   :  { %4785 = vmatpush1.bf16.msra.mxu0 %v5971_v60  ;;  %4849 = vmatpush1.bf16.msra.mxu1 %v5974_v1 }
 0x5b2   :  { %4787 = vmatprep.subr.bf16.mxu0 %v5981_v11  ;;  %4851 = vmatprep.subr.bf16.mxu1 %v5985_v21 }
 0x5b5   :  { %4789 = vmatpush1.bf16.msra.mxu0 %v5987_v25  ;;  %4853 = vmatpush1.bf16.msra.mxu1 %v5990_v31 }
 0x5b6   :  { %4791 = vmatprep.subr.bf16.mxu0 %v5995_v40  ;;  %4855 = vmatprep.subr.bf16.mxu1 %v7460_v3 }
 0x5b9   :  { %4793 = vmatpush1.bf16.msra.mxu0 %v7461_v6  ;;  %4857 = vmatpush1.bf16.msra.mxu1 %v7462_v48 }
 0x5ba   :  { %4795 = vmatprep.subr.bf16.mxu0 %v7463_v9  ;;  %4859 = vmatprep.subr.bf16.mxu1 %v7464_v37 }
 0x5bd   :  { %4797 = vmatpush1.bf16.msra.mxu0 %v7465_v7  ;;  %4861 = vmatpush1.bf16.msra.mxu1 %v7466_v26 }
 0x5be   :  { %4799 = vmatprep.subr.bf16.mxu0 %v7467_v57  ;;  %4863 = vmatprep.subr.bf16.mxu1 %v7468_v43 }
 0x5c1   :  { %4801 = vmatpush1.bf16.msra.mxu0 %v7469_v20  ;;  %4865 = vmatpush1.bf16.msra.mxu1 %v7470_v30 }
 0x5c2   :  { %4803 = vmatprep.subr.bf16.mxu0 %v7471_v53  ;;  %4867 = vmatprep.subr.bf16.mxu1 %v7472_v51  ;;  %v7482_v53 = vld [vmem:[#allocation34_spill] sm:$0xff]  ;;  %v7483_v51 = vld [vmem:[#allocation35_spill] sm:$0xff] }
 0x5c5   :  { %4805 = vmatpush1.bf16.msra.mxu0 %v7473_v62  ;;  %4869 = vmatpush1.bf16.msra.mxu1 %v7474_v61  ;;  %v7484_v62 = vld [vmem:[#allocation36_spill] sm:$0xff]  ;;  %v7485_v61 = vld [vmem:[#allocation37_spill] sm:$0xff] }
 0x5c6   :  { %4807 = vmatprep.subr.bf16.mxu0 %v7475_v15  ;;  %4871 = vmatprep.subr.bf16.mxu1 %v7476_v58  ;;  %v7486_v15 = vld [vmem:[#allocation38_spill] sm:$0xff]  ;;  %v7487_v58 = vld [vmem:[#allocation39_spill] sm:$0xff] }
 0x5c9   :  { %4809 = vmatpush1.bf16.msra.mxu0 %v7477_v63  ;;  %4873 = vmatpush1.bf16.msra.mxu1 %v7478_v4  ;;  %v7488_v63 = vld [vmem:[#allocation40_spill] sm:$0xff]  ;;  %v7489_v4 = vld [vmem:[#allocation41_spill] sm:$0xff] }
 0x5ca   :  { %4811 = vmatprep.subr.bf16.mxu0 %v7479_v47  ;;  %4875 = vmatprep.subr.bf16.mxu1 %v7480_v18  ;;  %v7490_v47 = vld [vmem:[#allocation42_spill] sm:$0xff]  ;;  %v7491_v18 = vld [vmem:[#allocation43_spill] sm:$0xff] }
 0x5cd   :  { %4813 = vmatpush1.bf16.msra.mxu0 %v7481_v13  ;;  %4877 = vmatpush1.bf16.msra.mxu1 %v7482_v53  ;;  %v7492_v13 = vld [vmem:[#allocation44_spill] sm:$0xff]  ;;  %v7493_v53 = vld [vmem:[#allocation45_spill] sm:$0xff] }
 0x5ce   :  { %4815 = vmatprep.subr.bf16.mxu0 %v7483_v51  ;;  %4879 = vmatprep.subr.bf16.mxu1 %v7484_v62  ;;  %v7494_v51 = vld [vmem:[#allocation46_spill] sm:$0xff]  ;;  %v7495_v62 = vld [vmem:[#allocation47_spill] sm:$0xff] }
 0x5d1   :  { %4817 = vmatpush1.bf16.msra.mxu0 %v7485_v61  ;;  %4881 = vmatpush1.bf16.msra.mxu1 %v7486_v15  ;;  %v7496_v61 = vld [vmem:[#allocation48_spill] sm:$0xff]  ;;  %v7497_v15 = vld [vmem:[#allocation49_spill] sm:$0xff] }
 0x5d2   :  { %4819 = vmatprep.subr.bf16.mxu0 %v7487_v58  ;;  %4883 = vmatprep.subr.bf16.mxu1 %v7488_v63  ;;  %v7498_v58 = vld [vmem:[#allocation50_spill] sm:$0xff]  ;;  %v7499_v63 = vld [vmem:[#allocation51_spill] sm:$0xff] }
 0x5d5   :  { %4821 = vmatpush1.bf16.msra.mxu0 %v7489_v4  ;;  %4885 = vmatpush1.bf16.msra.mxu1 %v7490_v47  ;;  %v7500_v4 = vld [vmem:[#allocation52_spill] sm:$0xff]  ;;  %v7501_v47 = vld [vmem:[#allocation53_spill] sm:$0xff] }
 0x5d6   :  { %4823 = vmatprep.subr.bf16.mxu0 %v7491_v18  ;;  %4887 = vmatprep.subr.bf16.mxu1 %v7492_v13  ;;  %v7502_v18 = vld [vmem:[#allocation54_spill] sm:$0xff]  ;;  %v7503_v13 = vld [vmem:[#allocation55_spill] sm:$0xff] }
 0x5d9   :  { %4825 = vmatpush1.bf16.msra.mxu0 %v7493_v53  ;;  %4889 = vmatpush1.bf16.msra.mxu1 %v7494_v51  ;;  %v7504_v53 = vld [vmem:[#allocation56_spill] sm:$0xff]  ;;  %v7505_v51 = vld [vmem:[#allocation57_spill] sm:$0xff] }
 0x5da   :  { %4827 = vmatprep.subr.bf16.mxu0 %v7495_v62  ;;  %4891 = vmatprep.subr.bf16.mxu1 %v7496_v61  ;;  %v7506_v62 = vld [vmem:[#allocation58_spill] sm:$0xff]  ;;  %v7507_v61 = vld [vmem:[#allocation59_spill] sm:$0xff] }
 0x5dd   :  { %4829 = vmatpush1.bf16.msra.mxu0 %v7497_v15  ;;  %4893 = vmatpush1.bf16.msra.mxu1 %v7498_v58  ;;  %v7508_v15 = vld [vmem:[#allocation60_spill] sm:$0xff]  ;;  %v7509_v58 = vld [vmem:[#allocation61_spill] sm:$0xff] }
 0x5de   :  { %4831 = vmatprep.subr.bf16.mxu0 %v7499_v63  ;;  %4895 = vmatprep.subr.bf16.mxu1 %v7500_v4  ;;  %v7510_v63 = vld [vmem:[#allocation62_spill] sm:$0xff]  ;;  %v7511_v4 = vld [vmem:[#allocation11_spill] sm:$0xff] }
 0x5e1   :  { %4833 = vmatpush1.bf16.msra.mxu0 %v7501_v47  ;;  %4897 = vmatpush1.bf16.msra.mxu1 %v7502_v18  ;;  %v7512_v47 = vld [vmem:[#allocation67_spill] sm:$0xff] }
 0x5e2   :  { %4835 = vmatprep.subr.bf16.mxu0 %v7503_v13  ;;  %4899 = vmatprep.subr.bf16.mxu1 %v7504_v53 }
 0x5e5   :  { %4837 = vmatpush1.bf16.msra.mxu0 %v7505_v51  ;;  %4901 = vmatpush1.bf16.msra.mxu1 %v7506_v62  ;;  %v7513_v62 = vld [vmem:[#allocation68_spill] sm:$0xff] }
 0x5e6   :  { %4839 = vmatprep.subr.bf16.mxu0 %v7507_v61  ;;  %4903 = vmatprep.subr.bf16.mxu1 %v7508_v15 }
 0x5e9   :  { %4841 = vmatpush1.bf16.msra.mxu0 %v7509_v58  ;;  %4905 = vmatpush1.bf16.msra.mxu1 %v7510_v63 }
 0x5ea   :  { %4907 = vmatprep.subr.bf16.mxu0 %v7511_v4  ;;  %4938 = vmatprep.subr.bf16.mxu1 %v7295_v33 }
 0x65f   :  { %v1892_v18 = vpop.f32.mrb[14].mxu0  ;;  %v1963_v13 = vpop.f32.mrb[24].mxu1 }
 0x660   :  { %v1893_v53 = vadd.f32 %v1892_v18, %v7512_v47  ;;  %v1894_v30 = vpop.f32.mrb[15].mxu0  ;;  %v1965_v51 = vpop.f32.mrb[25].mxu1  ;;  %v1964_v7 = vadd.f32 %v1963_v13, %v6315_v56 }
 0x661   :  { %v1895_v43 = vadd.f32 %v1894_v30, %v7513_v62  ;;  %v1966_v4 = vadd.f32 %v1965_v51, %v6311_v42  ;;  %v7514_v30 = vld [vmem:[#allocation64_spill] sm:$0xff] }
 0x662   :  { %v3477_v20 = vmul.f32 -1.442695, %v1893_v53 }
 0x663   :  { %v3478_v61 = vmul.f32 -1.442695, %v1895_v43 }
 0x664   :  { %5562 = vpow2.f32 %v3477_v20 }
 0x665   :  { %5564 = vpow2.f32 %v3478_v61 }
 0x66e   :  { %v5563_v15 = vpop.eup %5562 }
 0x66f   :  { %v1971_v58 = vadd.f32 1.0, %v5563_v15  ;;  %v5565_v63 = vpop.eup %5564  ;;  %v7515_v15 = vld [vmem:[#allocation65_spill] sm:$0xff] }
 0x670   :  { %v1977_v57 = vadd.f32 1.0, %v5565_v63 }
 0x671   :  { %5566 = vrcp.f32 %v1971_v58 }
 0x672   :  { %5568 = vrcp.f32 %v1977_v57 }
 0x67b   :  { %v5567_v26 = vpop.eup %5566 }
 0x67c   :  { %v1980_v18 = vmul.f32 %v5567_v26, %v1966_v4  ;;  %v5569_v63 = vpop.eup %5568 }
 0x67d   :  { %v1983_v51 = vsub.f32 1.0, %v5569_v63  ;;  %v1985_v26 = vmul.f32 %v5569_v63, %v6551_v54 }
 0x67e   :  { %v1981_v47 = vadd.f32 %v1980_v18, %v1964_v7  ;;  %v7516_v18 = vld [vmem:[#allocation66_spill] sm:$0xff] }
 0x67f   :  { %v2053_v37 = vpop.f32.mrb[16].mxu0  ;;  %v2124_v53 = vpop.f32.mrb[26].mxu1 }
 0x680   :  { %5570 = vtanh.f32 %v1981_v47  ;;  %v2128_v20 = vadd.f32 %v2053_v37, %v7514_v30  ;;  %v2055_v43 = vpop.f32.mrb[17].mxu0  ;;  %v3845_v61 = vpop.f32.mrb[27].mxu1 }
 0x681   :  { %v2135_v58 = vadd.f32 %v2055_v43, %v7515_v15 }
 0x682   :  { %v3479_v62 = vmul.f32 -1.442695, %v2128_v20 }
 0x683   :  { %v3480_v9 = vmul.f32 -1.442695, %v2135_v58 }
 0x684   :  { %5572 = vpow2.f32 %v3479_v62  ;;  %v6676_v62 = vld [vmem:[%s7111_s5] ss:$0 sm:$0xff] }
 0x685   :  { %5574 = vpow2.f32 %v3480_v9 }
 0x68a   :  { %v5571_v42 = vpop.eup %5570 }
 0x68b   :  { %v1984_v13 = vmul.f32 %v5571_v42, %v1983_v51  ;;  %v2142_v42 = vadd.f32 %v6676_v62, %v2124_v53  ;;  %v7518_v53 = vld [vmem:[#allocation16_spill] sm:$0xff] }
 0x68d   :  { %v6669_v7 = vadd.f32 %v1985_v26, %v1984_v13  ;;  %v7519_v26 = vld [vmem:[#allocation17_spill] sm:$0xff] }
 0x68e   :  { %v5573_v57 = vpop.eup %5572 }
 0x68f   :  { %v2132_v4 = vadd.f32 1.0, %v5573_v57  ;;  %2214 = vmatprep.mubr.f32.mxu0 %v6669_v7  ;;  %2285 = vmatprep.mubr.f32.mxu1 %v6669_v7  ;;  %v5575_v37 = vpop.eup %5574  ;;  %v7520_v57 = vld [vmem:[#allocation18_spill] sm:$0xff] }
 0x690   :  { %v2139_v47 = vadd.f32 1.0, %v5575_v37  ;;  %v7522_v37 = vld [vmem:[#allocation20_spill] sm:$0xff] }
 0x691   :  { %5576 = vrcp.f32 %v2132_v4  ;;  %v7521_v4 = vld [vmem:[#allocation19_spill] sm:$0xff] }
 0x692   :  { %5578 = vrcp.f32 %v2139_v47  ;;  %v7523_v47 = vld [vmem:[#allocation21_spill] sm:$0xff] }
 0x69b   :  { %v5577_v9 = vpop.eup %5576 }
 0x69c   :  { %v2143_v54 = vmul.f32 %v5577_v9, %v2142_v42  ;;  %v5579_v43 = vpop.eup %5578  ;;  %v7524_v42 = vld [vmem:[#allocation22_spill] sm:$0xff]  ;;  %v7525_v9 = vld [vmem:[#allocation23_spill] sm:$0xff] }
 0x69d   :  { %v2146_v61 = vsub.f32 1.0, %v5579_v43  ;;  %v2148_v51 = vmul.f32 %v5579_v43, %v6557_v0  ;;  %v7517_v0 = vld [vmem:[#allocation15_spill] sm:$0xff]  ;;  %v7528_v43 = vld [vmem:[#allocation26_spill] sm:$0xff] }
 0x69e   :  { %v2144_v20 = vadd.f32 %v2143_v54, %v7516_v18  ;;  %v7526_v54 = vld [vmem:[#allocation24_spill] sm:$0xff] }
 0x6a0   :  { %5580 = vtanh.f32 %v2144_v20  ;;  %v7527_v20 = vld [vmem:[#allocation25_spill] sm:$0xff] }
 0x6aa   :  { %v5581_v58 = vpop.eup %5580 }
 0x6ab   :  { %v2147_v63 = vmul.f32 %v5581_v58, %v2146_v61  ;;  %v7529_v61 = vld [vmem:[#allocation27_spill] sm:$0xff]  ;;  %v7530_v58 = vld [vmem:[#allocation28_spill] sm:$0xff] }
 0x6ad   :  { %v6681_v13 = vadd.f32 %v2148_v51, %v2147_v63  ;;  %v7531_v63 = vld [vmem:[#allocation29_spill] sm:$0xff]  ;;  %v7532_v51 = vld [vmem:[#allocation30_spill] sm:$0xff] }
 0x6af   :  { %2215 = vmatmul.mubr.f32.vlgmr.msra.gmra.mrb[18].mxu0 %v6681_v13  ;;  %2286 = vmatmul.mubr.f32.vlgmr.msra.gmra.mrb[28].mxu1 %v6681_v13 }
 0x6b0   :  { %4909 = vmatpush1.bf16.msra.mxu0 %v5841_v8  ;;  %4940 = vmatpush3.bf16.msra.mxu1 %v5920_v2 }
 0x6b1   :  { %4911 = vmatprep.subr.bf16.mxu0 %v5844_v12  ;;  %4941 = vmatprep.subr.bf16.mxu1 %v7295_v33 }
 0x6b2   :  { %2375 = vmatprep.mubr.f32.mxu0 %v7300_v36  ;;  %3878 = vmatprep.mubr.msk.f32.mxu1 %vm5732_vm0, %v7300_v36 }
 0x6b4   :  { %4913 = vmatpush1.bf16.msra.mxu0 %v5850_v16  ;;  %4943 = vmatpush3.bf16.msra.mxu1 %v5923_v5 }
 0x6b5   :  { %4915 = vmatprep.subr.bf16.mxu0 %v5853_v17  ;;  %4944 = vmatprep.subr.bf16.mxu1 %v7295_v33 }
 0x6b8   :  { %4917 = vmatpush1.bf16.msra.mxu0 %v5856_v22  ;;  %4946 = vmatpush3.bf16.msra.mxu1 %v5929_v10 }
 0x6b9   :  { %4919 = vmatprep.subr.bf16.mxu0 %v5859_v23  ;;  %4947 = vmatprep.subr.bf16.mxu1 %v7295_v33 }
 0x6bc   :  { %4921 = vmatpush1.bf16.msra.mxu0 %v5862_v28  ;;  %4949 = vmatpush3.bf16.msra.mxu1 %v5933_v14 }
 0x6bd   :  { %4923 = vmatprep.subr.bf16.mxu0 %v5865_v29  ;;  %4950 = vmatprep.subr.bf16.mxu1 %v7295_v33 }
 0x6c0   :  { %4925 = vmatpush1.bf16.msra.mxu0 %v5868_v34  ;;  %4952 = vmatpush3.bf16.msra.mxu1 %v5937_v19 }
 0x6c1   :  { %4927 = vmatprep.subr.bf16.mxu0 %v5871_v35  ;;  %4953 = vmatprep.subr.bf16.mxu1 %v7295_v33 }
 0x6c4   :  { %4929 = vmatpush1.bf16.msra.mxu0 %v5875_v38  ;;  %4955 = vmatpush3.bf16.msra.mxu1 %v5941_v24 }
 0x6c5   :  { %4931 = vmatprep.subr.bf16.mxu0 %v5878_v41  ;;  %4956 = vmatprep.subr.bf16.mxu1 %v7295_v33 }
 0x6c8   :  { %4933 = vmatpush1.bf16.msra.mxu0 %v5880_v44  ;;  %4958 = vmatpush3.bf16.msra.mxu1 %v5945_v27 }
 0x6c9   :  { %4935 = vmatprep.subr.bf16.mxu0 %v5891_v49  ;;  %4959 = vmatprep.subr.bf16.mxu1 %v7295_v33 }
 0x6cc   :  { %4937 = vmatpush1.bf16.msra.mxu0 %v5893_v52  ;;  %4961 = vmatpush3.bf16.msra.mxu1 %v5949_v32 }
 0x6cd   :  { %4963 = vmatprep.subr.bf16.mxu0 %v5955_v39  ;;  %5027 = vmatprep.subr.bf16.mxu1 %v5957_v45 }
 0x6cf   :  { %2376 = vmatmul.mubr.f32.vlgmr.msra.gmra.mrb[20].mxu0 %v6681_v13  ;;  %3879 = vmatmul.mubr.f32.vlgmr.msra.gmra.mrb[30].mxu1 %v6681_v13 }
 0x6d0   :  { %4965 = vmatpush1.bf16.msra.mxu0 %v5959_v46  ;;  %5029 = vmatpush1.bf16.msra.mxu1 %v5962_v50 }
 0x6d1   :  { %4967 = vmatprep.subr.bf16.mxu0 %v5967_v55  ;;  %5031 = vmatprep.subr.bf16.mxu1 %v5969_v59 }
 0x6d4   :  { %4969 = vmatpush1.bf16.msra.mxu0 %v5971_v60  ;;  %5033 = vmatpush1.bf16.msra.mxu1 %v5974_v1 }
 0x6d5   :  { %4971 = vmatprep.subr.bf16.mxu0 %v5981_v11  ;;  %5035 = vmatprep.subr.bf16.mxu1 %v5985_v21 }
 0x6d8   :  { %4973 = vmatpush1.bf16.msra.mxu0 %v5987_v25  ;;  %5037 = vmatpush1.bf16.msra.mxu1 %v5990_v31 }
 0x6d9   :  { %4975 = vmatprep.subr.bf16.mxu0 %v5995_v40  ;;  %5039 = vmatprep.subr.bf16.mxu1 %v7460_v3 }
 0x6dc   :  { %4977 = vmatpush1.bf16.msra.mxu0 %v7461_v6  ;;  %5041 = vmatpush1.bf16.msra.mxu1 %v7462_v48 }
 0x6dd   :  { %4979 = vmatprep.subr.bf16.mxu0 %v7517_v0  ;;  %5043 = vmatprep.subr.bf16.mxu1 %v7518_v53 }
 0x6e0   :  { %4981 = vmatpush1.bf16.msra.mxu0 %v7519_v26  ;;  %5045 = vmatpush1.bf16.msra.mxu1 %v7520_v57 }
 0x6e1   :  { %4983 = vmatprep.subr.bf16.mxu0 %v7521_v4  ;;  %5047 = vmatprep.subr.bf16.mxu1 %v7522_v37  ;;  %v7533_v37 = vld [vmem:[#allocation31_spill] sm:$0xff] }
 0x6e4   :  { %4985 = vmatpush1.bf16.msra.mxu0 %v7523_v47  ;;  %5049 = vmatpush1.bf16.msra.mxu1 %v7524_v42  ;;  %v7534_v47 = vld [vmem:[#allocation32_spill] sm:$0xff]  ;;  %v7535_v42 = vld [vmem:[#allocation33_spill] sm:$0xff] }
 0x6e5   :  { %4987 = vmatprep.subr.bf16.mxu0 %v7525_v9  ;;  %5051 = vmatprep.subr.bf16.mxu1 %v7526_v54  ;;  %v7536_v9 = vld [vmem:[#allocation34_spill] sm:$0xff]  ;;  %v7537_v54 = vld [vmem:[#allocation35_spill] sm:$0xff] }
 0x6e8   :  { %4989 = vmatpush1.bf16.msra.mxu0 %v7527_v20  ;;  %5053 = vmatpush1.bf16.msra.mxu1 %v7528_v43  ;;  %v7538_v20 = vld [vmem:[#allocation36_spill] sm:$0xff]  ;;  %v7539_v43 = vld [vmem:[#allocation37_spill] sm:$0xff] }
 0x6e9   :  { %4991 = vmatprep.subr.bf16.mxu0 %v7529_v61  ;;  %5055 = vmatprep.subr.bf16.mxu1 %v7530_v58  ;;  %v7540_v61 = vld [vmem:[#allocation38_spill] sm:$0xff]  ;;  %v7541_v58 = vld [vmem:[#allocation39_spill] sm:$0xff] }
 0x6ec   :  { %4993 = vmatpush1.bf16.msra.mxu0 %v7531_v63  ;;  %5057 = vmatpush1.bf16.msra.mxu1 %v7532_v51  ;;  %v7542_v63 = vld [vmem:[#allocation40_spill] sm:$0xff]  ;;  %v7543_v51 = vld [vmem:[#allocation41_spill] sm:$0xff] }
 0x6ed   :  { %4995 = vmatprep.subr.bf16.mxu0 %v7533_v37  ;;  %5059 = vmatprep.subr.bf16.mxu1 %v7534_v47  ;;  %v7544_v37 = vld [vmem:[#allocation42_spill] sm:$0xff]  ;;  %v7545_v47 = vld [vmem:[#allocation43_spill] sm:$0xff] }
 0x6f0   :  { %4997 = vmatpush1.bf16.msra.mxu0 %v7535_v42  ;;  %5061 = vmatpush1.bf16.msra.mxu1 %v7536_v9  ;;  %v7546_v42 = vld [vmem:[#allocation44_spill] sm:$0xff]  ;;  %v7547_v9 = vld [vmem:[#allocation45_spill] sm:$0xff] }
 0x6f1   :  { %4999 = vmatprep.subr.bf16.mxu0 %v7537_v54  ;;  %5063 = vmatprep.subr.bf16.mxu1 %v7538_v20  ;;  %v7548_v54 = vld [vmem:[#allocation46_spill] sm:$0xff]  ;;  %v7549_v20 = vld [vmem:[#allocation47_spill] sm:$0xff] }
 0x6f4   :  { %5001 = vmatpush1.bf16.msra.mxu0 %v7539_v43  ;;  %5065 = vmatpush1.bf16.msra.mxu1 %v7540_v61  ;;  %v7550_v43 = vld [vmem:[#allocation48_spill] sm:$0xff]  ;;  %v7551_v61 = vld [vmem:[#allocation49_spill] sm:$0xff] }
 0x6f5   :  { %5003 = vmatprep.subr.bf16.mxu0 %v7541_v58  ;;  %5067 = vmatprep.subr.bf16.mxu1 %v7542_v63  ;;  %v7552_v58 = vld [vmem:[#allocation50_spill] sm:$0xff]  ;;  %v7553_v63 = vld [vmem:[#allocation51_spill] sm:$0xff] }
 0x6f8   :  { %5005 = vmatpush1.bf16.msra.mxu0 %v7543_v51  ;;  %5069 = vmatpush1.bf16.msra.mxu1 %v7544_v37  ;;  %v7554_v51 = vld [vmem:[#allocation52_spill] sm:$0xff]  ;;  %v7555_v37 = vld [vmem:[#allocation53_spill] sm:$0xff] }
 0x6f9   :  { %5007 = vmatprep.subr.bf16.mxu0 %v7545_v47  ;;  %5071 = vmatprep.subr.bf16.mxu1 %v7546_v42  ;;  %v7556_v47 = vld [vmem:[#allocation54_spill] sm:$0xff]  ;;  %v7557_v42 = vld [vmem:[#allocation55_spill] sm:$0xff] }
 0x6fc   :  { %5009 = vmatpush1.bf16.msra.mxu0 %v7547_v9  ;;  %5073 = vmatpush1.bf16.msra.mxu1 %v7548_v54  ;;  %v7558_v9 = vld [vmem:[#allocation56_spill] sm:$0xff]  ;;  %v7559_v54 = vld [vmem:[#allocation57_spill] sm:$0xff] }
 0x6fd   :  { %5011 = vmatprep.subr.bf16.mxu0 %v7549_v20  ;;  %5075 = vmatprep.subr.bf16.mxu1 %v7550_v43  ;;  %v7560_v20 = vld [vmem:[#allocation58_spill] sm:$0xff]  ;;  %v7561_v43 = vld [vmem:[#allocation59_spill] sm:$0xff] }
 0x700   :  { %5013 = vmatpush1.bf16.msra.mxu0 %v7551_v61  ;;  %5077 = vmatpush1.bf16.msra.mxu1 %v7552_v58  ;;  %v7562_v61 = vld [vmem:[#allocation60_spill] sm:$0xff]  ;;  %v7563_v58 = vld [vmem:[#allocation61_spill] sm:$0xff] }
 0x701   :  { %5015 = vmatprep.subr.bf16.mxu0 %v7553_v63  ;;  %5079 = vmatprep.subr.bf16.mxu1 %v7554_v51  ;;  %v7564_v63 = vld [vmem:[#allocation62_spill] sm:$0xff]  ;;  %v7565_v51 = vld [vmem:[#allocation11_spill] sm:$0xff] }
 0x704   :  { %5017 = vmatpush1.bf16.msra.mxu0 %v7555_v37  ;;  %5081 = vmatpush1.bf16.msra.mxu1 %v7556_v47  ;;  %v7566_v37 = vld [vmem:[#allocation67_spill] sm:$0xff] }
 0x705   :  { %5019 = vmatprep.subr.bf16.mxu0 %v7557_v42  ;;  %5083 = vmatprep.subr.bf16.mxu1 %v7558_v9 }
 0x708   :  { %5021 = vmatpush1.bf16.msra.mxu0 %v7559_v54  ;;  %5085 = vmatpush1.bf16.msra.mxu1 %v7560_v20  ;;  %v7567_v20 = vld [vmem:[#allocation68_spill] sm:$0xff] }
 0x709   :  { %5023 = vmatprep.subr.bf16.mxu0 %v7561_v43  ;;  %5087 = vmatprep.subr.bf16.mxu1 %v7562_v61 }
 0x70c   :  { %5025 = vmatpush1.bf16.msra.mxu0 %v7563_v58  ;;  %5089 = vmatpush1.bf16.msra.mxu1 %v7564_v63 }
 0x70d   :  { %5091 = vmatprep.subr.bf16.mxu0 %v7565_v51  ;;  %5122 = vmatprep.subr.bf16.mxu1 %v7295_v33  ;;  %v7568_v51 = vld [vmem:[#allocation69_spill] sm:$0xff] }
 0x782   :  { %v2216_v47 = vpop.f32.mrb[18].mxu0  ;;  %v2287_v42 = vpop.f32.mrb[28].mxu1 }
 0x783   :  { %v2217_v9 = vadd.f32 %v2216_v47, %v7566_v37  ;;  %v2218_v4 = vpop.f32.mrb[19].mxu0  ;;  %v2289_v54 = vpop.f32.mrb[29].mxu1  ;;  %v2288_v6 = vadd.f32 %v2287_v42, %v6315_v56 }
 0x784   :  { %v2219_v26 = vadd.f32 %v2218_v4, %v7567_v20  ;;  %v2290_v0 = vadd.f32 %v2289_v54, %v7568_v51 }
 0x785   :  { %v3481_v57 = vmul.f32 -1.442695, %v2217_v9 }
 0x786   :  { %v3482_v43 = vmul.f32 -1.442695, %v2219_v26 }
 0x787   :  { %5582 = vpow2.f32 %v3481_v57 }
 0x788   :  { %5584 = vpow2.f32 %v3482_v43 }
 0x791   :  { %v5583_v61 = vpop.eup %5582 }
 0x792   :  { %v2295_v58 = vadd.f32 1.0, %v5583_v61  ;;  %v5585_v63 = vpop.eup %5584 }
 0x793   :  { %v2301_v53 = vadd.f32 1.0, %v5585_v63 }
 0x794   :  { %5586 = vrcp.f32 %v2295_v58 }
 0x795   :  { %5588 = vrcp.f32 %v2301_v53 }
 0x79e   :  { %v5587_v48 = vpop.eup %5586 }
 0x79f   :  { %v2304_v47 = vmul.f32 %v5587_v48, %v2290_v0  ;;  %v5589_v54 = vpop.eup %5588 }
 0x7a0   :  { %v2307_v42 = vsub.f32 1.0, %v5589_v54 }
 0x7a1   :  { %v2305_v37 = vadd.f32 %v2304_v47, %v2288_v6  ;;  %v2309_v6 = vmul.f32 %v5589_v54, %v6669_v7 }
 0x7a2   :  { %v2377_v3 = vpop.f32.mrb[20].mxu0  ;;  %v2448_v9 = vpop.f32.mrb[30].mxu1 }
 0x7a3   :  { %5590 = vtanh.f32 %v2305_v37  ;;  %v2453_v4 = vrot.slane %v2377_v3, 6  ;;  %v2379_v57 = vpop.f32.mrb[21].mxu0  ;;  %v3880_v26 = vpop.f32.mrb[31].mxu1 }
 0x7a4   :  { %v2463_v43 = vrot.slane %v2379_v57, 6 }
 0x7a5   :  { %v2455_v61 = vadd.f32 %v2453_v4, %v7514_v30 }
 0x7a6   :  { %v2465_v58 = vadd.f32 %v2463_v43, %v7515_v15 }
 0x7a7   :  { %v3483_v63 = vmul.f32 -1.442695, %v2455_v61 }
 0x7a8   :  { %v3484_v20 = vmul.f32 -1.442695, %v2465_v58  ;;  %v2482_v58 = vrot.slane %v6681_v13, 6  ;;  %v7569_v13 = vld [vmem:[#allocation12_spill] sm:$0xff] }
 0x7a9   :  { %5592 = vpow2.f32 %v3483_v63 }
 0x7aa   :  { %5594 = vpow2.f32 %v3484_v20  ;;  %v2472_v20 = vadd.f32 %v6676_v62, %v2448_v9  ;;  %v7570_v9 = vld [vmem:[#allocation13_spill] sm:$0xff] }
 0x7ac   :  { %v2474_v43 = vrot.slane %v2472_v20, 6  ;;  %v7575_v20 = vld [vmem:[#allocation18_spill] sm:$0xff] }
 0x7ad   :  { %v5591_v53 = vpop.eup %5590 }
 0x7ae   :  { %v2308_v48 = vmul.f32 %v5591_v53, %v2307_v42 }
 0x7b0   :  { %v6793_v0 = vadd.f32 %v2309_v6, %v2308_v48 }
 0x7b2   :  { %v2487_v3 = vrot.slane %v6793_v0, 6 }
 0x7b3   :  { %v5593_v37 = vpop.eup %5592 }
 0x7b4   :  { %v5595_v47 = vpop.eup %5594  ;;  %v2459_v57 = vadd.f32 1.0, %v5593_v37  ;;  %v2490_v4 = vrot.slane %v2487_v3, 2 }
 0x7b5   :  { %v2469_v26 = vadd.f32 1.0, %v5595_v47  ;;  %v7571_v47 = vld [vmem:[#allocation14_spill] sm:$0xff] }
 0x7b6   :  { %5596 = vrcp.f32 %v2459_v57  ;;  %2557 = vmatprep.mubr.f32.mxu0 %v2490_v4  ;;  %2628 = vmatprep.mubr.f32.mxu1 %v2490_v4  ;;  %v7572_v57 = vld [vmem:[#allocation15_spill] sm:$0xff]  ;;  %v7573_v4 = vld [vmem:[#allocation16_spill] sm:$0xff] }
 0x7b7   :  { %5598 = vrcp.f32 %v2469_v26  ;;  %v7574_v26 = vld [vmem:[#allocation17_spill] sm:$0xff] }
 0x7c0   :  { %v5597_v61 = vpop.eup %5596 }
 0x7c1   :  { %v5599_v7 = vpop.eup %5598  ;;  %v2476_v63 = vmul.f32 %v5597_v61, %v2474_v43  ;;  %v7576_v43 = vld [vmem:[#allocation19_spill] sm:$0xff]  ;;  %v7577_v61 = vld [vmem:[#allocation20_spill] sm:$0xff] }
 0x7c2   :  { %v2484_v54 = vmul.f32 %v5599_v7, %v2482_v58  ;;  %v2479_v53 = vsub.f32 1.0, %v5599_v7  ;;  %v7578_v58 = vld [vmem:[#allocation21_spill] sm:$0xff]  ;;  %v7579_v7 = vld [vmem:[#allocation22_spill] sm:$0xff] }
 0x7c3   :  { %v2477_v42 = vadd.f32 %v2476_v63, %v7516_v18  ;;  %v7580_v63 = vld [vmem:[#allocation23_spill] sm:$0xff] }
 0x7c5   :  { %5600 = vtanh.f32 %v2477_v42  ;;  %v7582_v42 = vld [vmem:[#allocation25_spill] sm:$0xff] }
 0x7cf   :  { %v5601_v48 = vpop.eup %5600 }
 0x7d0   :  { %v2480_v6 = vmul.f32 %v5601_v48, %v2479_v53  ;;  %v7583_v53 = vld [vmem:[#allocation26_spill] sm:$0xff]  ;;  %v7584_v48 = vld [vmem:[#allocation27_spill] sm:$0xff] }
 0x7d2   :  { %v6799_v3 = vadd.f32 %v2484_v54, %v2480_v6  ;;  %v7581_v54 = vld [vmem:[#allocation24_spill] sm:$0xff] }
 0x7d3   :  { %v7585_v6 = vld [vmem:[#allocation28_spill] sm:$0xff] }
 0x7d4   :  { %v2489_v37 = vrot.slane %v6799_v3, 2 }
 0x7d6   :  { %2558 = vmatmul.mubr.f32.vlgmr.msra.gmra.mrb[22].mxu0 %v2489_v37  ;;  %2629 = vmatmul.mubr.f32.vlgmr.msra.gmra.mrb[32].mxu1 %v2489_v37 }
 0x7d7   :  { %5093 = vmatpush1.bf16.msra.mxu0 %v5841_v8  ;;  %5124 = vmatpush3.bf16.msra.mxu1 %v5920_v2 }
 0x7d8   :  { %5095 = vmatprep.subr.bf16.mxu0 %v5844_v12  ;;  %5125 = vmatprep.subr.bf16.mxu1 %v7295_v33 }
 0x7d9   :  { %2718 = vmatprep.mubr.f32.mxu0 %v7300_v36  ;;  %3913 = vmatprep.mubr.msk.f32.mxu1 %vm5732_vm0, %v7300_v36 }
 0x7db   :  { %5097 = vmatpush1.bf16.msra.mxu0 %v5850_v16  ;;  %5127 = vmatpush3.bf16.msra.mxu1 %v5923_v5 }
 0x7dc   :  { %5099 = vmatprep.subr.bf16.mxu0 %v5853_v17  ;;  %5128 = vmatprep.subr.bf16.mxu1 %v7295_v33 }
 0x7df   :  { %5101 = vmatpush1.bf16.msra.mxu0 %v5856_v22  ;;  %5130 = vmatpush3.bf16.msra.mxu1 %v5929_v10 }
 0x7e0   :  { %5103 = vmatprep.subr.bf16.mxu0 %v5859_v23  ;;  %5131 = vmatprep.subr.bf16.mxu1 %v7295_v33 }
 0x7e3   :  { %5105 = vmatpush1.bf16.msra.mxu0 %v5862_v28  ;;  %5133 = vmatpush3.bf16.msra.mxu1 %v5933_v14 }
 0x7e4   :  { %5107 = vmatprep.subr.bf16.mxu0 %v5865_v29  ;;  %5134 = vmatprep.subr.bf16.mxu1 %v7295_v33 }
 0x7e7   :  { %5109 = vmatpush1.bf16.msra.mxu0 %v5868_v34  ;;  %5136 = vmatpush3.bf16.msra.mxu1 %v5937_v19 }
 0x7e8   :  { %5111 = vmatprep.subr.bf16.mxu0 %v5871_v35  ;;  %5137 = vmatprep.subr.bf16.mxu1 %v7295_v33 }
 0x7eb   :  { %5113 = vmatpush1.bf16.msra.mxu0 %v5875_v38  ;;  %5139 = vmatpush3.bf16.msra.mxu1 %v5941_v24 }
 0x7ec   :  { %5115 = vmatprep.subr.bf16.mxu0 %v5878_v41  ;;  %5140 = vmatprep.subr.bf16.mxu1 %v7295_v33 }
 0x7ef   :  { %5117 = vmatpush1.bf16.msra.mxu0 %v5880_v44  ;;  %5142 = vmatpush3.bf16.msra.mxu1 %v5945_v27 }
 0x7f0   :  { %5119 = vmatprep.subr.bf16.mxu0 %v5891_v49  ;;  %5143 = vmatprep.subr.bf16.mxu1 %v7295_v33 }
 0x7f3   :  { %5121 = vmatpush1.bf16.msra.mxu0 %v5893_v52  ;;  %5145 = vmatpush3.bf16.msra.mxu1 %v5949_v32 }
 0x7f4   :  { %5147 = vmatprep.subr.bf16.mxu0 %v5955_v39  ;;  %5211 = vmatprep.subr.bf16.mxu1 %v5957_v45 }
 0x7f6   :  { %2719 = vmatmul.mubr.f32.vlgmr.msra.gmra.mrb[24].mxu0 %v2489_v37  ;;  %3914 = vmatmul.mubr.f32.vlgmr.msra.gmra.mrb[34].mxu1 %v2489_v37  ;;  %v7586_v37 = vld [vmem:[#allocation29_spill] sm:$0xff] }
 0x7f7   :  { %5149 = vmatpush1.bf16.msra.mxu0 %v5959_v46  ;;  %5213 = vmatpush1.bf16.msra.mxu1 %v5962_v50 }
 0x7f8   :  { %5151 = vmatprep.subr.bf16.mxu0 %v5967_v55  ;;  %5215 = vmatprep.subr.bf16.mxu1 %v5969_v59 }
 0x7fb   :  { %5153 = vmatpush1.bf16.msra.mxu0 %v5971_v60  ;;  %5217 = vmatpush1.bf16.msra.mxu1 %v5974_v1 }
 0x7fc   :  { %5155 = vmatprep.subr.bf16.mxu0 %v5981_v11  ;;  %5219 = vmatprep.subr.bf16.mxu1 %v5985_v21 }
 0x7ff   :  { %5157 = vmatpush1.bf16.msra.mxu0 %v5987_v25  ;;  %5221 = vmatpush1.bf16.msra.mxu1 %v5990_v31 }
 0x800   :  { %5159 = vmatprep.subr.bf16.mxu0 %v5995_v40  ;;  %5223 = vmatprep.subr.bf16.mxu1 %v7569_v13 }
 0x803   :  { %5161 = vmatpush1.bf16.msra.mxu0 %v7570_v9  ;;  %5225 = vmatpush1.bf16.msra.mxu1 %v7571_v47 }
 0x804   :  { %5163 = vmatprep.subr.bf16.mxu0 %v7572_v57  ;;  %5227 = vmatprep.subr.bf16.mxu1 %v7573_v4 }
 0x807   :  { %5165 = vmatpush1.bf16.msra.mxu0 %v7574_v26  ;;  %5229 = vmatpush1.bf16.msra.mxu1 %v7575_v20 }
 0x808   :  { %5167 = vmatprep.subr.bf16.mxu0 %v7576_v43  ;;  %5231 = vmatprep.subr.bf16.mxu1 %v7577_v61  ;;  %v7587_v43 = vld [vmem:[#allocation30_spill] sm:$0xff]  ;;  %v7588_v61 = vld [vmem:[#allocation31_spill] sm:$0xff] }
 0x80b   :  { %5169 = vmatpush1.bf16.msra.mxu0 %v7578_v58  ;;  %5233 = vmatpush1.bf16.msra.mxu1 %v7579_v7  ;;  %v7589_v58 = vld [vmem:[#allocation32_spill] sm:$0xff]  ;;  %v7590_v7 = vld [vmem:[#allocation33_spill] sm:$0xff] }
 0x80c   :  { %5171 = vmatprep.subr.bf16.mxu0 %v7580_v63  ;;  %5235 = vmatprep.subr.bf16.mxu1 %v7581_v54  ;;  %v7591_v63 = vld [vmem:[#allocation34_spill] sm:$0xff]  ;;  %v7592_v54 = vld [vmem:[#allocation35_spill] sm:$0xff] }
 0x80f   :  { %5173 = vmatpush1.bf16.msra.mxu0 %v7582_v42  ;;  %5237 = vmatpush1.bf16.msra.mxu1 %v7583_v53  ;;  %v7593_v42 = vld [vmem:[#allocation36_spill] sm:$0xff]  ;;  %v7594_v53 = vld [vmem:[#allocation37_spill] sm:$0xff] }
 0x810   :  { %5175 = vmatprep.subr.bf16.mxu0 %v7584_v48  ;;  %5239 = vmatprep.subr.bf16.mxu1 %v7585_v6  ;;  %v7595_v48 = vld [vmem:[#allocation38_spill] sm:$0xff]  ;;  %v7596_v6 = vld [vmem:[#allocation39_spill] sm:$0xff] }
 0x813   :  { %5177 = vmatpush1.bf16.msra.mxu0 %v7586_v37  ;;  %5241 = vmatpush1.bf16.msra.mxu1 %v7587_v43  ;;  %v7597_v37 = vld [vmem:[#allocation40_spill] sm:$0xff]  ;;  %v7598_v43 = vld [vmem:[#allocation41_spill] sm:$0xff] }
 0x814   :  { %5179 = vmatprep.subr.bf16.mxu0 %v7588_v61  ;;  %5243 = vmatprep.subr.bf16.mxu1 %v7589_v58  ;;  %v7599_v61 = vld [vmem:[#allocation42_spill] sm:$0xff]  ;;  %v7600_v58 = vld [vmem:[#allocation43_spill] sm:$0xff] }
 0x817   :  { %5181 = vmatpush1.bf16.msra.mxu0 %v7590_v7  ;;  %5245 = vmatpush1.bf16.msra.mxu1 %v7591_v63  ;;  %v7601_v7 = vld [vmem:[#allocation44_spill] sm:$0xff]  ;;  %v7602_v63 = vld [vmem:[#allocation45_spill] sm:$0xff] }
 0x818   :  { %5183 = vmatprep.subr.bf16.mxu0 %v7592_v54  ;;  %5247 = vmatprep.subr.bf16.mxu1 %v7593_v42  ;;  %v7603_v54 = vld [vmem:[#allocation46_spill] sm:$0xff]  ;;  %v7604_v42 = vld [vmem:[#allocation47_spill] sm:$0xff] }
 0x81b   :  { %5185 = vmatpush1.bf16.msra.mxu0 %v7594_v53  ;;  %5249 = vmatpush1.bf16.msra.mxu1 %v7595_v48  ;;  %v7605_v53 = vld [vmem:[#allocation48_spill] sm:$0xff]  ;;  %v7606_v48 = vld [vmem:[#allocation49_spill] sm:$0xff] }
 0x81c   :  { %5187 = vmatprep.subr.bf16.mxu0 %v7596_v6  ;;  %5251 = vmatprep.subr.bf16.mxu1 %v7597_v37  ;;  %v7607_v6 = vld [vmem:[#allocation50_spill] sm:$0xff]  ;;  %v7608_v37 = vld [vmem:[#allocation51_spill] sm:$0xff] }
 0x81f   :  { %5189 = vmatpush1.bf16.msra.mxu0 %v7598_v43  ;;  %5253 = vmatpush1.bf16.msra.mxu1 %v7599_v61  ;;  %v7609_v43 = vld [vmem:[#allocation52_spill] sm:$0xff]  ;;  %v7610_v61 = vld [vmem:[#allocation53_spill] sm:$0xff] }
 0x820   :  { %5191 = vmatprep.subr.bf16.mxu0 %v7600_v58  ;;  %5255 = vmatprep.subr.bf16.mxu1 %v7601_v7  ;;  %v7611_v58 = vld [vmem:[#allocation54_spill] sm:$0xff]  ;;  %v7612_v7 = vld [vmem:[#allocation55_spill] sm:$0xff] }
 0x823   :  { %5193 = vmatpush1.bf16.msra.mxu0 %v7602_v63  ;;  %5257 = vmatpush1.bf16.msra.mxu1 %v7603_v54  ;;  %v7613_v63 = vld [vmem:[#allocation56_spill] sm:$0xff]  ;;  %v7614_v54 = vld [vmem:[#allocation57_spill] sm:$0xff] }
 0x824   :  { %5195 = vmatprep.subr.bf16.mxu0 %v7604_v42  ;;  %5259 = vmatprep.subr.bf16.mxu1 %v7605_v53  ;;  %v7615_v42 = vld [vmem:[#allocation58_spill] sm:$0xff]  ;;  %v7616_v53 = vld [vmem:[#allocation59_spill] sm:$0xff] }
 0x827   :  { %5197 = vmatpush1.bf16.msra.mxu0 %v7606_v48  ;;  %5261 = vmatpush1.bf16.msra.mxu1 %v7607_v6  ;;  %v7617_v48 = vld [vmem:[#allocation60_spill] sm:$0xff]  ;;  %v7618_v6 = vld [vmem:[#allocation61_spill] sm:$0xff] }
 0x828   :  { %5199 = vmatprep.subr.bf16.mxu0 %v7608_v37  ;;  %5263 = vmatprep.subr.bf16.mxu1 %v7609_v43  ;;  %v7619_v37 = vld [vmem:[#allocation62_spill] sm:$0xff]  ;;  %v7620_v43 = vld [vmem:[#allocation11_spill] sm:$0xff] }
 0x82b   :  { %5201 = vmatpush1.bf16.msra.mxu0 %v7610_v61  ;;  %5265 = vmatpush1.bf16.msra.mxu1 %v7611_v58  ;;  %v7621_v61 = vld [vmem:[#allocation67_spill] sm:$0xff] }
 0x82c   :  { %5203 = vmatprep.subr.bf16.mxu0 %v7612_v7  ;;  %5267 = vmatprep.subr.bf16.mxu1 %v7613_v63 }
 0x82f   :  { %5205 = vmatpush1.bf16.msra.mxu0 %v7614_v54  ;;  %5269 = vmatpush1.bf16.msra.mxu1 %v7615_v42  ;;  %v7622_v42 = vld [vmem:[#allocation68_spill] sm:$0xff] }
 0x830   :  { %5207 = vmatprep.subr.bf16.mxu0 %v7616_v53  ;;  %5271 = vmatprep.subr.bf16.mxu1 %v7617_v48 }
 0x833   :  { %5209 = vmatpush1.bf16.msra.mxu0 %v7618_v6  ;;  %5273 = vmatpush1.bf16.msra.mxu1 %v7619_v37 }
 0x834   :  { %5275 = vmatprep.subr.bf16.mxu0 %v7620_v43  ;;  %5306 = vmatprep.subr.bf16.mxu1 %v7295_v33 }
 0x8a9   :  { %v2559_v58 = vpop.f32.mrb[22].mxu0  ;;  %v2630_v7 = vpop.f32.mrb[32].mxu1 }
 0x8aa   :  { %v2560_v63 = vadd.f32 %v2559_v58, %v7621_v61  ;;  %v2561_v20 = vpop.f32.mrb[23].mxu0  ;;  %v2632_v54 = vpop.f32.mrb[33].mxu1  ;;  %v2631_v9 = vadd.f32 %v2630_v7, %v6315_v56 }
 0x8ab   :  { %v2562_v4 = vadd.f32 %v2561_v20, %v7622_v42  ;;  %v2633_v43 = vadd.f32 %v2632_v54, %v7568_v51 }
 0x8ac   :  { %v3485_v26 = vmul.f32 -1.442695, %v2560_v63 }
 0x8ad   :  { %v3486_v53 = vmul.f32 -1.442695, %v2562_v4 }
 0x8ae   :  { %5602 = vpow2.f32 %v3485_v26 }
 0x8af   :  { %5604 = vpow2.f32 %v3486_v53 }
 0x8b8   :  { %v5603_v48 = vpop.eup %5602 }
 0x8b9   :  { %v2638_v6 = vadd.f32 1.0, %v5603_v48  ;;  %v5605_v37 = vpop.eup %5604 }
 0x8ba   :  { %v2644_v57 = vadd.f32 1.0, %v5605_v37 }
 0x8bb   :  { %5606 = vrcp.f32 %v2638_v6 }
 0x8bc   :  { %5608 = vrcp.f32 %v2644_v57 }
 0x8c5   :  { %v5607_v47 = vpop.eup %5606 }
 0x8c6   :  { %v2647_v58 = vmul.f32 %v5607_v47, %v2633_v43  ;;  %v5609_v54 = vpop.eup %5608 }
 0x8c7   :  { %v2650_v7 = vsub.f32 1.0, %v5609_v54 }
 0x8c8   :  { %v2648_v61 = vadd.f32 %v2647_v58, %v2631_v9  ;;  %v2652_v9 = vmul.f32 %v5609_v54, %v6793_v0 }
 0x8c9   :  { %v2720_v13 = vpop.f32.mrb[24].mxu0  ;;  %v2791_v63 = vpop.f32.mrb[34].mxu1 }
 0x8ca   :  { %5610 = vtanh.f32 %v2648_v61  ;;  %v2796_v20 = vrot.slane %v2720_v13, 4  ;;  %v2722_v26 = vpop.f32.mrb[25].mxu0  ;;  %v3915_v4 = vpop.f32.mrb[35].mxu1 }
 0x8cb   :  { %v2806_v53 = vrot.slane %v2722_v26, 4 }
 0x8cc   :  { %v2798_v48 = vadd.f32 %v2796_v20, %v7514_v30 }
 0x8cd   :  { %v2808_v6 = vadd.f32 %v2806_v53, %v7515_v15 }
 0x8ce   :  { %v3487_v37 = vmul.f32 -1.442695, %v2798_v48 }
 0x8cf   :  { %v3488_v42 = vmul.f32 -1.442695, %v2808_v6  ;;  %v2824_v6 = vrot.slane %v6799_v3, 6  ;;  %v7659_v3 = vld [vmem:[#allocation48_spill] sm:$0xff] }
 0x8d0   :  { %5612 = vpow2.f32 %v3487_v37 }
 0x8d1   :  { %5614 = vpow2.f32 %v3488_v42  ;;  %v2815_v42 = vadd.f32 %v6676_v62, %v2791_v63  ;;  %v7660_v63 = vld [vmem:[#allocation49_spill] sm:$0xff] }
 0x8d3   :  { %v2817_v53 = vrot.slane %v2815_v42, 4  ;;  %v7665_v42 = vld [vmem:[#allocation54_spill] sm:$0xff] }
 0x8d4   :  { %v5611_v57 = vpop.eup %5610 }
 0x8d5   :  { %v2651_v47 = vmul.f32 %v5611_v57, %v2650_v7 }
 0x8d7   :  { %v6908_v43 = vadd.f32 %v2652_v9, %v2651_v47 }
 0x8d9   :  { %v2829_v13 = vrot.slane %v6908_v43, 4 }
 0x8da   :  { %v5613_v61 = vpop.eup %5612 }
 0x8db   :  { %v5615_v58 = vpop.eup %5614  ;;  %v2802_v26 = vadd.f32 1.0, %v5613_v61  ;;  %v2832_v20 = vrot.slane %v2829_v13, 4 }
 0x8dc   :  { %v2812_v4 = vadd.f32 1.0, %v5615_v58  ;;  %v7661_v58 = vld [vmem:[#allocation50_spill] sm:$0xff] }
 0x8dd   :  { %5616 = vrcp.f32 %v2802_v26  ;;  %2899 = vmatprep.mubr.f32.mxu0 %v2832_v20  ;;  %2970 = vmatprep.mubr.f32.mxu1 %v2832_v20  ;;  %v7662_v26 = vld [vmem:[#allocation51_spill] sm:$0xff]  ;;  %v7663_v20 = vld [vmem:[#allocation52_spill] sm:$0xff] }
 0x8de   :  { %5618 = vrcp.f32 %v2812_v4  ;;  %v7664_v4 = vld [vmem:[#allocation53_spill] sm:$0xff] }
 0x8e7   :  { %v5617_v48 = vpop.eup %5616 }
 0x8e8   :  { %v5619_v0 = vpop.eup %5618  ;;  %v2819_v37 = vmul.f32 %v5617_v48, %v2817_v53  ;;  %v7666_v53 = vld [vmem:[#allocation55_spill] sm:$0xff]  ;;  %v7667_v48 = vld [vmem:[#allocation56_spill] sm:$0xff] }
 0x8e9   :  { %v2826_v54 = vmul.f32 %v5619_v0, %v2824_v6  ;;  %v2822_v57 = vsub.f32 1.0, %v5619_v0  ;;  %v7668_v6 = vld [vmem:[#allocation57_spill] sm:$0xff]  ;;  %v7669_v0 = vld [vmem:[#allocation58_spill] sm:$0xff] }
 0x8ea   :  { %v2820_v7 = vadd.f32 %v2819_v37, %v7516_v18  ;;  %v7670_v37 = vld [vmem:[#allocation59_spill] sm:$0xff] }
 0x8ec   :  { %5620 = vtanh.f32 %v2820_v7  ;;  %v7672_v7 = vld [vmem:[#allocation61_spill] sm:$0xff] }
 0x8f6   :  { %v5621_v47 = vpop.eup %5620 }
 0x8f7   :  { %v2823_v9 = vmul.f32 %v5621_v47, %v2822_v57  ;;  %v7673_v57 = vld [vmem:[#allocation62_spill] sm:$0xff] }
 0x8f9   :  { %v6914_v13 = vadd.f32 %v2826_v54, %v2823_v9  ;;  %v7671_v54 = vld [vmem:[#allocation60_spill] sm:$0xff] }
 0x8fb   :  { %v2831_v61 = vrot.slane %v6914_v13, 4 }
 0x8fd   :  { %2900 = vmatmul.mubr.f32.vlgmr.msra.gmra.mrb[26].mxu0 %v2831_v61  ;;  %2971 = vmatmul.mubr.f32.vlgmr.msra.gmra.mrb[36].mxu1 %v2831_v61 }
 0x8fe   :  { %5277 = vmatpush1.bf16.msra.mxu0 %v5841_v8  ;;  %5308 = vmatpush3.bf16.msra.mxu1 %v5920_v2  ;;  %v7623_v8 = vld [vmem:[#allocation12_spill] sm:$0xff]  ;;  %v7638_v2 = vld [vmem:[#allocation27_spill] sm:$0xff] }
 0x8ff   :  { %5279 = vmatprep.subr.bf16.mxu0 %v5844_v12  ;;  %5309 = vmatprep.subr.bf16.mxu1 %v7295_v33  ;;  %v7624_v12 = vld [vmem:[#allocation13_spill] sm:$0xff] }
 0x900   :  { %3060 = vmatprep.mubr.f32.mxu0 %v7300_v36  ;;  %3948 = vmatprep.mubr.msk.f32.mxu1 %vm5732_vm0, %v7300_v36 }
 0x902   :  { %5281 = vmatpush1.bf16.msra.mxu0 %v5850_v16  ;;  %5311 = vmatpush3.bf16.msra.mxu1 %v5923_v5  ;;  %v7625_v16 = vld [vmem:[#allocation14_spill] sm:$0xff]  ;;  %v7639_v5 = vld [vmem:[#allocation28_spill] sm:$0xff] }
 0x903   :  { %5283 = vmatprep.subr.bf16.mxu0 %v5853_v17  ;;  %5312 = vmatprep.subr.bf16.mxu1 %v7295_v33  ;;  %v7626_v17 = vld [vmem:[#allocation15_spill] sm:$0xff] }
 0x906   :  { %5285 = vmatpush1.bf16.msra.mxu0 %v5856_v22  ;;  %5314 = vmatpush3.bf16.msra.mxu1 %v5929_v10  ;;  %v7627_v22 = vld [vmem:[#allocation16_spill] sm:$0xff]  ;;  %v7640_v10 = vld [vmem:[#allocation29_spill] sm:$0xff] }
 0x907   :  { %5287 = vmatprep.subr.bf16.mxu0 %v5859_v23  ;;  %5315 = vmatprep.subr.bf16.mxu1 %v7295_v33  ;;  %v7628_v23 = vld [vmem:[#allocation17_spill] sm:$0xff] }
 0x90a   :  { %5289 = vmatpush1.bf16.msra.mxu0 %v5862_v28  ;;  %5317 = vmatpush3.bf16.msra.mxu1 %v5933_v14  ;;  %v7629_v28 = vld [vmem:[#allocation18_spill] sm:$0xff] }
 0x90b   :  { %5291 = vmatprep.subr.bf16.mxu0 %v5865_v29  ;;  %5318 = vmatprep.subr.bf16.mxu1 %v7295_v33  ;;  %v7630_v29 = vld [vmem:[#allocation19_spill] sm:$0xff]  ;;  %v7641_v14 = vld [vmem:[#allocation30_spill] sm:$0xff] }
 0x90e   :  { %5293 = vmatpush1.bf16.msra.mxu0 %v5868_v34  ;;  %5320 = vmatpush3.bf16.msra.mxu1 %v5937_v19  ;;  %v7631_v34 = vld [vmem:[#allocation20_spill] sm:$0xff]  ;;  %v7642_v19 = vld [vmem:[#allocation31_spill] sm:$0xff] }
 0x90f   :  { %5295 = vmatprep.subr.bf16.mxu0 %v5871_v35  ;;  %5321 = vmatprep.subr.bf16.mxu1 %v7295_v33  ;;  %v7632_v35 = vld [vmem:[#allocation21_spill] sm:$0xff] }
 0x912   :  { %5297 = vmatpush1.bf16.msra.mxu0 %v5875_v38  ;;  %5323 = vmatpush3.bf16.msra.mxu1 %v5941_v24  ;;  %v7633_v38 = vld [vmem:[#allocation22_spill] sm:$0xff]  ;;  %v7643_v24 = vld [vmem:[#allocation32_spill] sm:$0xff] }
 0x913   :  { %5299 = vmatprep.subr.bf16.mxu0 %v5878_v41  ;;  %5324 = vmatprep.subr.bf16.mxu1 %v7295_v33  ;;  %v7634_v41 = vld [vmem:[#allocation23_spill] sm:$0xff] }
 0x916   :  { %5301 = vmatpush1.bf16.msra.mxu0 %v5880_v44  ;;  %5326 = vmatpush3.bf16.msra.mxu1 %v5945_v27  ;;  %v7635_v44 = vld [vmem:[#allocation24_spill] sm:$0xff]  ;;  %v7644_v27 = vld [vmem:[#allocation33_spill] sm:$0xff] }
 0x917   :  { %5303 = vmatprep.subr.bf16.mxu0 %v5891_v49  ;;  %5327 = vmatprep.subr.bf16.mxu1 %v7295_v33  ;;  %v7636_v49 = vld [vmem:[#allocation25_spill] sm:$0xff] }
 0x91a   :  { %5305 = vmatpush1.bf16.msra.mxu0 %v5893_v52  ;;  %5329 = vmatpush3.bf16.msra.mxu1 %v5949_v32  ;;  %v7637_v52 = vld [vmem:[#allocation26_spill] sm:$0xff] }
 0x91b   :  { %5331 = vmatprep.subr.bf16.mxu0 %v5955_v39  ;;  %5395 = vmatprep.subr.bf16.mxu1 %v5957_v45  ;;  %v7645_v32 = vld [vmem:[#allocation34_spill] sm:$0xff]  ;;  %v7646_v39 = vld [vmem:[#allocation35_spill] sm:$0xff]  ;;  %v7647_v45 = vld [vmem:[#allocation36_spill] sm:$0xff] }
 0x91d   :  { %3061 = vmatmul.mubr.f32.vlgmr.msra.gmra.mrb[28].mxu0 %v2831_v61  ;;  %3949 = vmatmul.mubr.f32.vlgmr.msra.gmra.mrb[38].mxu1 %v2831_v61  ;;  %v7674_v61 = vld [vmem:[#allocation67_spill] sm:$0xff] }
 0x91e   :  { %5333 = vmatpush1.bf16.msra.mxu0 %v5959_v46  ;;  %5397 = vmatpush1.bf16.msra.mxu1 %v5962_v50  ;;  %v7648_v46 = vld [vmem:[#allocation37_spill] sm:$0xff]  ;;  %v7649_v50 = vld [vmem:[#allocation38_spill] sm:$0xff] }
 0x91f   :  { %5335 = vmatprep.subr.bf16.mxu0 %v5967_v55  ;;  %5399 = vmatprep.subr.bf16.mxu1 %v5969_v59  ;;  %v7650_v55 = vld [vmem:[#allocation39_spill] sm:$0xff]  ;;  %v7651_v59 = vld [vmem:[#allocation40_spill] sm:$0xff] }
 0x922   :  { %5337 = vmatpush1.bf16.msra.mxu0 %v5971_v60  ;;  %5401 = vmatpush1.bf16.msra.mxu1 %v5974_v1  ;;  %v7652_v60 = vld [vmem:[#allocation41_spill] sm:$0xff]  ;;  %v7653_v1 = vld [vmem:[#allocation42_spill] sm:$0xff] }
 0x923   :  { %5339 = vmatprep.subr.bf16.mxu0 %v5981_v11  ;;  %5403 = vmatprep.subr.bf16.mxu1 %v5985_v21  ;;  %v7654_v11 = vld [vmem:[#allocation43_spill] sm:$0xff]  ;;  %v7655_v21 = vld [vmem:[#allocation44_spill] sm:$0xff] }
 0x926   :  { %5341 = vmatpush1.bf16.msra.mxu0 %v5987_v25  ;;  %5405 = vmatpush1.bf16.msra.mxu1 %v5990_v31  ;;  %v7656_v25 = vld [vmem:[#allocation45_spill] sm:$0xff]  ;;  %v7657_v31 = vld [vmem:[#allocation46_spill] sm:$0xff] }
 0x927   :  { %5343 = vmatprep.subr.bf16.mxu0 %v5995_v40  ;;  %5407 = vmatprep.subr.bf16.mxu1 %v7623_v8  ;;  %v7658_v40 = vld [vmem:[#allocation47_spill] sm:$0xff] }
 0x92a   :  { %5345 = vmatpush1.bf16.msra.mxu0 %v7624_v12  ;;  %5409 = vmatpush1.bf16.msra.mxu1 %v7625_v16 }
 0x92b   :  { %5347 = vmatprep.subr.bf16.mxu0 %v7626_v17  ;;  %5411 = vmatprep.subr.bf16.mxu1 %v7627_v22  ;;  %v7675_v22 = vld [vmem:[#allocation68_spill] sm:$0xff] }
 0x92e   :  { %5349 = vmatpush1.bf16.msra.mxu0 %v7628_v23  ;;  %5413 = vmatpush1.bf16.msra.mxu1 %v7629_v28 }
 0x92f   :  { %5351 = vmatprep.subr.bf16.mxu0 %v7630_v29  ;;  %5415 = vmatprep.subr.bf16.mxu1 %v7631_v34 }
 0x932   :  { %5353 = vmatpush1.bf16.msra.mxu0 %v7632_v35  ;;  %5417 = vmatpush1.bf16.msra.mxu1 %v7633_v38 }
 0x933   :  { %5355 = vmatprep.subr.bf16.mxu0 %v7634_v41  ;;  %5419 = vmatprep.subr.bf16.mxu1 %v7635_v44 }
 0x936   :  { %5357 = vmatpush1.bf16.msra.mxu0 %v7636_v49  ;;  %5421 = vmatpush1.bf16.msra.mxu1 %v7637_v52 }
 0x937   :  { %5359 = vmatprep.subr.bf16.mxu0 %v7638_v2  ;;  %5423 = vmatprep.subr.bf16.mxu1 %v7639_v5 }
 0x93a   :  { %5361 = vmatpush1.bf16.msra.mxu0 %v7640_v10  ;;  %5425 = vmatpush1.bf16.msra.mxu1 %v7641_v14 }
 0x93b   :  { %5363 = vmatprep.subr.bf16.mxu0 %v7642_v19  ;;  %5427 = vmatprep.subr.bf16.mxu1 %v7643_v24 }
 0x93e   :  { %5365 = vmatpush1.bf16.msra.mxu0 %v7644_v27  ;;  %5429 = vmatpush1.bf16.msra.mxu1 %v7645_v32 }
 0x93f   :  { %5367 = vmatprep.subr.bf16.mxu0 %v7646_v39  ;;  %5431 = vmatprep.subr.bf16.mxu1 %v7647_v45 }
 0x942   :  { %5369 = vmatpush1.bf16.msra.mxu0 %v7648_v46  ;;  %5433 = vmatpush1.bf16.msra.mxu1 %v7649_v50 }
 0x943   :  { %5371 = vmatprep.subr.bf16.mxu0 %v7650_v55  ;;  %5435 = vmatprep.subr.bf16.mxu1 %v7651_v59 }
 0x946   :  { %5373 = vmatpush1.bf16.msra.mxu0 %v7652_v60  ;;  %5437 = vmatpush1.bf16.msra.mxu1 %v7653_v1 }
 0x947   :  { %5375 = vmatprep.subr.bf16.mxu0 %v7654_v11  ;;  %5439 = vmatprep.subr.bf16.mxu1 %v7655_v21 }
 0x94a   :  { %5377 = vmatpush1.bf16.msra.mxu0 %v7656_v25  ;;  %5441 = vmatpush1.bf16.msra.mxu1 %v7657_v31 }
 0x94b   :  { %5379 = vmatprep.subr.bf16.mxu0 %v7658_v40  ;;  %5443 = vmatprep.subr.bf16.mxu1 %v7659_v3 }
 0x94e   :  { %5381 = vmatpush1.bf16.msra.mxu0 %v7660_v63  ;;  %5445 = vmatpush1.bf16.msra.mxu1 %v7661_v58 }
 0x94f   :  { %5383 = vmatprep.subr.bf16.mxu0 %v7662_v26  ;;  %5447 = vmatprep.subr.bf16.mxu1 %v7663_v20  ;;  %v3166_v26 = vrot.slane %v6914_v13, 6  ;;  %v3339_v13 = vld [vmem:[%s7114_s8 + $0x8] sm:$0xff] }
 0x952   :  { %5385 = vmatpush1.bf16.msra.mxu0 %v7664_v4  ;;  %5449 = vmatpush1.bf16.msra.mxu1 %v7665_v42 }
 0x953   :  { %5387 = vmatprep.subr.bf16.mxu0 %v7666_v53  ;;  %5451 = vmatprep.subr.bf16.mxu1 %v7667_v48 }
 0x956   :  { %5389 = vmatpush1.bf16.msra.mxu0 %v7668_v6  ;;  %5453 = vmatpush1.bf16.msra.mxu1 %v7669_v0 }
 0x957   :  { %5391 = vmatprep.subr.bf16.mxu0 %v7670_v37  ;;  %5455 = vmatprep.subr.bf16.mxu1 %v7671_v54  ;;  %v3340_v54 = vld [vmem:[%s7114_s8 + $0x10] sm:$0xff] }
 0x95a   :  { %5393 = vmatpush1.bf16.msra.mxu0 %v7672_v7  ;;  %5457 = vmatpush1.bf16.msra.mxu1 %v7673_v57  ;;  %v3342_v57 = vld [vmem:[%s7114_s8 + $0x20] sm:$0xff] }
 0x95b   :  { %5458 = vmatprep.subr.bf16.mxu0 %v7295_v33 }
 0x9d0   :  { %v2901_v47 = vpop.f32.mrb[26].mxu0  ;;  %v2972_v9 = vpop.f32.mrb[36].mxu1 }
 0x9d1   :  { %v2902_v8 = vadd.f32 %v2901_v47, %v7674_v61  ;;  %v2903_v12 = vpop.f32.mrb[27].mxu0  ;;  %v2974_v16 = vpop.f32.mrb[37].mxu1  ;;  %v2973_v49 = vadd.f32 %v2972_v9, %v6315_v56  ;;  %v3343_v47 = vld [vmem:[%s7114_s8 + $0x28] sm:$0xff] }
 0x9d2   :  { %v2904_v23 = vadd.f32 %v2903_v12, %v7675_v22  ;;  %v2975_v41 = vadd.f32 %v2974_v16, %v7568_v51  ;;  %v5465_v9 = vpack.c.bf16 %v3343_v47, %v3342_v57  ;;  %v3345_v12 = vld [vmem:[%s7114_s8 + $0x38] sm:$0xff] }
 0x9d3   :  { %v3489_v17 = vmul.f32 -1.442695, %v2902_v8  ;;  %v3344_v8 = vld [vmem:[%s7114_s8 + $0x30] sm:$0xff] }
 0x9d4   :  { %v3490_v28 = vmul.f32 -1.442695, %v2904_v23  ;;  %v5468_v16 = vpack.c.bf16 %v3345_v12, %v3344_v8  ;;  %v3347_v23 = vld [vmem:[%s7114_s8 + $0x48] sm:$0xff] }
 0x9d5   :  { %5622 = vpow2.f32 %v3489_v17  ;;  %v3346_v17 = vld [vmem:[%s7114_s8 + $0x40] sm:$0xff] }
 0x9d6   :  { %5624 = vpow2.f32 %v3490_v28  ;;  %v5471_v28 = vpack.c.bf16 %v3347_v23, %v3346_v17 }
 0x9df   :  { %v5623_v29 = vpop.eup %5622 }
 0x9e0   :  { %v2980_v34 = vadd.f32 1.0, %v5623_v29  ;;  %v5625_v35 = vpop.eup %5624  ;;  %v3348_v29 = vld [vmem:[%s7114_s8 + $0x50] sm:$0xff] }
 0x9e1   :  { %v2986_v38 = vadd.f32 1.0, %v5625_v35 }
 0x9e2   :  { %5626 = vrcp.f32 %v2980_v34  ;;  %v3349_v34 = vld [vmem:[%s7114_s8 + $0x58] sm:$0xff] }
 0x9e3   :  { %5628 = vrcp.f32 %v2986_v38  ;;  %v5474_v35 = vpack.c.bf16 %v3349_v34, %v3348_v29  ;;  %v3350_v38 = vld [vmem:[%s7114_s8 + $0x60] sm:$0xff] }
 0x9ec   :  { %v5627_v44 = vpop.eup %5626 }
 0x9ed   :  { %v2989_v52 = vmul.f32 %v5627_v44, %v2975_v41  ;;  %v5629_v50 = vpop.eup %5628  ;;  %v3351_v41 = vld [vmem:[%s7114_s8 + $0x68] sm:$0xff] }
 0x9ee   :  { %v2992_v55 = vsub.f32 1.0, %v5629_v50  ;;  %v2994_v1 = vmul.f32 %v5629_v50, %v6908_v43  ;;  %v5477_v44 = vpack.c.bf16 %v3351_v41, %v3350_v38 }
 0x9ef   :  { %v2990_v2 = vadd.f32 %v2989_v52, %v2973_v49  ;;  %v3352_v49 = vld [vmem:[%s7114_s8 + $0x70] sm:$0xff]  ;;  %v3353_v52 = vld [vmem:[%s7114_s8 + $0x78] sm:$0xff] }
 0x9f0   :  { %v3062_v5 = vpop.f32.mrb[28].mxu0  ;;  %v3133_v10 = vpop.f32.mrb[38].mxu1 }
 0x9f1   :  { %5630 = vtanh.f32 %v2990_v2  ;;  %v3138_v14 = vrot.slane %v3062_v5, 2  ;;  %v3064_v19 = vpop.f32.mrb[29].mxu0  ;;  %v3950_v24 = vpop.f32.mrb[39].mxu1  ;;  %v5480_v2 = vpack.c.bf16 %v3353_v52, %v3352_v49 }
 0x9f2   :  { %v3148_v27 = vrot.slane %v3064_v19, 2 }
 0x9f3   :  { %v3140_v32 = vadd.f32 %v3138_v14, %v7514_v30 }
 0x9f4   :  { %v3150_v39 = vadd.f32 %v3148_v27, %v7515_v15  ;;  %v3157_v15 = vadd.f32 %v6676_v62, %v3133_v10  ;;  %v3338_v62 = vld [vmem:[%s7114_s8] sm:$0xff] }
 0x9f5   :  { %v3491_v45 = vmul.f32 -1.442695, %v3140_v32 }
 0x9f6   :  { %v3492_v46 = vmul.f32 -1.442695, %v3150_v39  ;;  %v3159_v63 = vrot.slane %v3157_v15, 2 }
 0x9f7   :  { %5632 = vpow2.f32 %v3491_v45 }
 0x9f8   :  { %5634 = vpow2.f32 %v3492_v46 }
 0x9fb   :  { %v5631_v59 = vpop.eup %5630 }
 0x9fc   :  { %v2993_v60 = vmul.f32 %v5631_v59, %v2992_v55 }
 0x9fe   :  { %v7022_v11 = vadd.f32 %v2994_v1, %v2993_v60 }
 0xa00   :  { %v3171_v21 = vrot.slane %v7022_v11, 2 }
 0xa01   :  { %v5633_v25 = vpop.eup %5632 }
 0xa02   :  { %v5635_v31 = vpop.eup %5634  ;;  %v3144_v40 = vadd.f32 1.0, %v5633_v25  ;;  %v3174_v30 = vrot.slane %v3171_v21, 6 }
 0xa03   :  { %v3154_v3 = vadd.f32 1.0, %v5635_v31 }
 0xa04   :  { %5636 = vrcp.f32 %v3144_v40  ;;  %3241 = vmatprep.mubr.f32.mxu0 %v3174_v30  ;;  %3312 = vmatprep.mubr.f32.mxu1 %v3174_v30 }
 0xa05   :  { %5638 = vrcp.f32 %v3154_v3 }
 0xa0e   :  { %v5637_v58 = vpop.eup %5636 }
 0xa0f   :  { %v5639_v43 = vpop.eup %5638  ;;  %v3161_v20 = vmul.f32 %v5637_v58, %v3159_v63 }
 0xa10   :  { %v3168_v4 = vmul.f32 %v5639_v43, %v3166_v26  ;;  %v3164_v53 = vsub.f32 1.0, %v5639_v43 }
 0xa11   :  { %v3162_v42 = vadd.f32 %v3161_v20, %v7516_v18  ;;  %v5459_v18 = vpack.c.bf16 %v3339_v13, %v3338_v62 }
 0xa13   :  { %5640 = vtanh.f32 %v3162_v42 }
 0xa1d   :  { %v5641_v48 = vpop.eup %5640 }
 0xa1e   :  { %v3165_v6 = vmul.f32 %v5641_v48, %v3164_v53 }
 0xa20   :  { %v3169_v0 = vadd.f32 %v3168_v4, %v3165_v6 }
 0xa22   :  { %v3173_v37 = vrot.slane %v3169_v0, 6 }
 0xa24   :  { %3242 = vmatmul.mubr.f32.vlgmr.msra.gmra.mrb[30].mxu0 %v3173_v37  ;;  %3313 = vmatmul.mubr.f32.vlgmr.msra.gmra.mrb[40].mxu1 %v3173_v37 }
 0xa25   :  { %3983 = vmatprep.mubr.msk.f32.mxu0 %vm5732_vm0, %v7300_v36  ;;  %5460 = vmatpush3.bf16.msra.mxu0 %v5459_v18  ;;  %v3341_v36 = vld [vmem:[%s7114_s8 + $0x18] sm:$0xff] }
 0xa26   :  { %5461 = vmatprep.subr.bf16.mxu0 %v7295_v33  ;;  %v5462_v7 = vpack.c.bf16 %v3341_v36, %v3340_v54 }
 0xa29   :  { %5463 = vmatpush3.bf16.msra.mxu0 %v5462_v7 }
 0xa2a   :  { %5464 = vmatprep.subr.bf16.mxu0 %v7295_v33 }
 0xa2d   :  { %5466 = vmatpush3.bf16.msra.mxu0 %v5465_v9 }
 0xa2e   :  { %5467 = vmatprep.subr.bf16.mxu0 %v7295_v33 }
 0xa31   :  { %5469 = vmatpush3.bf16.msra.mxu0 %v5468_v16 }
 0xa32   :  { %5470 = vmatprep.subr.bf16.mxu0 %v7295_v33 }
 0xa35   :  { %5472 = vmatpush3.bf16.msra.mxu0 %v5471_v28 }
 0xa36   :  { %5473 = vmatprep.subr.bf16.mxu0 %v7295_v33 }
 0xa39   :  { %5475 = vmatpush3.bf16.msra.mxu0 %v5474_v35 }
 0xa3a   :  { %5476 = vmatprep.subr.bf16.mxu0 %v7295_v33 }
 0xa3d   :  { %5478 = vmatpush3.bf16.msra.mxu0 %v5477_v44 }
 0xa3e   :  { %5479 = vmatprep.subr.bf16.mxu0 %v7295_v33 }
 0xa41   :  { %5481 = vmatpush3.bf16.msra.mxu0 %v5480_v2 }
 0xaf7   :  { %v3243_v5 = vpop.f32.mrb[30].mxu0  ;;  %v3314_v10 = vpop.f32.mrb[40].mxu1 }
 0xaf8   :  { %v3244_v14 = vadd.f32 %v3243_v5, %v7674_v61  ;;  %v3245_v19 = vpop.f32.mrb[31].mxu0  ;;  %v3316_v24 = vpop.f32.mrb[41].mxu1  ;;  %v3315_v60 = vadd.f32 %v3314_v10, %v6315_v56  ;;  %v7676_v56 = vld [vmem:[#allocation63_spill] sm:$0xff] }
 0xaf9   :  { %v3246_v32 = vadd.f32 %v3245_v19, %v7675_v22  ;;  %v3317_v33 = vadd.f32 %v3316_v24, %v7568_v51  ;;  %v3495_v51 = vld [vmem:[%s7118_s12] ss:$0 sm:$0xff] }
 0xafa   :  { %v3493_v27 = vmul.f32 -1.442695, %v3244_v14 }
 0xafb   :  { %v3494_v39 = vmul.f32 -1.442695, %v3246_v32 }
 0xafc   :  { %5642 = vpow2.f32 %v3493_v27 }
 0xafd   :  { %5644 = vpow2.f32 %v3494_v39 }
 0xb06   :  { %v5643_v45 = vpop.eup %5642 }
 0xb07   :  { %v3322_v46 = vadd.f32 1.0, %v5643_v45  ;;  %v5645_v50 = vpop.eup %5644 }
 0xb08   :  { %v3328_v55 = vadd.f32 1.0, %v5645_v50 }
 0xb09   :  { %5646 = vrcp.f32 %v3322_v46 }
 0xb0a   :  { %5648 = vrcp.f32 %v3328_v55 }
 0xb13   :  { %v5647_v59 = vpop.eup %5646 }
 0xb14   :  { %v3331_v61 = vmul.f32 %v5647_v59, %v3317_v33  ;;  %v5649_v21 = vpop.eup %5648 }
 0xb15   :  { %v3334_v25 = vsub.f32 1.0, %v5649_v21  ;;  %v3336_v40 = vmul.f32 %v5649_v21, %v7022_v11 }
 0xb16   :  { %v3332_v1 = vadd.f32 %v3331_v61, %v3315_v60 }
 0xb18   :  { %5650 = vtanh.f32 %v3332_v1 }
 0xb22   :  { %v5651_v22 = vpop.eup %5650 }
 0xb23   :  { %v3335_v31 = vmul.f32 %v5651_v22, %v3334_v25 }
 0xb25   :  { %v3337_v30 = vadd.f32 %v3336_v40, %v3335_v31 }
 0xb27   :  { %3984 = vmatmul.mubr.f32.vlgmr.msra.gmra.mrb[32].mxu0 %v3337_v30 }
 0xbfa   :  { %v3420_v3 = vpop.f32.mrb[32].mxu0 }
 0xbfb   :  { %v3421_v15 = vadd.f32 %v3420_v3, %v7676_v56  ;;  %v3985_v63 = vpop.f32.mrb[33].mxu0 }
 0xbfd   :  { %v3431_v58 = vadd.f32 %v3495_v51, %v3421_v15 }
 0xbff   :  { %3433 = vst.msk [vmem:[#allocation7] sm:$0x3] %vm3432_vm7, %v3431_v58 }
 0xc00   :  { %5708 = shalt.err (!%p5705_p6)
}
 0xc01   :  { %s5709_s12 = scalar_lea.hbm %s7119_s13, 32 }
 0xc02   :  { %p5710_p7 = scmp.ne.s32.totalorder %s7119_s13, %s5709_s12  ;;  %p5713_p8 = scmp.lt.u32.totalorder %s5709_s12, %s7119_s13 }
 0xc04   :  { %p5715_p9 = pnand %p5713_p8, %p5710_p7 }
 0xc06   :  { %5718 = shalt.err (!%p5715_p9)
}
 0xc07   :  { %3443 = dma.vmem_to_hbm [thread:$0]  %s3441_s1, 32, %s7119_s13, [#allocation4]  }
 0xc08   :  { %5723 = dma.done.wait [#allocation4], 32  }
 0xc09   :  { %5724 = vsyncadd [#allocation4], 4294967264 }
 0xc0a   :  { %3447 = vsyncpa [#allocation3], 1 }
 0xc0b   :  { %3448 = vsyncpa [#allocation6], 1 }
 0xc0c   :  { %3449 = vsyncpa [#allocation4], 1 }

</bundles_post_ra>
